<compile_context>
chip_gen: v5e
topology: v5e:2x2
jax: 0.10.0
libtpu: 0.0.40
codegen_flags: <defaults>
</compile_context>

<pallas_src>
import functools

import numpy as np

import jax
import jax.numpy as jnp
from jax.experimental import pallas as pl
from jax.experimental.pallas import tpu as pltpu

BN_EPS = 1e-5
_VMEM = pl.BlockSpec(memory_space=pltpu.MemorySpace.VMEM)


# ------------------------------ in-kernel helper ------------------------------

def _bn_relu(z, gamma, beta):
    """Training-mode BatchNorm (batch stats over rows, biased var) + ReLU, all f32."""
    mean = jnp.mean(z, axis=0, keepdims=True)
    zc = z - mean
    var = jnp.mean(zc * zc, axis=0, keepdims=True)
    return jnp.maximum(zc * jax.lax.rsqrt(var + BN_EPS) * gamma + beta, 0.0)


# -------------------------------- Pallas kernels -------------------------------

def _conv1_kernel(p_ref, w_ref, gb_ref, o_ref):
    """conv1 (im2col matmul) + BN1 + ReLU, fully lane-dense (128 lanes).

    p_ref:  [R, 128]   bf16 patches (R = B*16*16, feature dim zero-padded 48 -> 128)
    w_ref:  [128, 128] bf16 conv1 weight (rows (ki,kj,cin) padded, cols 32 -> 128)
    gb_ref: [2, 128]   f32  row 0 = gamma, row 1 = beta (zero in padded lanes)
    o_ref:  [R, 128]   bf16 activation (lanes >= 32 stay exactly zero)

    Conv bias omitted: training-mode BN subtracts the batch mean -> bias cancels exactly.
    """
    z = jnp.dot(p_ref[...], w_ref[...], preferred_element_type=jnp.float32)
    o_ref[...] = _bn_relu(z, gb_ref[0:1, :], gb_ref[1:2, :]).astype(o_ref.dtype)


def _tail_kernel(p2_ref, w2_ref, w3_ref, w4_ref, wfc_ref, g23_ref, g34_ref,
                 scal_ref, o_ref):
    """Fused conv2 -> conv3 -> conv4 (each + BN + ReLU) -> both FC heads.

    p2_ref:   [B*64, 512]    bf16 conv2 im2col patches, rows (b, oh, ow)
    w2_ref:   [512, 64]      bf16
    w3_ref:   [1024, 128]    bf16
    w4_ref:   [2048, 256]    bf16
    wfc_ref:  [1024, 128]    bf16; row s*256+c = torch flat feature c*4+s,
                             cols = [W_mu | W_log_var | zero pad to 128]
    g23_ref:  [16*16B, 64B]  bf16 0/1 selection ("im2col as matmul") for 8x8 -> 4x4
    g34_ref:  [16*4B, 16B]   bf16 0/1 selection for 4x4 -> 2x2 (output rows (s, b))
    scal_ref: [8, 256]       f32 packed per-channel params: rows 0/1 = bn2 g/b (:64),
                             2/3 = bn3 (:128), 4/5 = bn4 (:256), 6 = fc bias (:128)
    o_ref:    [B, 128]       f32 [mu | log_var | 0 ...]   (lane-dense output)
    """
    f32, bf16 = jnp.float32, jnp.bfloat16
    B = o_ref.shape[0]
    R3, R4 = 16 * B, 4 * B

    # conv2 + BN2 + ReLU
    z = jnp.dot(p2_ref[...], w2_ref[...], preferred_element_type=f32)          # [64B, 64]
    a2 = _bn_relu(z, scal_ref[0:1, 0:64], scal_ref[1:2, 0:64]).astype(bf16)

    # 8x8 -> 4x4 im2col: one 0/1 selection matmul, 16 tap blocks -> lane concat.
    y = jnp.dot(g23_ref[...], a2, preferred_element_type=f32)                  # [16*R3, 64]
    p3 = jnp.concatenate([y[t * R3:(t + 1) * R3, :] for t in range(16)],
                         axis=1).astype(bf16)                                  # [R3, 1024]

    # conv3 + BN3 + ReLU
    z = jnp.dot(p3, w3_ref[...], preferred_element_type=f32)                   # [R3, 128]
    a3 = _bn_relu(z, scal_ref[2:3, 0:128], scal_ref[3:4, 0:128]).astype(bf16)

    # 4x4 -> 2x2 im2col (output rows ordered (s, b) so the FC fold below is static).
    y = jnp.dot(g34_ref[...], a3, preferred_element_type=f32)                  # [16*R4, 128]
    p4 = jnp.concatenate([y[t * R4:(t + 1) * R4, :] for t in range(16)],
                         axis=1).astype(bf16)                                  # [R4, 2048]

    # conv4 + BN4 + ReLU (stay f32 for the FC input statistics).
    z = jnp.dot(p4, w4_ref[...], preferred_element_type=f32)                   # [R4, 256]
    a4 = _bn_relu(z, scal_ref[4:5, 0:256], scal_ref[5:6, 0:256])

    # FC heads: ONE 1024-deep contraction; torch (C,H,W) flatten order + mu/log_var
    # concat are folded into wfc at init.
    xcat = jnp.concatenate([a4[s * B:(s + 1) * B, :] for s in range(4)],
                           axis=1).astype(bf16)                                # [B, 1024]
    o_ref[...] = (jnp.dot(xcat, wfc_ref[...], preferred_element_type=f32)
                  + scal_ref[6:7, 0:128])


# ----------------------------- pallas_call wrappers -----------------------------

def conv1_bn_relu(patches, w, gb):
    R, Kd = patches.shape
    Cout = w.shape[1]
    cost = pl.CostEstimate(
        flops=2 * R * Kd * Cout, transcendentals=Cout,
        bytes_accessed=(R * Kd + Kd * Cout + R * Cout) * 2 + 2 * 128 * 4)
    return pl.pallas_call(
        _conv1_kernel,
        out_shape=jax.ShapeDtypeStruct((R, Cout), jnp.bfloat16),
        in_specs=[_VMEM] * 3,
        out_specs=_VMEM,
        compiler_params=pltpu.CompilerParams(
            allow_input_fusion=[True, False, False]),   # fuse the XLA im2col producer
        cost_estimate=cost,
    )(patches, w, gb)


def encoder_tail(p2, w2, w3, w4, wfc, g23, g34, scal, batch):
    macs = (p2.shape[0] * 512 * 64
            + g23.shape[0] * g23.shape[1] * 64
            + 16 * batch * 1024 * 128
            + g34.shape[0] * g34.shape[1] * 128
            + 4 * batch * 2048 * 256
            + batch * 1024 * 128)
    nbytes = sum(int(np.prod(a.shape)) * a.dtype.itemsize
                 for a in (p2, w2, w3, w4, wfc, g23, g34, scal)) + batch * 128 * 4
    cost = pl.CostEstimate(flops=2 * macs, transcendentals=448, bytes_accessed=nbytes)
    return pl.pallas_call(
        _tail_kernel,
        out_shape=jax.ShapeDtypeStruct((batch, 128), jnp.float32),
        in_specs=[_VMEM] * 8,
        out_specs=_VMEM,
        compiler_params=pltpu.CompilerParams(
            allow_input_fusion=[True] + [False] * 7),    # fuse the conv2-patch producer
        cost_estimate=cost,
    )(p2, w2, w3, w4, wfc, g23, g34, scal)


# ---------------------------------- glue (JAX) ----------------------------------

def _im2col(x_nhwc, k=4, stride=2, pad=1):
    """XLA-side patch extraction: [B,H,W,C] -> ([B*Ho*Wo, k*k*C], (B,Ho,Wo)).
    Row order (b, oh, ow); per-patch feature order (ki, kj, c)."""
    B, H, W, C = x_nhwc.shape
    Ho = (H + 2 * pad - k) // stride + 1
    Wo = (W + 2 * pad - k) // stride + 1
    Hp, Wp = H + 2 * pad, W + 2 * pad
    xp = jnp.pad(x_nhwc, ((0, 0), (pad, pad), (pad, pad), (0, 0)))
    cols = []
    for ki in range(k):
        for kj in range(k):
            cols.append(xp[:, ki:min(ki + stride * Ho, Hp):stride,
                            kj:min(kj + stride * Wo, Wp):stride, :])
    patches = jnp.stack(cols, axis=3).reshape(B, Ho, Wo, k * k * C)
    return patches.reshape(B * Ho * Wo, k * k * C), (B, Ho, Wo)


def _selection_matrix(B, Hi, Wi, spatial_major_out, k=4, stride=2, pad=1):
    """0/1 matrix implementing im2col of a [B*Hi*Wi, C] activation (rows (b,ih,iw)).
    Returns [k*k*R_out, R_in] bf16; tap t=ki*k+kj occupies rows [t*R_out, (t+1)*R_out).
    Output patch rows ordered (b, oh, ow) or, if spatial_major_out, (s=oh*Wo+ow, b).
    Zero rows encode the conv's zero padding."""
    Ho = (Hi + 2 * pad - k) // stride + 1
    Wo = (Wi + 2 * pad - k) // stride + 1
    R_in, R_out = B * Hi * Wi, B * Ho * Wo
    G = np.zeros((k * k, R_out, R_in), np.float32)
    for b in range(B):
        for oh in range(Ho):
            for ow in range(Wo):
                r_out = ((oh * Wo + ow) * B + b) if spatial_major_out \
                    else ((b * Ho + oh) * Wo + ow)
                for ki in range(k):
                    ih = stride * oh + ki - pad
                    if not 0 <= ih < Hi:
                        continue
                    for kj in range(k):
                        iw = stride * ow + kj - pad
                        if not 0 <= iw < Wi:
                            continue
                        G[ki * k + kj, r_out, (b * Hi + ih) * Wi + iw] = 1.0
    return jnp.asarray(G.reshape(k * k * R_out, R_in), jnp.bfloat16)


def init_encoder_params(key, in_channels, latent_dim, batch):
    """Deterministic synthetic parameters in kernel-ready layout.

    Conv weights: [kH,kW,Cin,Cout] flattened to (ki,kj,cin) rows (== PyTorch
    [Cout,Cin,kH,kW] permuted), bf16.  Conv biases are not created (cancelled exactly
    by training-mode BN).  conv1 padded to 128 input rows / 128 output lanes.
    FC: [W_mu | W_log_var] concatenated, zero-padded to 128 lanes, re-indexed from
    torch flat feature c*4+s to kernel row s*256+c.
    """
    assert 2 * latent_dim <= 128, "mu|log_var must fit in 128 output lanes"
    k = 4
    chans = [in_channels, 32, 64, 128, 256]
    keys = jax.random.split(key, 13)
    params = {}
    gammas, betas = [], []
    for li in range(4):
        cin, cout = chans[li], chans[li + 1]
        scale = 1.0 / float(np.sqrt(cin * k * k))
        w = (jax.random.normal(keys[3 * li], (k, k, cin, cout), jnp.float32)
             * scale).reshape(k * k * cin, cout)
        g = 1.0 + 0.05 * jax.random.normal(keys[3 * li + 1], (cout,), jnp.float32)
        b = 0.05 * jax.random.normal(keys[3 * li + 2], (cout,), jnp.float32)
        if li == 0:
            kd_pad = ((k * k * cin + 127) // 128) * 128           # lane-dense K
            w = jnp.pad(w, ((0, kd_pad - k * k * cin), (0, 128 - cout)))
            gb = jnp.zeros((2, 128), jnp.float32)
            params["conv1_w"] = w.astype(jnp.bfloat16)
            params["bn1_gb"] = gb.at[0, :cout].set(g).at[1, :cout].set(b)
        else:
            params[f"conv{li + 1}_w"] = w.astype(jnp.bfloat16)
            gammas.append(g)
            betas.append(b)

    flat_dim = 256 * 2 * 2
    fs = 1.0 / float(np.sqrt(flat_dim))
    kf = jax.random.split(keys[12], 4)
    w_mu = jax.random.normal(kf[0], (flat_dim, latent_dim), jnp.float32) * fs
    b_mu = jax.random.normal(kf[1], (latent_dim,), jnp.float32) * fs
    w_lv = jax.random.normal(kf[2], (flat_dim, latent_dim), jnp.float32) * fs
    b_lv = jax.random.normal(kf[3], (latent_dim,), jnp.float32) * fs
    w_cat = jnp.pad(jnp.concatenate([w_mu, w_lv], axis=1),
                    ((0, 0), (0, 128 - 2 * latent_dim)))           # [1024, 128]
    # torch flat feature c*4 + s  ->  kernel row s*256 + c
    params["fc_w"] = (w_cat.reshape(256, 4, 128).transpose(1, 0, 2)
                      .reshape(flat_dim, 128).astype(jnp.bfloat16))
    b_cat = jnp.pad(jnp.concatenate([b_mu, b_lv]), (0, 128 - 2 * latent_dim))

    # One f32 slab for every small per-channel param of the fused tail kernel.
    scal = jnp.zeros((8, 256), jnp.float32)
    scal = scal.at[0, :64].set(gammas[0]).at[1, :64].set(betas[0])
    scal = scal.at[2, :128].set(gammas[1]).at[3, :128].set(betas[1])
    scal = scal.at[4, :256].set(gammas[2]).at[5, :256].set(betas[2])
    params["scal"] = scal.at[6, :128].set(b_cat)

    # Constant 0/1 gather matrices for the in-kernel im2col transitions (batch-fixed).
    params["g23"] = _selection_matrix(batch, 8, 8, spatial_major_out=False)
    params["g34"] = _selection_matrix(batch, 4, 4, spatial_major_out=True)
    return params


def encoder_forward(params, x_nchw, latent_dim):
    """x_nchw: [B, Cin, 32, 32] float32 -> (mu [B, L], log_var [B, L])."""
    x = jnp.transpose(x_nchw, (0, 2, 3, 1)).astype(jnp.bfloat16)    # NHWC bf16 MXU feed
    p1, (B, Ho, Wo) = _im2col(x)                                    # [B*256, 48]
    p1 = jnp.pad(p1, ((0, 0), (0, params["conv1_w"].shape[0] - p1.shape[1])))
    a1 = conv1_bn_relu(p1, params["conv1_w"], params["bn1_gb"])     # [B*256, 128] bf16
    # conv2 patches from conv1 output; this producer is fused into the tail call.
    p2, _ = _im2col(a1[:, :32].reshape(B, Ho, Wo, 32))              # [B*64, 512]
    out = encoder_tail(p2, params["conv2_w"], params["conv3_w"], params["conv4_w"],
                       params["fc_w"], params["g23"], params["g34"], params["scal"],
                       batch=B)
    return out[:, :latent_dim], out[:, latent_dim:2 * latent_dim]


if __name__ == "__main__":
    batch, in_channels, latent_dim = 2, 3, 16
    H = W = 32            # 32 -> 16 -> 8 -> 4 -> 2; flat_dim = 256*2*2 matches the module

    key = jax.random.PRNGKey(0)
    k_x, k_p = jax.random.split(key)
    x = jax.random.normal(k_x, (batch, in_channels, H, W), jnp.float32)
    params = init_encoder_params(k_p, in_channels, latent_dim, batch)

    fwd = jax.jit(functools.partial(encoder_forward, latent_dim=latent_dim))
    mu, log_var = fwd(params, x)
    jax.block_until_ready((mu, log_var))

    assert mu.shape == (batch, latent_dim) and log_var.shape == (batch, latent_dim)
    assert jnp.all(jnp.isfinite(mu)) and jnp.all(jnp.isfinite(log_var))
    print("KERNEL_OK")
</pallas_src>

<mosaic_0001>
module attributes {stable_mosaic.version = 11 : i64} {
  func.func @_conv1_kernel(%arg0: memref<512x128xbf16, #tpu.memory_space<vmem>>, %arg1: memref<128x128xbf16, #tpu.memory_space<vmem>>, %arg2: memref<2x128xf32, #tpu.memory_space<vmem>>, %arg3: memref<512x128xbf16, #tpu.memory_space<vmem>>) attributes {dimension_semantics = [], scalar_prefetch = 0 : i64, scratch_operands = 0 : i64, tpu.core_type = #tpu.core_type<tc>} {
    %c0 = arith.constant 0 : index
    %c0_0 = arith.constant 0 : index
    %0 = vector.load %arg0[%c0, %c0_0] : memref<512x128xbf16, #tpu.memory_space<vmem>>, vector<512x128xbf16>
    %c0_1 = arith.constant 0 : index
    %c0_2 = arith.constant 0 : index
    %1 = vector.load %arg1[%c0_1, %c0_2] : memref<128x128xbf16, #tpu.memory_space<vmem>>, vector<128x128xbf16>
    %cst = arith.constant dense<0.000000e+00> : vector<512x128xf32>
    %2 = tpu.matmul %0, %1, %cst {dimension_numbers = #tpu.dot_dimension_numbers<[1], [0], [0], [1], [0, 0, 1, 1], [], []>} : vector<512x128xbf16>, vector<128x128xbf16>, vector<512x128xf32> -> vector<512x128xf32>
    %c0_3 = arith.constant 0 : index
    %c0_4 = arith.constant 0 : index
    %3 = vector.load %arg2[%c0_3, %c0_4] : memref<2x128xf32, #tpu.memory_space<vmem>>, vector<1x128xf32>
    %c1 = arith.constant 1 : index
    %c0_5 = arith.constant 0 : index
    %4 = vector.load %arg2[%c1, %c0_5] : memref<2x128xf32, #tpu.memory_space<vmem>>, vector<1x128xf32>
    %cst_6 = arith.constant dense<0.000000e+00> : vector<128xf32>
    %5 = vector.multi_reduction <add>, %2, %cst_6 [0] : vector<512x128xf32> to vector<128xf32>
    %6 = vector.shape_cast %5 : vector<128xf32> to vector<1x128xf32>
    %cst_7 = arith.constant 5.120000e+02 : f32
    %7 = vector.broadcast %cst_7 : f32 to vector<1x128xf32>
    %8 = arith.divf %6, %7 : vector<1x128xf32>
    %9 = vector.broadcast %8 : vector<1x128xf32> to vector<512x128xf32>
    %10 = arith.subf %2, %9 : vector<512x128xf32>
    %11 = arith.mulf %10, %10 : vector<512x128xf32>
    %cst_8 = arith.constant dense<0.000000e+00> : vector<128xf32>
    %12 = vector.multi_reduction <add>, %11, %cst_8 [0] : vector<512x128xf32> to vector<128xf32>
    %13 = vector.shape_cast %12 : vector<128xf32> to vector<1x128xf32>
    %cst_9 = arith.constant 5.120000e+02 : f32
    %14 = vector.broadcast %cst_9 : f32 to vector<1x128xf32>
    %15 = arith.divf %13, %14 : vector<1x128xf32>
    %cst_10 = arith.constant 9.99999974E-6 : f32
    %16 = vector.broadcast %cst_10 : f32 to vector<1x128xf32>
    %17 = arith.addf %15, %16 : vector<1x128xf32>
    %18 = math.rsqrt %17 : vector<1x128xf32>
    %19 = vector.broadcast %18 : vector<1x128xf32> to vector<512x128xf32>
    %20 = arith.mulf %10, %19 : vector<512x128xf32>
    %21 = vector.broadcast %3 : vector<1x128xf32> to vector<512x128xf32>
    %22 = arith.mulf %20, %21 : vector<512x128xf32>
    %23 = vector.broadcast %4 : vector<1x128xf32> to vector<512x128xf32>
    %24 = arith.addf %22, %23 : vector<512x128xf32>
    %cst_11 = arith.constant 0.000000e+00 : f32
    %25 = vector.broadcast %cst_11 : f32 to vector<512x128xf32>
    %26 = arith.maximumf %24, %25 : vector<512x128xf32>
    %27 = arith.truncf %26 : vector<512x128xf32> to vector<512x128xbf16>
    %c0_12 = arith.constant 0 : index
    %c0_13 = arith.constant 0 : index
    %28 = vector.load %arg3[%c0_12, %c0_13] : memref<512x128xbf16, #tpu.memory_space<vmem>>, vector<512x128xbf16>
    tpu.vector_store %arg3[%c0_12, %c0_13], %27 {strides = array<i32>} : memref<512x128xbf16, #tpu.memory_space<vmem>>, vector<512x128xbf16>,
    return
  }
}

module attributes {stable_mosaic.version = 11 : i64} {
  func.func @_tail_kernel(%arg0: memref<128x512xbf16, #tpu.memory_space<vmem>>, %arg1: memref<512x64xbf16, #tpu.memory_space<vmem>>, %arg2: memref<1024x128xbf16, #tpu.memory_space<vmem>>, %arg3: memref<2048x256xbf16, #tpu.memory_space<vmem>>, %arg4: memref<1024x128xbf16, #tpu.memory_space<vmem>>, %arg5: memref<512x128xbf16, #tpu.memory_space<vmem>>, %arg6: memref<128x32xbf16, #tpu.memory_space<vmem>>, %arg7: memref<8x256xf32, #tpu.memory_space<vmem>>, %arg8: memref<2x128xf32, #tpu.memory_space<vmem>>) attributes {dimension_semantics = [], scalar_prefetch = 0 : i64, scratch_operands = 0 : i64, tpu.core_type = #tpu.core_type<tc>} {
    %c0 = arith.constant 0 : index
    %c0_0 = arith.constant 0 : index
    %0 = vector.load %arg0[%c0, %c0_0] : memref<128x512xbf16, #tpu.memory_space<vmem>>, vector<128x512xbf16>
    %c0_1 = arith.constant 0 : index
    %c0_2 = arith.constant 0 : index
    %1 = vector.load %arg1[%c0_1, %c0_2] : memref<512x64xbf16, #tpu.memory_space<vmem>>, vector<512x64xbf16>
    %cst = arith.constant dense<0.000000e+00> : vector<128x64xf32>
    %2 = tpu.matmul %0, %1, %cst {dimension_numbers = #tpu.dot_dimension_numbers<[1], [0], [0], [1], [0, 0, 1, 1], [], []>} : vector<128x512xbf16>, vector<512x64xbf16>, vector<128x64xf32> -> vector<128x64xf32>
    %c0_3 = arith.constant 0 : index
    %c0_4 = arith.constant 0 : index
    %3 = vector.load %arg7[%c0_3, %c0_4] : memref<8x256xf32, #tpu.memory_space<vmem>>, vector<1x64xf32>
    %c1 = arith.constant 1 : index
    %c0_5 = arith.constant 0 : index
    %4 = vector.load %arg7[%c1, %c0_5] : memref<8x256xf32, #tpu.memory_space<vmem>>, vector<1x64xf32>
    %cst_6 = arith.constant dense<0.000000e+00> : vector<64xf32>
    %5 = vector.multi_reduction <add>, %2, %cst_6 [0] : vector<128x64xf32> to vector<64xf32>
    %6 = vector.shape_cast %5 : vector<64xf32> to vector<1x64xf32>
    %cst_7 = arith.constant 1.280000e+02 : f32
    %7 = vector.broadcast %cst_7 : f32 to vector<1x64xf32>
    %8 = arith.divf %6, %7 : vector<1x64xf32>
    %9 = vector.broadcast %8 : vector<1x64xf32> to vector<128x64xf32>
    %10 = arith.subf %2, %9 : vector<128x64xf32>
    %11 = arith.mulf %10, %10 : vector<128x64xf32>
    %cst_8 = arith.constant dense<0.000000e+00> : vector<64xf32>
    %12 = vector.multi_reduction <add>, %11, %cst_8 [0] : vector<128x64xf32> to vector<64xf32>
    %13 = vector.shape_cast %12 : vector<64xf32> to vector<1x64xf32>
    %cst_9 = arith.constant 1.280000e+02 : f32
    %14 = vector.broadcast %cst_9 : f32 to vector<1x64xf32>
    %15 = arith.divf %13, %14 : vector<1x64xf32>
    %cst_10 = arith.constant 9.99999974E-6 : f32
    %16 = vector.broadcast %cst_10 : f32 to vector<1x64xf32>
    %17 = arith.addf %15, %16 : vector<1x64xf32>
    %18 = math.rsqrt %17 : vector<1x64xf32>
    %19 = vector.broadcast %18 : vector<1x64xf32> to vector<128x64xf32>
    %20 = arith.mulf %10, %19 : vector<128x64xf32>
    %21 = vector.broadcast %3 : vector<1x64xf32> to vector<128x64xf32>
    %22 = arith.mulf %20, %21 : vector<128x64xf32>
    %23 = vector.broadcast %4 : vector<1x64xf32> to vector<128x64xf32>
    %24 = arith.addf %22, %23 : vector<128x64xf32>
    %cst_11 = arith.constant 0.000000e+00 : f32
    %25 = vector.broadcast %cst_11 : f32 to vector<128x64xf32>
    %26 = arith.maximumf %24, %25 : vector<128x64xf32>
    %27 = arith.truncf %26 : vector<128x64xf32> to vector<128x64xbf16>
    %c0_12 = arith.constant 0 : index
    %c0_13 = arith.constant 0 : index
    %28 = vector.load %arg5[%c0_12, %c0_13] : memref<512x128xbf16, #tpu.memory_space<vmem>>, vector<512x128xbf16>
    %cst_14 = arith.constant dense<0.000000e+00> : vector<512x64xf32>
    %29 = tpu.matmul %28, %27, %cst_14 {dimension_numbers = #tpu.dot_dimension_numbers<[1], [0], [0], [1], [0, 0, 1, 1], [], []>} : vector<512x128xbf16>, vector<128x64xbf16>, vector<512x64xf32> -> vector<512x64xf32>
    %30 = vector.extract_strided_slice %29 {offsets = [0, 0], sizes = [32, 64], strides = [1, 1]} : vector<512x64xf32> to vector<32x64xf32>
    %31 = vector.extract_strided_slice %29 {offsets = [32, 0], sizes = [32, 64], strides = [1, 1]} : vector<512x64xf32> to vector<32x64xf32>
    %32 = vector.extract_strided_slice %29 {offsets = [64, 0], sizes = [32, 64], strides = [1, 1]} : vector<512x64xf32> to vector<32x64xf32>
    %33 = vector.extract_strided_slice %29 {offsets = [96, 0], sizes = [32, 64], strides = [1, 1]} : vector<512x64xf32> to vector<32x64xf32>
    %34 = vector.extract_strided_slice %29 {offsets = [128, 0], sizes = [32, 64], strides = [1, 1]} : vector<512x64xf32> to vector<32x64xf32>
    %35 = vector.extract_strided_slice %29 {offsets = [160, 0], sizes = [32, 64], strides = [1, 1]} : vector<512x64xf32> to vector<32x64xf32>
    %36 = vector.extract_strided_slice %29 {offsets = [192, 0], sizes = [32, 64], strides = [1, 1]} : vector<512x64xf32> to vector<32x64xf32>
    %37 = vector.extract_strided_slice %29 {offsets = [224, 0], sizes = [32, 64], strides = [1, 1]} : vector<512x64xf32> to vector<32x64xf32>
    %38 = vector.extract_strided_slice %29 {offsets = [256, 0], sizes = [32, 64], strides = [1, 1]} : vector<512x64xf32> to vector<32x64xf32>
    %39 = vector.extract_strided_slice %29 {offsets = [288, 0], sizes = [32, 64], strides = [1, 1]} : vector<512x64xf32> to vector<32x64xf32>
    %40 = vector.extract_strided_slice %29 {offsets = [320, 0], sizes = [32, 64], strides = [1, 1]} : vector<512x64xf32> to vector<32x64xf32>
    %41 = vector.extract_strided_slice %29 {offsets = [352, 0], sizes = [32, 64], strides = [1, 1]} : vector<512x64xf32> to vector<32x64xf32>
    %42 = vector.extract_strided_slice %29 {offsets = [384, 0], sizes = [32, 64], strides = [1, 1]} : vector<512x64xf32> to vector<32x64xf32>
    %43 = vector.extract_strided_slice %29 {offsets = [416, 0], sizes = [32, 64], strides = [1, 1]} : vector<512x64xf32> to vector<32x64xf32>
    %44 = vector.extract_strided_slice %29 {offsets = [448, 0], sizes = [32, 64], strides = [1, 1]} : vector<512x64xf32> to vector<32x64xf32>
    %45 = vector.extract_strided_slice %29 {offsets = [480, 0], sizes = [32, 64], strides = [1, 1]} : vector<512x64xf32> to vector<32x64xf32>
    %46 = tpu.concatenate %30, %31, %32, %33, %34, %35, %36, %37, %38, %39, %40, %41, %42, %43, %44, %45 in 1 : vector<32x64xf32>, vector<32x64xf32>, vector<32x64xf32>, vector<32x64xf32>, vector<32x64xf32>, vector<32x64xf32>, vector<32x64xf32>, vector<32x64xf32>, vector<32x64xf32>, vector<32x64xf32>, vector<32x64xf32>, vector<32x64xf32>, vector<32x64xf32>, vector<32x64xf32>, vector<32x64xf32>, vector<32x64xf32> -> vector<32x1024xf32>
    %47 = arith.truncf %46 : vector<32x1024xf32> to vector<32x1024xbf16>
    %c0_15 = arith.constant 0 : index
    %c0_16 = arith.constant 0 : index
    %48 = vector.load %arg2[%c0_15, %c0_16] : memref<1024x128xbf16, #tpu.memory_space<vmem>>, vector<1024x128xbf16>
    %cst_17 = arith.constant dense<0.000000e+00> : vector<32x128xf32>
    %49 = tpu.matmul %47, %48, %cst_17 {dimension_numbers = #tpu.dot_dimension_numbers<[1], [0], [0], [1], [0, 0, 1, 1], [], []>} : vector<32x1024xbf16>, vector<1024x128xbf16>, vector<32x128xf32> -> vector<32x128xf32>
    %c2 = arith.constant 2 : index
    %c0_18 = arith.constant 0 : index
    %50 = vector.load %arg7[%c2, %c0_18] : memref<8x256xf32, #tpu.memory_space<vmem>>, vector<1x128xf32>
    %c3 = arith.constant 3 : index
    %c0_19 = arith.constant 0 : index
    %51 = vector.load %arg7[%c3, %c0_19] : memref<8x256xf32, #tpu.memory_space<vmem>>, vector<1x128xf32>
    %cst_20 = arith.constant dense<0.000000e+00> : vector<128xf32>
    %52 = vector.multi_reduction <add>, %49, %cst_20 [0] : vector<32x128xf32> to vector<128xf32>
    %53 = vector.shape_cast %52 : vector<128xf32> to vector<1x128xf32>
    %cst_21 = arith.constant 3.200000e+01 : f32
    %54 = vector.broadcast %cst_21 : f32 to vector<1x128xf32>
    %55 = arith.divf %53, %54 : vector<1x128xf32>
    %56 = vector.broadcast %55 : vector<1x128xf32> to vector<32x128xf32>
    %57 = arith.subf %49, %56 : vector<32x128xf32>
    %58 = arith.mulf %57, %57 : vector<32x128xf32>
    %cst_22 = arith.constant dense<0.000000e+00> : vector<128xf32>
    %59 = vector.multi_reduction <add>, %58, %cst_22 [0] : vector<32x128xf32> to vector<128xf32>
    %60 = vector.shape_cast %59 : vector<128xf32> to vector<1x128xf32>
    %cst_23 = arith.constant 3.200000e+01 : f32
    %61 = vector.broadcast %cst_23 : f32 to vector<1x128xf32>
    %62 = arith.divf %60, %61 : vector<1x128xf32>
    %cst_24 = arith.constant 9.99999974E-6 : f32
    %63 = vector.broadcast %cst_24 : f32 to vector<1x128xf32>
    %64 = arith.addf %62, %63 : vector<1x128xf32>
    %65 = math.rsqrt %64 : vector<1x128xf32>
    %66 = vector.broadcast %65 : vector<1x128xf32> to vector<32x128xf32>
    %67 = arith.mulf %57, %66 : vector<32x128xf32>
    %68 = vector.broadcast %50 : vector<1x128xf32> to vector<32x128xf32>
    %69 = arith.mulf %67, %68 : vector<32x128xf32>
    %70 = vector.broadcast %51 : vector<1x128xf32> to vector<32x128xf32>
    %71 = arith.addf %69, %70 : vector<32x128xf32>
    %cst_25 = arith.constant 0.000000e+00 : f32
    %72 = vector.broadcast %cst_25 : f32 to vector<32x128xf32>
    %73 = arith.maximumf %71, %72 : vector<32x128xf32>
    %74 = arith.truncf %73 : vector<32x128xf32> to vector<32x128xbf16>
    %c0_26 = arith.constant 0 : index
    %c0_27 = arith.constant 0 : index
    %75 = vector.load %arg6[%c0_26, %c0_27] : memref<128x32xbf16, #tpu.memory_space<vmem>>, vector<128x32xbf16>
    %cst_28 = arith.constant dense<0.000000e+00> : vector<128x128xf32>
    %76 = tpu.matmul %75, %74, %cst_28 {dimension_numbers = #tpu.dot_dimension_numbers<[1], [0], [0], [1], [0, 0, 1, 1], [], []>} : vector<128x32xbf16>, vector<32x128xbf16>, vector<128x128xf32> -> vector<128x128xf32>
    %77 = vector.extract_strided_slice %76 {offsets = [0, 0], sizes = [8, 128], strides = [1, 1]} : vector<128x128xf32> to vector<8x128xf32>
    %78 = vector.extract_strided_slice %76 {offsets = [8, 0], sizes = [8, 128], strides = [1, 1]} : vector<128x128xf32> to vector<8x128xf32>
    %79 = vector.extract_strided_slice %76 {offsets = [16, 0], sizes = [8, 128], strides = [1, 1]} : vector<128x128xf32> to vector<8x128xf32>
    %80 = vector.extract_strided_slice %76 {offsets = [24, 0], sizes = [8, 128], strides = [1, 1]} : vector<128x128xf32> to vector<8x128xf32>
    %81 = vector.extract_strided_slice %76 {offsets = [32, 0], sizes = [8, 128], strides = [1, 1]} : vector<128x128xf32> to vector<8x128xf32>
    %82 = vector.extract_strided_slice %76 {offsets = [40, 0], sizes = [8, 128], strides = [1, 1]} : vector<128x128xf32> to vector<8x128xf32>
    %83 = vector.extract_strided_slice %76 {offsets = [48, 0], sizes = [8, 128], strides = [1, 1]} : vector<128x128xf32> to vector<8x128xf32>
    %84 = vector.extract_strided_slice %76 {offsets = [56, 0], sizes = [8, 128], strides = [1, 1]} : vector<128x128xf32> to vector<8x128xf32>
    %85 = vector.extract_strided_slice %76 {offsets = [64, 0], sizes = [8, 128], strides = [1, 1]} : vector<128x128xf32> to vector<8x128xf32>
    %86 = vector.extract_strided_slice %76 {offsets = [72, 0], sizes = [8, 128], strides = [1, 1]} : vector<128x128xf32> to vector<8x128xf32>
    %87 = vector.extract_strided_slice %76 {offsets = [80, 0], sizes = [8, 128], strides = [1, 1]} : vector<128x128xf32> to vector<8x128xf32>
    %88 = vector.extract_strided_slice %76 {offsets = [88, 0], sizes = [8, 128], strides = [1, 1]} : vector<128x128xf32> to vector<8x128xf32>
    %89 = vector.extract_strided_slice %76 {offsets = [96, 0], sizes = [8, 128], strides = [1, 1]} : vector<128x128xf32> to vector<8x128xf32>
    %90 = vector.extract_strided_slice %76 {offsets = [104, 0], sizes = [8, 128], strides = [1, 1]} : vector<128x128xf32> to vector<8x128xf32>
    %91 = vector.extract_strided_slice %76 {offsets = [112, 0], sizes = [8, 128], strides = [1, 1]} : vector<128x128xf32> to vector<8x128xf32>
    %92 = vector.extract_strided_slice %76 {offsets = [120, 0], sizes = [8, 128], strides = [1, 1]} : vector<128x128xf32> to vector<8x128xf32>
    %93 = tpu.concatenate %77, %78, %79, %80, %81, %82, %83, %84, %85, %86, %87, %88, %89, %90, %91, %92 in 1 : vector<8x128xf32>, vector<8x128xf32>, vector<8x128xf32>, vector<8x128xf32>, vector<8x128xf32>, vector<8x128xf32>, vector<8x128xf32>, vector<8x128xf32>, vector<8x128xf32>, vector<8x128xf32>, vector<8x128xf32>, vector<8x128xf32>, vector<8x128xf32>, vector<8x128xf32>, vector<8x128xf32>, vector<8x128xf32> -> vector<8x2048xf32>
    %94 = arith.truncf %93 : vector<8x2048xf32> to vector<8x2048xbf16>
    %c0_29 = arith.constant 0 : index
    %c0_30 = arith.constant 0 : index
    %95 = vector.load %arg3[%c0_29, %c0_30] : memref<2048x256xbf16, #tpu.memory_space<vmem>>, vector<2048x256xbf16>
    %cst_31 = arith.constant dense<0.000000e+00> : vector<8x256xf32>
    %96 = tpu.matmul %94, %95, %cst_31 {dimension_numbers = #tpu.dot_dimension_numbers<[1], [0], [0], [1], [0, 0, 1, 1], [], []>} : vector<8x2048xbf16>, vector<2048x256xbf16>, vector<8x256xf32> -> vector<8x256xf32>
    %c4 = arith.constant 4 : index
    %c0_32 = arith.constant 0 : index
    %97 = vector.load %arg7[%c4, %c0_32] : memref<8x256xf32, #tpu.memory_space<vmem>>, vector<1x256xf32>
    %c5 = arith.constant 5 : index
    %c0_33 = arith.constant 0 : index
    %98 = vector.load %arg7[%c5, %c0_33] : memref<8x256xf32, #tpu.memory_space<vmem>>, vector<1x256xf32>
    %cst_34 = arith.constant dense<0.000000e+00> : vector<256xf32>
    %99 = vector.multi_reduction <add>, %96, %cst_34 [0] : vector<8x256xf32> to vector<256xf32>
    %100 = vector.shape_cast %99 : vector<256xf32> to vector<1x256xf32>
    %cst_35 = arith.constant 8.000000e+00 : f32
    %101 = vector.broadcast %cst_35 : f32 to vector<1x256xf32>
    %102 = arith.divf %100, %101 : vector<1x256xf32>
    %103 = vector.broadcast %102 : vector<1x256xf32> to vector<8x256xf32>
    %104 = arith.subf %96, %103 : vector<8x256xf32>
    %105 = arith.mulf %104, %104 : vector<8x256xf32>
    %cst_36 = arith.constant dense<0.000000e+00> : vector<256xf32>
    %106 = vector.multi_reduction <add>, %105, %cst_36 [0] : vector<8x256xf32> to vector<256xf32>
    %107 = vector.shape_cast %106 : vector<256xf32> to vector<1x256xf32>
    %cst_37 = arith.constant 8.000000e+00 : f32
    %108 = vector.broadcast %cst_37 : f32 to vector<1x256xf32>
    %109 = arith.divf %107, %108 : vector<1x256xf32>
    %cst_38 = arith.constant 9.99999974E-6 : f32
    %110 = vector.broadcast %cst_38 : f32 to vector<1x256xf32>
    %111 = arith.addf %109, %110 : vector<1x256xf32>
    %112 = math.rsqrt %111 : vector<1x256xf32>
    %113 = vector.broadcast %112 : vector<1x256xf32> to vector<8x256xf32>
    %114 = arith.mulf %104, %113 : vector<8x256xf32>
    %115 = vector.broadcast %97 : vector<1x256xf32> to vector<8x256xf32>
    %116 = arith.mulf %114, %115 : vector<8x256xf32>
    %117 = vector.broadcast %98 : vector<1x256xf32> to vector<8x256xf32>
    %118 = arith.addf %116, %117 : vector<8x256xf32>
    %cst_39 = arith.constant 0.000000e+00 : f32
    %119 = vector.broadcast %cst_39 : f32 to vector<8x256xf32>
    %120 = arith.maximumf %118, %119 : vector<8x256xf32>
    %121 = vector.extract_strided_slice %120 {offsets = [0, 0], sizes = [2, 256], strides = [1, 1]} : vector<8x256xf32> to vector<2x256xf32>
    %122 = vector.extract_strided_slice %120 {offsets = [2, 0], sizes = [2, 256], strides = [1, 1]} : vector<8x256xf32> to vector<2x256xf32>
    %123 = vector.extract_strided_slice %120 {offsets = [4, 0], sizes = [2, 256], strides = [1, 1]} : vector<8x256xf32> to vector<2x256xf32>
    %124 = vector.extract_strided_slice %120 {offsets = [6, 0], sizes = [2, 256], strides = [1, 1]} : vector<8x256xf32> to vector<2x256xf32>
    %125 = tpu.concatenate %121, %122, %123, %124 in 1 : vector<2x256xf32>, vector<2x256xf32>, vector<2x256xf32>, vector<2x256xf32> -> vector<2x1024xf32>
    %126 = arith.truncf %125 : vector<2x1024xf32> to vector<2x1024xbf16>
    %c0_40 = arith.constant 0 : index
    %c0_41 = arith.constant 0 : index
    %127 = vector.load %arg4[%c0_40, %c0_41] : memref<1024x128xbf16, #tpu.memory_space<vmem>>, vector<1024x128xbf16>
    %cst_42 = arith.constant dense<0.000000e+00> : vector<2x128xf32>
    %128 = tpu.matmul %126, %127, %cst_42 {dimension_numbers = #tpu.dot_dimension_numbers<[1], [0], [0], [1], [0, 0, 1, 1], [], []>} : vector<2x1024xbf16>, vector<1024x128xbf16>, vector<2x128xf32> -> vector<2x128xf32>
    %c6 = arith.constant 6 : index
    %c0_43 = arith.constant 0 : index
    %129 = vector.load %arg7[%c6, %c0_43] : memref<8x256xf32, #tpu.memory_space<vmem>>, vector<1x128xf32>
    %130 = vector.broadcast %129 : vector<1x128xf32> to vector<2x128xf32>
    %131 = arith.addf %128, %130 : vector<2x128xf32>
    %c0_44 = arith.constant 0 : index
    %c0_45 = arith.constant 0 : index
    %132 = vector.load %arg8[%c0_44, %c0_45] : memref<2x128xf32, #tpu.memory_space<vmem>>, vector<2x128xf32>
    tpu.vector_store %arg8[%c0_44, %c0_45], %131 {strides = array<i32>} : memref<2x128xf32, #tpu.memory_space<vmem>>, vector<2x128xf32>,
    return
  }
}

</mosaic_0001>

<bundles_post_ra>
// kernel: encoder_forward.4
= control target key start
LH: loop header
LB: loop body
LE: loop exit
PB: predicated region body
PF: predicated region fallthrough
CT: control target
= control target key end

     0   :  { %s4945_s0 = inlined_call_operand.vmem [shape: bf16[128,128], index: 0, kind: input, shape index: {}]   ;;  %s4946_s1 = inlined_call_operand.vmem [shape: f32[2,128], index: 1, kind: input, shape index: {}]   ;;  %s4947_s2 = inlined_call_operand.vmem [shape: bf16[512,48], index: 2, kind: input, shape index: {}]   ;;  %s4948_s3 = inlined_call_operand.<no memory space> [shape: bf16[], index: 3, kind: input, shape index: {}]   ;;  %s4949_s4 = inlined_call_operand.vmem [shape: bf16[512,128], index: 4, kind: output, shape index: {}]  }
   0x1   :  { %v9_v0 = vstv %s4948_s3 }
   0x2   :  { %v3171_v1 = vunpack.i.l.bf16 %v9_v0 }
   0x3   :  { %v2919_v2 = vld [vmem:[%s4945_s0 + $0x38] sm:$0xff]  ;;  %v32_v3 = vlaneseq  ;;  %v2918_v4 = vld [vmem:[%s4945_s0 + $0x30] sm:$0xff]  ;;  %v29_v5 = vld [vmem:[%s4947_s2] sm:$0xff]  }
   0x4   :  { %1810 = vmatpush.bf16.msra.mxu0 %v2919_v2  ;;  %3111 = vmatpush.bf16.msra.mxu1 %v2919_v2  ;;  %v30_v7 = vunpack.c.l.bf16 %v29_v5  ;;  %v52_v8 = vunpack.c.h.bf16 %v29_v5  ;;  %v2658_v9 = vld [vmem:[%s4947_s2 + $0x8] sm:$0xff]   ;;  %v2916_v21 = vld [vmem:[%s4945_s0 + $0x20] sm:$0xff]  ;;  %v2915_v27 = vld [vmem:[%s4945_s0 + $0x18] sm:$0xff] }
   0x5   :  { %v3182_v6 = vand.u32 127, %v32_v3  ;;  %3112 = vmatpush.bf16.msra.mxu2 %v2919_v2  ;;  %3113 = vmatpush.bf16.msra.mxu3 %v2919_v2  ;;  %v75_v10 = vunpack.c.l.bf16 %v2658_v9  ;;  %v98_v11 = vunpack.c.h.bf16 %v2658_v9  ;;  %v2917_v14 = vld [vmem:[%s4945_s0 + $0x28] sm:$0xff]  ;;  %v2672_v22 = vld [vmem:[%s4947_s2 + $0x40] sm:$0xff]   ;;  %v2660_v30 = vld [vmem:[%s4947_s2 + $0x10] sm:$0xff]  }
   0x6   :  { %v397_v23 = vunpack.c.l.bf16 %v2672_v22  ;;  %v420_v24 = vunpack.c.h.bf16 %v2672_v22  ;;  %v2914_v31 = vld [vmem:[%s4945_s0 + $0x10] sm:$0xff]  ;;  %v121_v32 = vunpack.c.l.bf16 %v2660_v30  ;;  %v144_v33 = vunpack.c.h.bf16 %v2660_v30  ;;  %v2913_v38 = vld [vmem:[%s4945_s0 + $0x8] sm:$0xff]  ;;  %v2912_v39 = vld [vmem:[%s4945_s0] sm:$0xff] }
   0x7   :  { %vm35_vm0 = vcmp.lt.s32.totalorder %v3182_v6, 48  ;;  %v2674_v40 = vld [vmem:[%s4947_s2 + $0x48] sm:$0xff]   ;;  %v2662_v49 = vld [vmem:[%s4947_s2 + $0x18] sm:$0xff]   ;;  %v2688_v54 = vld [vmem:[%s4947_s2 + $0x80] sm:$0xff]  }
   0x8   :  { %v36_v12 = vsel %vm35_vm0, %v30_v7, %v3171_v1  ;;  %v58_v13 = vsel %vm35_vm0, %v52_v8, %v3171_v1  ;;  %1811 = vmatpush.bf16.msra.mxu0 %v2918_v4  ;;  %3114 = vmatpush.bf16.msra.mxu1 %v2918_v4  ;;  %v81_v17 = vsel %vm35_vm0, %v75_v10, %v3171_v1  ;;  %v443_v41 = vunpack.c.l.bf16 %v2674_v40  ;;  %v2676_v63 = vld [vmem:[%s4947_s2 + $0x50] sm:$0xff]   ;;  %v2664_v10 = vld [vmem:[%s4947_s2 + $0x20] sm:$0xff]  }
   0x9   :  { %v37_v15 = vpack.c.bf16 0.0, %v36_v12  ;;  %v60_v16 = vpack.c.bf16 0.0, %v58_v13  ;;  %v104_v18 = vsel %vm35_vm0, %v98_v11, %v3171_v1  ;;  %v83_v19 = vpack.c.bf16 0.0, %v81_v17  ;;  %3115 = vmatpush.bf16.msra.mxu2 %v2918_v4  ;;  %3116 = vmatpush.bf16.msra.mxu3 %v2918_v4 }
   0xa   :  { %v106_v20 = vpack.c.bf16 0.0, %v104_v18  ;;  %v403_v25 = vsel %vm35_vm0, %v397_v23, %v3171_v1  ;;  %v426_v26 = vsel %vm35_vm0, %v420_v24, %v3171_v1  ;;  %v127_v34 = vsel %vm35_vm0, %v121_v32, %v3171_v1 }
   0xb   :  { %40 = vst [vmem:[#allocation7] sm:$0xf] %v37_v15  ;;  %v405_v28 = vpack.c.bf16 0.0, %v403_v25  ;;  %v428_v29 = vpack.c.bf16 0.0, %v426_v26  ;;  %v150_v35 = vsel %vm35_vm0, %v144_v33, %v3171_v1  ;;  %v129_v36 = vpack.c.bf16 0.0, %v127_v34  ;;  %v2678_v25 = vld [vmem:[%s4947_s2 + $0x58] sm:$0xff]  }
   0xc   :  { %63 = vst [vmem:[#allocation7 + $0x4] sm:$0xf] %v60_v16  ;;  %1812 = vmatpush.bf16.msra.mxu0 %v2917_v14  ;;  %3117 = vmatpush.bf16.msra.mxu1 %v2917_v14  ;;  %v152_v37 = vpack.c.bf16 0.0, %v150_v35  ;;  %v466_v42 = vunpack.c.h.bf16 %v2674_v40  ;;  %v449_v45 = vsel %vm35_vm0, %v443_v41, %v3171_v1  ;;  %v167_v50 = vunpack.c.l.bf16 %v2662_v49  ;;  %v2690_v16 = vld [vmem:[%s4947_s2 + $0x88] sm:$0xff]   ;;  %v2692_v40 = vld [vmem:[%s4947_s2 + $0x90] sm:$0xff]   ;;  %v2704_v41 = vld [vmem:[%s4947_s2 + $0xc0] sm:$0xff]  }
   0xd   :  { %86 = vst [vmem:[#allocation7 + $0x8] sm:$0xf] %v83_v19  ;;  %3118 = vmatpush.bf16.msra.mxu2 %v2917_v14  ;;  %3119 = vmatpush.bf16.msra.mxu3 %v2917_v14  ;;  %v451_v47 = vpack.c.bf16 0.0, %v449_v45  ;;  %v190_v51 = vunpack.c.h.bf16 %v2662_v49  ;;  %v765_v57 = vunpack.c.l.bf16 %v2688_v54  ;;  %v788_v58 = vunpack.c.h.bf16 %v2688_v54  ;;  %v2666_v34 = vld [vmem:[%s4947_s2 + $0x28] sm:$0xff]  }
   0xe   :  { %109 = vst [vmem:[#allocation7 + $0xc] sm:$0xf] %v106_v20  ;;  %v472_v46 = vsel %vm35_vm0, %v466_v42, %v3171_v1  ;;  %v173_v52 = vsel %vm35_vm0, %v167_v50, %v3171_v1  ;;  %v489_v0 = vunpack.c.l.bf16 %v2676_v63  ;;  %v512_v2 = vunpack.c.h.bf16 %v2676_v63 }
   0xf   :  { %408 = vst [vmem:[#allocation7 + $0x40] sm:$0xf] %v405_v28  ;;  %v474_v48 = vpack.c.bf16 0.0, %v472_v46  ;;  %v196_v53 = vsel %vm35_vm0, %v190_v51, %v3171_v1  ;;  %v175_v55 = vpack.c.bf16 0.0, %v173_v52  ;;  %v771_v59 = vsel %vm35_vm0, %v765_v57, %v3171_v1 }
  0x10   :  { %1813 = vmatpush.bf16.msra.mxu0 %v2916_v21  ;;  %3120 = vmatpush.bf16.msra.mxu1 %v2916_v21  ;;  %431 = vst [vmem:[#allocation7 + $0x44] sm:$0xf] %v428_v29  ;;  %v198_v56 = vpack.c.bf16 0.0, %v196_v53  ;;  %v794_v60 = vsel %vm35_vm0, %v788_v58, %v3171_v1  ;;  %v773_v61 = vpack.c.bf16 0.0, %v771_v59  ;;  %v495_v5 = vsel %vm35_vm0, %v489_v0, %v3171_v1 }
  0x11   :  { %3121 = vmatpush.bf16.msra.mxu2 %v2916_v21  ;;  %3122 = vmatpush.bf16.msra.mxu3 %v2916_v21  ;;  %132 = vst [vmem:[#allocation7 + $0x10] sm:$0xf] %v129_v36  ;;  %v796_v62 = vpack.c.bf16 0.0, %v794_v60  ;;  %v518_v7 = vsel %vm35_vm0, %v512_v2, %v3171_v1  ;;  %v497_v8 = vpack.c.bf16 0.0, %v495_v5  ;;  %v213_v12 = vunpack.c.l.bf16 %v2664_v10  ;;  %v2668_v2 = vld [vmem:[%s4947_s2 + $0x30] sm:$0xff]  }
  0x12   :  { %155 = vst [vmem:[#allocation7 + $0x14] sm:$0xf] %v152_v37  ;;  %v520_v9 = vpack.c.bf16 0.0, %v518_v7  ;;  %v236_v13 = vunpack.c.h.bf16 %v2664_v10  ;;  %v811_v19 = vunpack.c.l.bf16 %v2690_v16  ;;  %v834_v20 = vunpack.c.h.bf16 %v2690_v16  ;;  %v2694_v10 = vld [vmem:[%s4947_s2 + $0x98] sm:$0xff]  }
  0x13   :  { %v2880_v43 = vld [vmem:[#allocation7] sm:$0xff]  ;;  %454 = vst [vmem:[#allocation7 + $0x48] sm:$0xf] %v451_v47  ;;  %v219_v14 = vsel %vm35_vm0, %v213_v12, %v3171_v1  ;;  %v535_v26 = vunpack.c.l.bf16 %v2678_v25  ;;  %v259_v36 = vunpack.c.l.bf16 %v2666_v34  ;;  %v282_v37 = vunpack.c.h.bf16 %v2666_v34 }
  0x14   :  { %1814 = vmatpush.bf16.msra.mxu0 %v2915_v27  ;;  %3123 = vmatpush.bf16.msra.mxu1 %v2915_v27  ;;  %477 = vst [vmem:[#allocation7 + $0x4c] sm:$0xf] %v474_v48  ;;  %v242_v15 = vsel %vm35_vm0, %v236_v13, %v3171_v1  ;;  %v221_v17 = vpack.c.bf16 0.0, %v219_v14  ;;  %v817_v21 = vsel %vm35_vm0, %v811_v19, %v3171_v1  ;;  %v880_v45 = vunpack.c.h.bf16 %v2692_v40 }
  0x15   :  { %3124 = vmatpush.bf16.msra.mxu2 %v2915_v27  ;;  %3125 = vmatpush.bf16.msra.mxu3 %v2915_v27  ;;  %178 = vst [vmem:[#allocation7 + $0x18] sm:$0xf] %v175_v55  ;;  %v2881_v3 = vld [vmem:[#allocation7 + $0x8] sm:$0xff]  ;;  %v244_v18 = vpack.c.bf16 0.0, %v242_v15  ;;  %v840_v22 = vsel %vm35_vm0, %v834_v20, %v3171_v1  ;;  %v819_v23 = vpack.c.bf16 0.0, %v817_v21  ;;  %v558_v27 = vunpack.c.h.bf16 %v2678_v25 }
  0x16   :  { %201 = vst [vmem:[#allocation7 + $0x1c] sm:$0xf] %v198_v56  ;;  %v842_v24 = vpack.c.bf16 0.0, %v840_v22  ;;  %v541_v30 = vsel %vm35_vm0, %v535_v26, %v3171_v1  ;;  %v1133_v46 = vunpack.c.l.bf16 %v2704_v41  ;;  %v1156_v47 = vunpack.c.h.bf16 %v2704_v41  ;;  %v2680_v56 = vld [vmem:[%s4947_s2 + $0x60] sm:$0xff]   ;;  %v2682_v26 = vld [vmem:[%s4947_s2 + $0x68] sm:$0xff]  }
  0x17   :  { %v2888_v44 = vld [vmem:[#allocation7 + $0x40] sm:$0xff]  ;;  %776 = vst [vmem:[#allocation7 + $0x80] sm:$0xf] %v773_v61  ;;  %v543_v32 = vpack.c.bf16 0.0, %v541_v30  ;;  %v886_v49 = vsel %vm35_vm0, %v880_v45, %v3171_v1  ;;  %v581_v57 = vunpack.c.l.bf16 %v2680_v56  ;;  %v604_v58 = vunpack.c.h.bf16 %v2680_v56 }
  0x18   :  { %1815 = vmatpush.bf16.msra.mxu0 %v2914_v31  ;;  %3126 = vmatpush.bf16.msra.mxu1 %v2914_v31  ;;  %799 = vst [vmem:[#allocation7 + $0x84] sm:$0xf] %v796_v62  ;;  %v888_v51 = vpack.c.bf16 0.0, %v886_v49  ;;  %v1139_v52 = vsel %vm35_vm0, %v1133_v46, %v3171_v1  ;;  %v1162_v53 = vsel %vm35_vm0, %v1156_v47, %v3171_v1  ;;  %v328_v5 = vunpack.c.h.bf16 %v2668_v2 }
  0x19   :  { %3127 = vmatpush.bf16.msra.mxu2 %v2914_v31  ;;  %3128 = vmatpush.bf16.msra.mxu3 %v2914_v31  ;;  %500 = vst [vmem:[#allocation7 + $0x50] sm:$0xf] %v497_v8  ;;  %v2882_v28 = vld [vmem:[#allocation7 + $0x10] sm:$0xff]  ;;  %v564_v31 = vsel %vm35_vm0, %v558_v27, %v3171_v1  ;;  %v1141_v54 = vpack.c.bf16 0.0, %v1139_v52  ;;  %v1164_v55 = vpack.c.bf16 0.0, %v1162_v53  ;;  %v587_v61 = vsel %vm35_vm0, %v581_v57, %v3171_v1 }
  0x1a   :  { %523 = vst [vmem:[#allocation7 + $0x54] sm:$0xf] %v520_v9  ;;  %v566_v33 = vpack.c.bf16 0.0, %v564_v31  ;;  %v610_v62 = vsel %vm35_vm0, %v604_v58, %v3171_v1  ;;  %v589_v63 = vpack.c.bf16 0.0, %v587_v61  ;;  %v334_v9 = vsel %vm35_vm0, %v328_v5, %v3171_v1  ;;  %v2684_v58 = vld [vmem:[%s4947_s2 + $0x70] sm:$0xff]  }
  0x1b   :  { %v2889_v4 = vld [vmem:[#allocation7 + $0x48] sm:$0xff]  ;;  %224 = vst [vmem:[#allocation7 + $0x20] sm:$0xf] %v221_v17  ;;  %v612_v0 = vpack.c.bf16 0.0, %v610_v62  ;;  %v336_v13 = vpack.c.bf16 0.0, %v334_v9  ;;  %v903_v14 = vunpack.c.l.bf16 %v2694_v10  ;;  %v926_v15 = vunpack.c.h.bf16 %v2694_v10 }
  0x1c   :  { %1816 = vmatpush.bf16.msra.mxu0 %v2913_v38  ;;  %3129 = vmatpush.bf16.msra.mxu1 %v2913_v38  ;;  %247 = vst [vmem:[#allocation7 + $0x24] sm:$0xf] %v244_v18  ;;  %v627_v27 = vunpack.c.l.bf16 %v2682_v26 }
  0x1d   :  { %3130 = vmatpush.bf16.msra.mxu2 %v2913_v38  ;;  %3131 = vmatpush.bf16.msra.mxu3 %v2913_v38  ;;  %822 = vst [vmem:[#allocation7 + $0x88] sm:$0xf] %v819_v23  ;;  %v265_v38 = vsel %vm35_vm0, %v259_v36, %v3171_v1  ;;  %v2883_v59 = vld [vmem:[#allocation7 + $0x18] sm:$0xff]  ;;  %v909_v18 = vsel %vm35_vm0, %v903_v14, %v3171_v1 }
  0x1e   :  { %845 = vst [vmem:[#allocation7 + $0x8c] sm:$0xf] %v842_v24  ;;  %v267_v42 = vpack.c.bf16 0.0, %v265_v38  ;;  %v932_v19 = vsel %vm35_vm0, %v926_v15, %v3171_v1  ;;  %v911_v20 = vpack.c.bf16 0.0, %v909_v18  ;;  %v633_v31 = vsel %vm35_vm0, %v627_v27, %v3171_v1 }
  0x1f   :  { %v2896_v11 = vld [vmem:[#allocation7 + $0x80] sm:$0xff]  ;;  %546 = vst [vmem:[#allocation7 + $0x58] sm:$0xf] %v543_v32  ;;  %v934_v21 = vpack.c.bf16 0.0, %v932_v19 }
  0x20   :  { %1817 = vmatpush.bf16.msra.mxu0 %v2912_v39  ;;  %3132 = vmatpush.bf16.msra.mxu1 %v2912_v39  ;;  %569 = vst [vmem:[#allocation7 + $0x5c] sm:$0xf] %v566_v33  ;;  %v635_v33 = vpack.c.bf16 0.0, %v633_v31 }
  0x21   :  { %3133 = vmatpush.bf16.msra.mxu2 %v2912_v39  ;;  %3134 = vmatpush.bf16.msra.mxu3 %v2912_v39  ;;  %v2890_v29 = vld [vmem:[#allocation7 + $0x50] sm:$0xff]  ;;  %v288_v39 = vsel %vm35_vm0, %v282_v37, %v3171_v1  ;;  %270 = vst [vmem:[#allocation7 + $0x28] sm:$0xf] %v267_v42  ;;  %v2696_v42 = vld [vmem:[%s4947_s2 + $0xa0] sm:$0xff]  }
  0x22   :  { %891 = vst [vmem:[#allocation7 + $0x94] sm:$0xf] %v888_v51  ;;  %v949_v46 = vunpack.c.l.bf16 %v2696_v42  ;;  %v972_v47 = vunpack.c.h.bf16 %v2696_v42 }
  0x23   :  { %1818 = vmatmul.bf16.vlgmr.msra.gmra.mxu0 %v2880_v43  ;;  %1858 = vmatmul.bf16.vlgmr.msra.gmra.mxu1 %v2888_v44  ;;  %v290_v43 = vpack.c.bf16 0.0, %v288_v39  ;;  %v857_v44 = vunpack.c.l.bf16 %v2692_v40  ;;  %1144 = vst [vmem:[#allocation7 + $0xc0] sm:$0xf] %v1141_v54 }
  0x24   :  { %1898 = vmatmul.bf16.vlgmr.msra.gmra.mxu2 %v2896_v11  ;;  %1167 = vst [vmem:[#allocation7 + $0xc4] sm:$0xf] %v1164_v55  ;;  %v2706_v11 = vld [vmem:[%s4947_s2 + $0xc8] sm:$0xff]   ;;  %v978_v51 = vsel %vm35_vm0, %v972_v47, %v3171_v1 }
  0x25   :  { %v2897_v35 = vld [vmem:[#allocation7 + $0x88] sm:$0xff]  ;;  %v863_v48 = vsel %vm35_vm0, %v857_v44, %v3171_v1  ;;  %293 = vst [vmem:[#allocation7 + $0x2c] sm:$0xf] %v290_v43  ;;  %v1179_v16 = vunpack.c.l.bf16 %v2706_v11  ;;  %v1202_v17 = vunpack.c.h.bf16 %v2706_v11  ;;  %v2708_v43 = vld [vmem:[%s4947_s2 + $0xd0] sm:$0xff]   ;;  %v980_v53 = vpack.c.bf16 0.0, %v978_v51 }
  0x26   :  { %v865_v50 = vpack.c.bf16 0.0, %v863_v48  ;;  %592 = vst [vmem:[#allocation7 + $0x60] sm:$0xf] %v589_v63  ;;  %v1225_v48 = vunpack.c.l.bf16 %v2708_v43  ;;  %v1248_v49 = vunpack.c.h.bf16 %v2708_v43  ;;  %v2714_v51 = vld [vmem:[%s4947_s2 + $0xe8] sm:$0xff]  }
  0x27   :  { %v2891_v60 = vld [vmem:[#allocation7 + $0x58] sm:$0xff]  ;;  %615 = vst [vmem:[#allocation7 + $0x64] sm:$0xf] %v612_v0  ;;  %v1185_v22 = vsel %vm35_vm0, %v1179_v16, %v3171_v1  ;;  %v1208_v23 = vsel %vm35_vm0, %v1202_v17, %v3171_v1 }
  0x28   :  { %868 = vst [vmem:[#allocation7 + $0x90] sm:$0xf] %v865_v50  ;;  %v1187_v24 = vpack.c.bf16 0.0, %v1185_v22  ;;  %v1210_v25 = vpack.c.bf16 0.0, %v1208_v23  ;;  %v955_v50 = vsel %vm35_vm0, %v949_v46, %v3171_v1  ;;  %v1231_v54 = vsel %vm35_vm0, %v1225_v48, %v3171_v1 }
  0x29   :  { %339 = vst [vmem:[#allocation7 + $0x34] sm:$0xf] %v336_v13  ;;  %v957_v52 = vpack.c.bf16 0.0, %v955_v50  ;;  %v1254_v55 = vsel %vm35_vm0, %v1248_v49, %v3171_v1  ;;  %v1233_v56 = vpack.c.bf16 0.0, %v1231_v54  ;;  %v2702_v50 = vld [vmem:[%s4947_s2 + $0xb8] sm:$0xff]   ;;  %v1363_v54 = vunpack.c.l.bf16 %v2714_v51 }
  0x2a   :  { %914 = vst [vmem:[#allocation7 + $0x98] sm:$0xf] %v911_v20  ;;  %v1256_v57 = vpack.c.bf16 0.0, %v1254_v55  ;;  %v1386_v55 = vunpack.c.h.bf16 %v2714_v51 }
  0x2b   :  { %v2904_v7 = vld [vmem:[#allocation7 + $0xc0] sm:$0xff]  ;;  %937 = vst [vmem:[#allocation7 + $0x9c] sm:$0xf] %v934_v21  ;;  %v2686_v21 = vld [vmem:[%s4947_s2 + $0x78] sm:$0xff]  }
  0x2c   :  { %1938 = vmatmul.bf16.vlgmr.msra.gmra.mxu3 %v2904_v7  ;;  %1190 = vst [vmem:[#allocation7 + $0xc8] sm:$0xf] %v1187_v24  ;;  %v2885_v61 = vld [vmem:[#allocation7 + $0x28] sm:$0xff]  ;;  %v719_v22 = vunpack.c.l.bf16 %v2686_v21  ;;  %v742_v23 = vunpack.c.h.bf16 %v2686_v21 }
  0x2d   :  { %1213 = vst [vmem:[#allocation7 + $0xcc] sm:$0xf] %v1210_v25  ;;  %v2698_v7 = vld [vmem:[%s4947_s2 + $0xa8] sm:$0xff]  }
  0x2e   :  { %v2892_v30 = vld [vmem:[#allocation7 + $0x60] sm:$0xff]  ;;  %638 = vst [vmem:[#allocation7 + $0x68] sm:$0xf] %v635_v33  ;;  %v995_v9 = vunpack.c.l.bf16 %v2698_v7  ;;  %v1018_v10 = vunpack.c.h.bf16 %v2698_v7  ;;  %v748_v27 = vsel %vm35_vm0, %v742_v23, %v3171_v1 }
  0x2f   :  { %960 = vst [vmem:[#allocation7 + $0xa0] sm:$0xf] %v957_v52  ;;  %v2712_v33 = vld [vmem:[%s4947_s2 + $0xe0] sm:$0xff]   ;;  %v1087_v52 = vunpack.c.l.bf16 %v2702_v50 }
  0x30   :  { %983 = vst [vmem:[#allocation7 + $0xa4] sm:$0xf] %v980_v53  ;;  %v1001_v13 = vsel %vm35_vm0, %v995_v9, %v3171_v1  ;;  %v1024_v14 = vsel %vm35_vm0, %v1018_v10, %v3171_v1  ;;  %v1110_v53 = vunpack.c.h.bf16 %v2702_v50 }
  0x31   :  { %1236 = vst [vmem:[#allocation7 + $0xd0] sm:$0xf] %v1233_v56  ;;  %v1003_v17 = vpack.c.bf16 0.0, %v1001_v13  ;;  %v1026_v18 = vpack.c.bf16 0.0, %v1024_v14  ;;  %v1093_v56 = vsel %vm35_vm0, %v1087_v52, %v3171_v1 }
  0x32   :  { %v2899_v36 = vld [vmem:[#allocation7 + $0x98] sm:$0xff]  ;;  %1259 = vst [vmem:[#allocation7 + $0xd4] sm:$0xf] %v1256_v57  ;;  %v1116_v57 = vsel %vm35_vm0, %v1110_v53, %v3171_v1 }
  0x33   :  { %1823 = vmatmul.bf16.gmra.mxu0 %v2881_v3  ;;  %1863 = vmatmul.bf16.gmra.mxu1 %v2889_v4  ;;  %v2898_v3 = vld [vmem:[#allocation7 + $0x90] sm:$0xff]  ;;  %v305_v4 = vunpack.c.l.bf16 %v2668_v2  ;;  %1006 = vst [vmem:[#allocation7 + $0xa8] sm:$0xf] %v1003_v17 }
  0x34   :  { %1903 = vmatmul.bf16.gmra.mxu2 %v2897_v35  ;;  %v2670_v35 = vld [vmem:[%s4947_s2 + $0x38] sm:$0xff]   ;;  %v2905_v39 = vld [vmem:[#allocation7 + $0xc8] sm:$0xff]  ;;  %1029 = vst [vmem:[#allocation7 + $0xac] sm:$0xf] %v1026_v18 }
  0x35   :  { %v311_v8 = vsel %vm35_vm0, %v305_v4, %v3171_v1  ;;  %v351_v37 = vunpack.c.l.bf16 %v2670_v35  ;;  %v374_v38 = vunpack.c.h.bf16 %v2670_v35  ;;  %v2718_v18 = vld [vmem:[%s4947_s2 + $0xf8] sm:$0xff]  }
  0x36   :  { %v313_v12 = vpack.c.bf16 0.0, %v311_v8  ;;  %v2710_v8 = vld [vmem:[%s4947_s2 + $0xd8] sm:$0xff]  }
  0x37   :  { %v357_v40 = vsel %vm35_vm0, %v351_v37, %v3171_v1  ;;  %v380_v41 = vsel %vm35_vm0, %v374_v38, %v3171_v1  ;;  %v2900_v4 = vld [vmem:[#allocation7 + $0xa0] sm:$0xff]  ;;  %v1271_v11 = vunpack.c.l.bf16 %v2710_v8  ;;  %v1340_v37 = vunpack.c.h.bf16 %v2712_v33 }
  0x38   :  { %316 = vst [vmem:[#allocation7 + $0x30] sm:$0xf] %v313_v12  ;;  %v359_v44 = vpack.c.bf16 0.0, %v357_v40  ;;  %v382_v45 = vpack.c.bf16 0.0, %v380_v41  ;;  %v1294_v12 = vunpack.c.h.bf16 %v2710_v8 }
  0x39   :  { %v2906_v5 = vld [vmem:[#allocation7 + $0xd0] sm:$0xff]  ;;  %v1277_v15 = vsel %vm35_vm0, %v1271_v11, %v3171_v1  ;;  %v1346_v41 = vsel %vm35_vm0, %v1340_v37, %v3171_v1 }
  0x3a   :  { %362 = vst [vmem:[#allocation7 + $0x38] sm:$0xf] %v359_v44  ;;  %v1300_v16 = vsel %vm35_vm0, %v1294_v12, %v3171_v1  ;;  %v1279_v19 = vpack.c.bf16 0.0, %v1277_v15 }
  0x3b   :  { %385 = vst [vmem:[#allocation7 + $0x3c] sm:$0xf] %v382_v45  ;;  %v1302_v20 = vpack.c.bf16 0.0, %v1300_v16  ;;  %v1348_v45 = vpack.c.bf16 0.0, %v1346_v41 }
  0x3c   :  { %1943 = vmatmul.bf16.gmra.mxu3 %v2905_v39  ;;  %1282 = vst [vmem:[#allocation7 + $0xd8] sm:$0xf] %v1279_v19  ;;  %v1455_v19 = vunpack.c.l.bf16 %v2718_v18 }
  0x3d   :  { %1305 = vst [vmem:[#allocation7 + $0xdc] sm:$0xf] %v1302_v20  ;;  %v1478_v20 = vunpack.c.h.bf16 %v2718_v18 }
  0x3e   :  { %1351 = vst [vmem:[#allocation7 + $0xe4] sm:$0xf] %v1348_v45 }
  0x3f   :  { %v2886_v24 = vld [vmem:[#allocation7 + $0x30] sm:$0xff]  ;;  %v1484_v23 = vsel %vm35_vm0, %v1478_v20, %v3171_v1 }
  0x42   :  { %v2887_v46 = vld [vmem:[#allocation7 + $0x38] sm:$0xff] }
  0x43   :  { %1828 = vmatmul.bf16.gmra.mxu0 %v2882_v28  ;;  %1868 = vmatmul.bf16.gmra.mxu1 %v2890_v29  ;;  %v650_v28 = vunpack.c.h.bf16 %v2682_v26  ;;  %v2884_v29 = vld [vmem:[#allocation7 + $0x20] sm:$0xff]  ;;  %v725_v26 = vsel %vm35_vm0, %v719_v22, %v3171_v1  ;;  %v1461_v22 = vsel %vm35_vm0, %v1455_v19, %v3171_v1 }
  0x44   :  { %1908 = vmatmul.bf16.gmra.mxu2 %v2898_v3  ;;  %v2907_v31 = vld [vmem:[#allocation7 + $0xd8] sm:$0xff] }
  0x45   :  { %v656_v32 = vsel %vm35_vm0, %v650_v28, %v3171_v1  ;;  %v727_v28 = vpack.c.bf16 0.0, %v725_v26 }
  0x46   :  { %v658_v34 = vpack.c.bf16 0.0, %v656_v32  ;;  %v2700_v32 = vld [vmem:[%s4947_s2 + $0xb0] sm:$0xff]  }
  0x47   :  { %730 = vst [vmem:[#allocation7 + $0x78] sm:$0xf] %v727_v28  ;;  %v1064_v35 = vunpack.c.h.bf16 %v2700_v32 }
  0x48   :  { %661 = vst [vmem:[#allocation7 + $0x6c] sm:$0xf] %v658_v34  ;;  %v1041_v34 = vunpack.c.l.bf16 %v2700_v32 }
  0x49   :  { %v1070_v39 = vsel %vm35_vm0, %v1064_v35, %v3171_v1 }
  0x4a   :  { %v1047_v38 = vsel %vm35_vm0, %v1041_v34, %v3171_v1  ;;  %v1072_v43 = vpack.c.bf16 0.0, %v1070_v39 }
  0x4b   :  { %v1049_v42 = vpack.c.bf16 0.0, %v1047_v38 }
  0x4c   :  { %1948 = vmatmul.bf16.gmra.mxu3 %v2906_v5  ;;  %1075 = vst [vmem:[#allocation7 + $0xb4] sm:$0xf] %v1072_v43  ;;  %v2716_v5 = vld [vmem:[%s4947_s2 + $0xf0] sm:$0xff]  }
  0x4d   :  { %1052 = vst [vmem:[#allocation7 + $0xb0] sm:$0xf] %v1049_v42  ;;  %v1409_v7 = vunpack.c.l.bf16 %v2716_v5  ;;  %v1432_v8 = vunpack.c.h.bf16 %v2716_v5 }
  0x4f   :  { %v2893_v62 = vld [vmem:[#allocation7 + $0x68] sm:$0xff]  ;;  %v1415_v10 = vsel %vm35_vm0, %v1409_v7, %v3171_v1  ;;  %v1438_v11 = vsel %vm35_vm0, %v1432_v8, %v3171_v1 }
  0x50   :  { %v1417_v12 = vpack.c.bf16 0.0, %v1415_v10  ;;  %v1440_v13 = vpack.c.bf16 0.0, %v1438_v11 }
  0x52   :  { %1420 = vst [vmem:[#allocation7 + $0xf0] sm:$0xf] %v1417_v12 }
  0x53   :  { %1833 = vmatmul.bf16.gmra.mxu0 %v2883_v59  ;;  %1873 = vmatmul.bf16.gmra.mxu1 %v2891_v60  ;;  %v673_v59 = vunpack.c.l.bf16 %v2684_v58  ;;  %v696_v60 = vunpack.c.h.bf16 %v2684_v58  ;;  %v1369_v58 = vsel %vm35_vm0, %v1363_v54, %v3171_v1  ;;  %1443 = vst [vmem:[#allocation7 + $0xf4] sm:$0xf] %v1440_v13 }
  0x54   :  { %1913 = vmatmul.bf16.gmra.mxu2 %v2899_v36  ;;  %v1317_v36 = vunpack.c.l.bf16 %v2712_v33  ;;  %v2902_v48 = vld [vmem:[#allocation7 + $0xb0] sm:$0xff] }
  0x55   :  { %v679_v63 = vsel %vm35_vm0, %v673_v59, %v3171_v1  ;;  %v702_v0 = vsel %vm35_vm0, %v696_v60, %v3171_v1  ;;  %v1392_v59 = vsel %vm35_vm0, %v1386_v55, %v3171_v1  ;;  %v1095_v60 = vpack.c.bf16 0.0, %v1093_v56 }
  0x56   :  { %v681_v2 = vpack.c.bf16 0.0, %v679_v63  ;;  %v704_v3 = vpack.c.bf16 0.0, %v702_v0  ;;  %v1323_v40 = vsel %vm35_vm0, %v1317_v36, %v3171_v1  ;;  %v1394_v63 = vpack.c.bf16 0.0, %v1392_v59 }
  0x57   :  { %v1325_v44 = vpack.c.bf16 0.0, %v1323_v40  ;;  %1098 = vst [vmem:[#allocation7 + $0xb8] sm:$0xf] %v1095_v60 }
  0x58   :  { %684 = vst [vmem:[#allocation7 + $0x70] sm:$0xf] %v681_v2 }
  0x59   :  { %707 = vst [vmem:[#allocation7 + $0x74] sm:$0xf] %v704_v3 }
  0x5a   :  { %1328 = vst [vmem:[#allocation7 + $0xe0] sm:$0xf] %v1325_v44  ;;  %v2910_v16 = vld [vmem:[#allocation7 + $0xf0] sm:$0xff] }
  0x5b   :  { %1397 = vst [vmem:[#allocation7 + $0xec] sm:$0xf] %v1394_v63 }
  0x5c   :  { %1953 = vmatmul.bf16.gmra.mxu3 %v2907_v31 }
  0x60   :  { %v2894_v25 = vld [vmem:[#allocation7 + $0x70] sm:$0xff] }
  0x61   :  { %v2908_v49 = vld [vmem:[#allocation7 + $0xe0] sm:$0xff] }
  0x63   :  { %1838 = vmatmul.bf16.gmra.mxu0 %v2884_v29  ;;  %1878 = vmatmul.bf16.gmra.mxu1 %v2892_v30  ;;  %v750_v29 = vpack.c.bf16 0.0, %v748_v27  ;;  %v2901_v30 = vld [vmem:[#allocation7 + $0xa8] sm:$0xff] }
  0x64   :  { %1918 = vmatmul.bf16.gmra.mxu2 %v2900_v4 }
  0x65   :  { %753 = vst [vmem:[#allocation7 + $0x7c] sm:$0xf] %v750_v29 }
  0x6c   :  { %v2895_v47 = vld [vmem:[#allocation7 + $0x78] sm:$0xff]  ;;  %1958 = vmatmul.bf16.gmra.mxu3 %v2908_v49 }
  0x73   :  { %1843 = vmatmul.bf16.gmra.mxu0 %v2885_v61  ;;  %1883 = vmatmul.bf16.gmra.mxu1 %v2893_v62  ;;  %v1118_v61 = vpack.c.bf16 0.0, %v1116_v57  ;;  %v1371_v62 = vpack.c.bf16 0.0, %v1369_v58 }
  0x74   :  { %1923 = vmatmul.bf16.gmra.mxu2 %v2901_v30 }
  0x75   :  { %1121 = vst [vmem:[#allocation7 + $0xbc] sm:$0xf] %v1118_v61 }
  0x76   :  { %1374 = vst [vmem:[#allocation7 + $0xe8] sm:$0xf] %v1371_v62 }
  0x7c   :  { %v2903_v3 = vld [vmem:[#allocation7 + $0xb8] sm:$0xff] }
  0x7d   :  { %v2909_v4 = vld [vmem:[#allocation7 + $0xe8] sm:$0xff] }
  0x7e   :  { %1963 = vmatmul.bf16.gmra.mxu3 %v2909_v4 }
  0x83   :  { %1848 = vmatmul.bf16.gmra.mxu0 %v2886_v24  ;;  %1888 = vmatmul.bf16.gmra.mxu1 %v2894_v25  ;;  %v1463_v24 = vpack.c.bf16 0.0, %v1461_v22  ;;  %v1486_v25 = vpack.c.bf16 0.0, %v1484_v23 }
  0x84   :  { %1928 = vmatmul.bf16.gmra.mxu2 %v2902_v48 }
  0x85   :  { %1466 = vst [vmem:[#allocation7 + $0xf8] sm:$0xf] %v1463_v24 }
  0x86   :  { %1489 = vst [vmem:[#allocation7 + $0xfc] sm:$0xf] %v1486_v25 }
  0x8d   :  { %v2911_v29 = vld [vmem:[#allocation7 + $0xf8] sm:$0xff] }
  0x8e   :  { %1968 = vmatmul.bf16.gmra.mxu3 %v2910_v16 }
  0x93   :  { %1853 = vmatmul.bf16.gmra.mxu0 %v2887_v46  ;;  %1893 = vmatmul.bf16.gmra.mxu1 %v2895_v47 }
  0x94   :  { %1933 = vmatmul.bf16.gmra.mxu2 %v2903_v3 }
  0x9e   :  { %1973 = vmatmul.bf16.gmra.mxu3 %v2911_v29 }
  0xa0   :  { %v3470_v0 = vpop.f32.mrf.mxu0  ;;  %v3472_v2 = vpop.f32.mrf.mxu1 }
  0xa7   :  { %v3506_v28 = vpop.f32.mrf.mxu2 }
  0xa8   :  { %v3477_v9 = vpop.f32.mrf.mxu0  ;;  %v3485_v14 = vpop.f32.mrf.mxu1  ;;  %4987 = vst [vmem:[#allocation8_spill] sm:$0xff] %v3506_v28 }
  0xa9   :  { %v1981_v49 = vadd.f32 %v3477_v9, %v3470_v0 }
  0xaf   :  { %v3512_v32 = vpop.f32.mrf.mxu2  ;;  %v3528_v38 = vpop.f32.mrf.mxu3 }
  0xb0   :  { %v3487_v15 = vpop.f32.mrf.mxu0  ;;  %v3489_v17 = vpop.f32.mrf.mxu1  ;;  %4988 = vst [vmem:[#allocation9_spill] sm:$0xff] %v3512_v32 }
  0xb1   :  { %4989 = vst [vmem:[#allocation10_spill] sm:$0xff] %v3528_v38  ;;  %v1982_v51 = vadd.f32 %v1981_v49, %v3487_v15 }
  0xb7   :  { %v3518_v33 = vpop.f32.mrf.mxu2  ;;  %v3536_v42 = vpop.f32.mrf.mxu3 }
  0xb8   :  { %v3494_v21 = vpop.f32.mrf.mxu0  ;;  %v3504_v27 = vpop.f32.mrf.mxu1 }
  0xb9   :  { %v1983_v54 = vadd.f32 %v1982_v51, %v3494_v21 }
  0xbf   :  { %v3526_v37 = vpop.f32.mrf.mxu2  ;;  %v3544_v46 = vpop.f32.mrf.mxu3 }
  0xc0   :  { %v3502_v26 = vpop.f32.mrf.mxu0  ;;  %v3510_v31 = vpop.f32.mrf.mxu1 }
  0xc1   :  { %v1984_v55 = vadd.f32 %v1983_v54, %v3502_v26 }
  0xc7   :  { %v3534_v41 = vpop.f32.mrf.mxu2  ;;  %v3557_v53 = vpop.f32.mrf.mxu3 }
  0xc8   :  { %v3508_v30 = vpop.f32.mrf.mxu0  ;;  %v3516_v1 = vpop.f32.mrf.mxu1 }
  0xc9   :  { %v1985_v56 = vadd.f32 %v1984_v55, %v3508_v30 }
  0xcf   :  { %v3542_v45 = vpop.f32.mrf.mxu2  ;;  %v3570_v62 = vpop.f32.mrf.mxu3 }
  0xd0   :  { %v3514_v6 = vpop.f32.mrf.mxu0  ;;  %v3522_v35 = vpop.f32.mrf.mxu1  ;;  %4990 = vst [vmem:[#allocation11_spill] sm:$0xff] %v3542_v45 }
  0xd1   :  { %v1986_v58 = vadd.f32 %v1985_v56, %v3514_v6  ;;  %4993 = vst [vmem:[#allocation14_spill] sm:$0xff] %v3570_v62 }
  0xd7   :  { %v3552_v50 = vpop.f32.mrf.mxu2  ;;  %v3583_v12 = vpop.f32.mrf.mxu3 }
  0xd8   :  { %v3520_v34 = vpop.f32.mrf.mxu0  ;;  %v3532_v40 = vpop.f32.mrf.mxu1  ;;  %4991 = vst [vmem:[#allocation12_spill] sm:$0xff] %v3552_v50 }
  0xd9   :  { %v1987_v61 = vadd.f32 %v1986_v58, %v3520_v34  ;;  %4994 = vst [vmem:[#allocation15_spill] sm:$0xff] %v3583_v12 }
  0xdf   :  { %v3567_v60 = vpop.f32.mrf.mxu2  ;;  %v3596_v25 = vpop.f32.mrf.mxu3 }
  0xe0   :  { %v3524_v36 = vpop.f32.mrf.mxu0  ;;  %v3540_v44 = vpop.f32.mrf.mxu1  ;;  %4992 = vst [vmem:[#allocation13_spill] sm:$0xff] %v3567_v60 }
  0xe1   :  { %v1988_v63 = vadd.f32 %v1987_v61, %v3524_v36  ;;  %4995 = vst [vmem:[#allocation16_spill] sm:$0xff] %v3596_v25 }
  0xe7   :  { %v3580_v10 = vpop.f32.mrf.mxu2  ;;  %v3607_v61 = vpop.f32.mrf.mxu3 }
  0xe8   :  { %v3530_v39 = vpop.f32.mrf.mxu0  ;;  %v3548_v48 = vpop.f32.mrf.mxu1  ;;  %4997 = vst [vmem:[#allocation18_spill] sm:$0xff] %v3607_v61 }
  0xe9   :  { %v1989_v3 = vadd.f32 %v1988_v63, %v3530_v39 }
  0xef   :  { %v3593_v23 = vpop.f32.mrf.mxu2 }
  0xf0   :  { %v3538_v43 = vpop.f32.mrf.mxu0  ;;  %v3562_v57 = vpop.f32.mrf.mxu1 }
  0xf1   :  { %v1990_v4 = vadd.f32 %v1989_v3, %v3538_v43 }
  0xf7   :  { %v3604_v56 = vpop.f32.mrf.mxu2 }
  0xf8   :  { %v3546_v47 = vpop.f32.mrf.mxu0  ;;  %v3577_v7 = vpop.f32.mrf.mxu1  ;;  %4996 = vst [vmem:[#allocation17_spill] sm:$0xff] %v3604_v56 }
  0xf9   :  { %v1991_v8 = vadd.f32 %v1990_v4, %v3546_v47 }
 0x100   :  { %v3555_v52 = vpop.f32.mrf.mxu0  ;;  %v3590_v20 = vpop.f32.mrf.mxu1 }
 0x101   :  { %v1992_v11 = vadd.f32 %v1991_v8, %v3555_v52 }
 0x108   :  { %v3565_v59 = vpop.f32.mrf.mxu0  ;;  %v3601_v54 = vpop.f32.mrf.mxu1 }
 0x109   :  { %v1993_v13 = vadd.f32 %v1992_v11, %v3565_v59 }
 0x110   :  { %v3575_v5 = vpop.f32.mrf.mxu0  ;;  %v3612_v8 = vpop.f32.mrf.mxu1 }
 0x111   :  { %v1994_v16 = vadd.f32 %v1993_v13, %v3575_v5  ;;  %4998 = vst [vmem:[#allocation19_spill] sm:$0xff] %v3612_v8  ;;  %v3615_v13 = vpop.f32.mrf.mxu2 }
 0x112   :  { %4999 = vst [vmem:[#allocation20_spill] sm:$0xff] %v3615_v13 }
 0x118   :  { %v3587_v18 = vpop.f32.mrf.mxu0 }
 0x119   :  { %v1995_v19 = vadd.f32 %v1994_v16, %v3587_v18 }
 0x11b   :  { %v1996_v22 = vadd.f32 %v1995_v19, %v3472_v2  ;;  %v3618_v19 = vpop.f32.mrf.mxu3 }
 0x11c   :  { %5000 = vst [vmem:[#allocation21_spill] sm:$0xff] %v3618_v19 }
 0x11d   :  { %v1997_v24 = vadd.f32 %v1996_v22, %v3485_v14 }
 0x11f   :  { %v1998_v29 = vadd.f32 %v1997_v24, %v3489_v17 }
 0x121   :  { %v1999_v49 = vadd.f32 %v1998_v29, %v3504_v27 }
 0x123   :  { %v2000_v51 = vadd.f32 %v1999_v49, %v3510_v31  ;;  %v3623_v49 = vpop.f32.mrf.mxu1 }
 0x125   :  { %v2001_v55 = vadd.f32 %v2000_v51, %v3516_v1 }
 0x127   :  { %v2002_v58 = vadd.f32 %v2001_v55, %v3522_v35  ;;  %v3626_v55 = vpop.f32.mrf.mxu2 }
 0x129   :  { %v2003_v63 = vadd.f32 %v2002_v58, %v3532_v40 }
 0x12b   :  { %v2004_v3 = vadd.f32 %v2003_v63, %v3540_v44  ;;  %v3629_v63 = vpop.f32.mrf.mxu3 }
 0x12c   :  { %5001 = vst [vmem:[#allocation22_spill] sm:$0xff] %v3629_v63 }
 0x12d   :  { %v2005_v4 = vadd.f32 %v2004_v3, %v3548_v48 }
 0x12f   :  { %v2006_v11 = vadd.f32 %v2005_v4, %v3562_v57 }
 0x131   :  { %v2007_v16 = vadd.f32 %v2006_v11, %v3577_v7 }
 0x133   :  { %v2008_v22 = vadd.f32 %v2007_v16, %v3590_v20 }
 0x135   :  { %v2009_v24 = vadd.f32 %v2008_v22, %v3601_v54  ;;  %v3635_v22 = vpop.f32.mrf.mxu2 }
 0x137   :  { %v2010_v29 = vadd.f32 %v2009_v24, %v3612_v8  ;;  %v3638_v8 = vpop.f32.mrf.mxu3 }
 0x138   :  { %5002 = vst [vmem:[#allocation23_spill] sm:$0xff] %v3638_v8 }
 0x139   :  { %v2011_v51 = vadd.f32 %v2010_v29, %v3623_v49 }
 0x13b   :  { %v2012_v58 = vadd.f32 %v2011_v51, %v3506_v28 }
 0x13d   :  { %v2013_v3 = vadd.f32 %v2012_v58, %v3512_v32  ;;  %v3644_v32 = vpop.f32.mrf.mxu2 }
 0x13f   :  { %v2014_v4 = vadd.f32 %v2013_v3, %v3518_v33 }
 0x141   :  { %v2015_v11 = vadd.f32 %v2014_v4, %v3526_v37  ;;  %v3647_v4 = vpop.f32.mrf.mxu3 }
 0x143   :  { %v2016_v16 = vadd.f32 %v2015_v11, %v3534_v41 }
 0x145   :  { %v2017_v24 = vadd.f32 %v2016_v16, %v3542_v45 }
 0x147   :  { %v2018_v29 = vadd.f32 %v2017_v24, %v3552_v50  ;;  %v1936_v50 = vpop.f32.mrf.mxu2 }
 0x149   :  { %v2019_v51 = vadd.f32 %v2018_v29, %v3567_v60  ;;  %v3653_v60 = vpop.f32.mrf.mxu3 }
 0x14a   :  { %5003 = vst [vmem:[#allocation24_spill] sm:$0xff] %v3653_v60 }
 0x14b   :  { %v2020_v28 = vadd.f32 %v2019_v51, %v3580_v10 }
 0x14d   :  { %v2021_v58 = vadd.f32 %v2020_v28, %v3593_v23 }
 0x14f   :  { %v2022_v3 = vadd.f32 %v2021_v58, %v3604_v56 }
 0x151   :  { %v2023_v11 = vadd.f32 %v2022_v3, %v3615_v13  ;;  %v3660_v13 = vpop.f32.mrf.mxu3 }
 0x153   :  { %v2024_v16 = vadd.f32 %v2023_v11, %v3626_v55 }
 0x155   :  { %v2025_v45 = vadd.f32 %v2024_v16, %v3635_v22 }
 0x157   :  { %v2026_v24 = vadd.f32 %v2025_v45, %v3644_v32 }
 0x159   :  { %v2027_v29 = vadd.f32 %v2026_v24, %v1936_v50 }
 0x15b   :  { %v2028_v28 = vadd.f32 %v2027_v29, %v3528_v38  ;;  %v3667_v38 = vpop.f32.mrf.mxu3 }
 0x15d   :  { %v2029_v51 = vadd.f32 %v2028_v28, %v3536_v42 }
 0x15f   :  { %v2030_v58 = vadd.f32 %v2029_v51, %v3544_v46 }
 0x161   :  { %v2031_v56 = vadd.f32 %v2030_v58, %v3557_v53  ;;  %v3142_v58 = vmov 512.0  }
 0x162   :  { %3138 = vrcp.f32 %v3142_v58 }
 0x163   :  { %v2032_v3 = vadd.f32 %v2031_v56, %v3570_v62 }
 0x165   :  { %v2033_v11 = vadd.f32 %v2032_v3, %v3583_v12 }
 0x167   :  { %v2034_v45 = vadd.f32 %v2033_v11, %v3596_v25  ;;  %v1976_v25 = vpop.f32.mrf.mxu3 }
 0x169   :  { %v2035_v16 = vadd.f32 %v2034_v45, %v3607_v61  ;;  %v3139_v61 = vpop.eup %3138 }
 0x16a   :  { %vm2055_vm1 = vweird.f32 %v3139_v61 }
 0x16b   :  { %v2036_v24 = vadd.f32 %v2035_v16, %v3618_v19 }
 0x16d   :  { %v2037_v29 = vadd.f32 %v2036_v24, %v3629_v63  ;;  %v2051_v24 = vmul.f32 512.0, %v3139_v61 }
 0x16f   :  { %v2038_v28 = vadd.f32 %v2037_v29, %v3638_v8  ;;  %v2052_v12 = vsub.f32 1.0, %v2051_v24 }
 0x171   :  { %v2039_v51 = vadd.f32 %v2038_v28, %v3647_v4  ;;  %v2053_v29 = vmul.f32 %v3139_v61, %v2052_v12 }
 0x173   :  { %v2040_v56 = vadd.f32 %v2039_v51, %v3653_v60  ;;  %v2054_v28 = vadd.f32 %v3139_v61, %v2053_v29 }
 0x175   :  { %v2041_v3 = vadd.f32 %v2040_v56, %v3660_v13  ;;  %v3674_v60 = vsel %vm2055_vm1, %v3139_v61, %v2054_v28 }
 0x177   :  { %v2042_v11 = vadd.f32 %v2041_v3, %v3667_v38 }
 0x179   :  { %v2043_v45 = vadd.f32 %v2042_v11, %v1976_v25 }
 0x17b   :  { %v2044_v16 = vrot.slane %v2043_v45, 4 }
 0x17d   :  { %v2045_v19 = vadd.f32 %v2044_v16, %v2043_v45 }
 0x17f   :  { %v2046_v63 = vrot.slane %v2045_v19, 2 }
 0x181   :  { %v2047_v62 = vadd.f32 %v2046_v63, %v2045_v19 }
 0x183   :  { %v2048_v8 = vrot.slane %v2047_v62, 1 }
 0x185   :  { %v2049_v51 = vadd.f32 %v2048_v8, %v2047_v62 }
 0x187   :  { %v3677_v56 = vmul.f32 %v3674_v60, %v2049_v51 }
 0x189   :  { %v3680_v58 = vsub.f32 %v1936_v50, %v3677_v56  ;;  %v3683_v3 = vsub.f32 %v1976_v25, %v3677_v56  ;;  %v3687_v11 = vsub.f32 %v3470_v0, %v3677_v56  ;;  %v3691_v12 = vsub.f32 %v3477_v9, %v3677_v56 }
 0x18a   :  { %v3695_v62 = vsub.f32 %v3487_v15, %v3677_v56  ;;  %v3703_v25 = vsub.f32 %v3494_v21, %v3677_v56  ;;  %v3707_v0 = vsub.f32 %v3502_v26, %v3677_v56  ;;  %v3713_v15 = vsub.f32 %v3508_v30, %v3677_v56 }
 0x18b   :  { %5004 = vst [vmem:[#allocation25_spill] sm:$0xff] %v3680_v58  ;;  %v2122_v61 = vmul.f32 %v3687_v11, %v3687_v11  ;;  %v2123_v50 = vmul.f32 %v3691_v12, %v3691_v12  ;;  %v3719_v21 = vsub.f32 %v3514_v6, %v3677_v56  ;;  %v3725_v16 = vsub.f32 %v3520_v34, %v3677_v56 }
 0x18c   :  { %v2124_v9 = vmul.f32 %v3695_v62, %v3695_v62  ;;  %v2125_v19 = vmul.f32 %v3703_v25, %v3703_v25  ;;  %v2126_v26 = vmul.f32 %v3707_v0, %v3707_v0  ;;  %v2127_v30 = vmul.f32 %v3713_v15, %v3713_v15 }
 0x18d   :  { %v2186_v8 = vadd.f32 %v2123_v50, %v2122_v61  ;;  %v3731_v29 = vsub.f32 %v3524_v36, %v3677_v56  ;;  %v2128_v6 = vmul.f32 %v3719_v21, %v3719_v21  ;;  %v3737_v51 = vsub.f32 %v3530_v39, %v3677_v56 }
 0x18e   :  { %v2129_v34 = vmul.f32 %v3725_v16, %v3725_v16  ;;  %v3743_v50 = vsub.f32 %v3538_v43, %v3677_v56 }
 0x18f   :  { %v2187_v63 = vadd.f32 %v2186_v8, %v2124_v9  ;;  %v2130_v36 = vmul.f32 %v3731_v29, %v3731_v29  ;;  %v3749_v8 = vsub.f32 %v3546_v47, %v3677_v56  ;;  %v2131_v39 = vmul.f32 %v3737_v51, %v3737_v51 }
 0x190   :  { %v2132_v43 = vmul.f32 %v3743_v50, %v3743_v50 }
 0x191   :  { %v2188_v45 = vadd.f32 %v2187_v63, %v2125_v19  ;;  %v3755_v63 = vsub.f32 %v3555_v52, %v3677_v56  ;;  %v2133_v47 = vmul.f32 %v3749_v8, %v3749_v8 }
 0x193   :  { %v2189_v24 = vadd.f32 %v2188_v45, %v2126_v26  ;;  %v3761_v45 = vsub.f32 %v3565_v59, %v3677_v56  ;;  %v2134_v52 = vmul.f32 %v3755_v63, %v3755_v63 }
 0x195   :  { %v2190_v28 = vadd.f32 %v2189_v24, %v2127_v30  ;;  %v3767_v24 = vsub.f32 %v3575_v5, %v3677_v56  ;;  %v2135_v59 = vmul.f32 %v3761_v45, %v3761_v45 }
 0x197   :  { %v2191_v61 = vadd.f32 %v2190_v28, %v2128_v6  ;;  %v3773_v28 = vsub.f32 %v3587_v18, %v3677_v56  ;;  %v2136_v5 = vmul.f32 %v3767_v24, %v3767_v24 }
 0x199   :  { %v2192_v9 = vadd.f32 %v2191_v61, %v2129_v34  ;;  %v3779_v61 = vsub.f32 %v3472_v2, %v3677_v56  ;;  %v2137_v18 = vmul.f32 %v3773_v28, %v3773_v28 }
 0x19b   :  { %v2193_v19 = vadd.f32 %v2192_v9, %v2130_v36  ;;  %v3785_v9 = vsub.f32 %v3485_v14, %v3677_v56  ;;  %v2138_v2 = vmul.f32 %v3779_v61, %v3779_v61 }
 0x19d   :  { %v2194_v26 = vadd.f32 %v2193_v19, %v2131_v39  ;;  %v3791_v19 = vsub.f32 %v3489_v17, %v3677_v56  ;;  %v2139_v14 = vmul.f32 %v3785_v9, %v3785_v9 }
 0x19f   :  { %v2195_v30 = vadd.f32 %v2194_v26, %v2132_v43  ;;  %v3797_v26 = vsub.f32 %v3504_v27, %v3677_v56  ;;  %v2140_v17 = vmul.f32 %v3791_v19, %v3791_v19 }
 0x1a1   :  { %v2196_v6 = vadd.f32 %v2195_v30, %v2133_v47  ;;  %v3803_v30 = vsub.f32 %v3510_v31, %v3677_v56  ;;  %v2141_v27 = vmul.f32 %v3797_v26, %v3797_v26 }
 0x1a3   :  { %v2197_v34 = vadd.f32 %v2196_v6, %v2134_v52  ;;  %v3809_v6 = vsub.f32 %v3516_v1, %v3677_v56  ;;  %v2142_v31 = vmul.f32 %v3803_v30, %v3803_v30 }
 0x1a5   :  { %v2198_v36 = vadd.f32 %v2197_v34, %v2135_v59  ;;  %v3815_v34 = vsub.f32 %v3522_v35, %v3677_v56  ;;  %v2143_v1 = vmul.f32 %v3809_v6, %v3809_v6 }
 0x1a7   :  { %v2199_v39 = vadd.f32 %v2198_v36, %v2136_v5  ;;  %v3821_v36 = vsub.f32 %v3532_v40, %v3677_v56  ;;  %v2144_v35 = vmul.f32 %v3815_v34, %v3815_v34 }
 0x1a9   :  { %v2200_v43 = vadd.f32 %v2199_v39, %v2137_v18  ;;  %v3827_v39 = vsub.f32 %v3540_v44, %v3677_v56  ;;  %v2145_v40 = vmul.f32 %v3821_v36, %v3821_v36 }
 0x1ab   :  { %v2201_v47 = vadd.f32 %v2200_v43, %v2138_v2  ;;  %v3833_v43 = vsub.f32 %v3548_v48, %v3677_v56  ;;  %v2146_v44 = vmul.f32 %v3827_v39, %v3827_v39 }
 0x1ad   :  { %v2202_v52 = vadd.f32 %v2201_v47, %v2139_v14  ;;  %v3839_v47 = vsub.f32 %v3562_v57, %v3677_v56  ;;  %v2147_v48 = vmul.f32 %v3833_v43, %v3833_v43 }
 0x1af   :  { %v2203_v59 = vadd.f32 %v2202_v52, %v2140_v17  ;;  %v3845_v52 = vsub.f32 %v3577_v7, %v3677_v56  ;;  %v2148_v57 = vmul.f32 %v3839_v47, %v3839_v47 }
 0x1b1   :  { %v2204_v5 = vadd.f32 %v2203_v59, %v2141_v27  ;;  %v3851_v59 = vsub.f32 %v3590_v20, %v3677_v56  ;;  %v2149_v7 = vmul.f32 %v3845_v52, %v3845_v52 }
 0x1b3   :  { %v2205_v18 = vadd.f32 %v2204_v5, %v2142_v31  ;;  %v3857_v5 = vsub.f32 %v3601_v54, %v3677_v56  ;;  %v2150_v20 = vmul.f32 %v3851_v59, %v3851_v59 }
 0x1b5   :  { %v2206_v2 = vadd.f32 %v2205_v18, %v2143_v1  ;;  %v5005_v18 = vld [vmem:[#allocation19_spill] sm:$0xff]  ;;  %v2151_v54 = vmul.f32 %v3857_v5, %v3857_v5 }
 0x1b7   :  { %v2207_v14 = vadd.f32 %v2206_v2, %v2144_v35  ;;  %v3863_v35 = vsub.f32 %v5005_v18, %v3677_v56 }
 0x1b9   :  { %v2208_v17 = vadd.f32 %v2207_v14, %v2145_v40  ;;  %v3869_v40 = vsub.f32 %v3623_v49, %v3677_v56 }
 0x1bb   :  { %v2209_v27 = vadd.f32 %v2208_v17, %v2146_v44  ;;  %v5006_v44 = vld [vmem:[#allocation8_spill] sm:$0xff]  ;;  %v2153_v49 = vmul.f32 %v3869_v40, %v3869_v40 }
 0x1bc   :  { %v3875_v17 = vsub.f32 %v5006_v44, %v3677_v56  ;;  %v3899_v44 = vsub.f32 %v3534_v41, %v3677_v56 }
 0x1bd   :  { %v2210_v31 = vadd.f32 %v2209_v27, %v2147_v48  ;;  %v2152_v48 = vmul.f32 %v3863_v35, %v3863_v35 }
 0x1be   :  { %v2154_v18 = vmul.f32 %v3875_v17, %v3875_v17  ;;  %v2158_v41 = vmul.f32 %v3899_v44, %v3899_v44 }
 0x1bf   :  { %v2211_v1 = vadd.f32 %v2210_v31, %v2148_v57  ;;  %v5007_v57 = vld [vmem:[#allocation9_spill] sm:$0xff] }
 0x1c0   :  { %v3881_v31 = vsub.f32 %v5007_v57, %v3677_v56 }
 0x1c1   :  { %v2212_v2 = vadd.f32 %v2211_v1, %v2149_v7  ;;  %v3887_v1 = vsub.f32 %v3518_v33, %v3677_v56 }
 0x1c2   :  { %5008 = vst [vmem:[#allocation19_spill] sm:$0xff] %v3881_v31 }
 0x1c3   :  { %v2213_v14 = vadd.f32 %v2212_v2, %v2150_v20  ;;  %5009 = vst [vmem:[#allocation8_spill] sm:$0xff] %v3887_v1  ;;  %v3893_v2 = vsub.f32 %v3526_v37, %v3677_v56  ;;  %v2156_v33 = vmul.f32 %v3887_v1, %v3887_v1 }
 0x1c5   :  { %v2214_v27 = vadd.f32 %v2213_v14, %v2151_v54  ;;  %v2155_v54 = vmul.f32 %v3881_v31, %v3881_v31  ;;  %v2157_v37 = vmul.f32 %v3893_v2, %v3893_v2 }
 0x1c7   :  { %v2215_v7 = vadd.f32 %v2214_v27, %v2152_v48  ;;  %v5010_v27 = vld [vmem:[#allocation11_spill] sm:$0xff] }
 0x1c8   :  { %v3905_v57 = vsub.f32 %v5010_v27, %v3677_v56  ;;  %v3923_v27 = vsub.f32 %v3580_v10, %v3677_v56 }
 0x1c9   :  { %v2216_v20 = vadd.f32 %v2215_v7, %v2153_v49  ;;  %v5012_v7 = vld [vmem:[#allocation12_spill] sm:$0xff] }
 0x1ca   :  { %5011 = vst [vmem:[#allocation9_spill] sm:$0xff] %v3905_v57  ;;  %v3911_v31 = vsub.f32 %v5012_v7, %v3677_v56  ;;  %v3929_v7 = vsub.f32 %v3593_v23, %v3677_v56  ;;  %v2162_v10 = vmul.f32 %v3923_v27, %v3923_v27 }
 0x1cb   :  { %v2217_v14 = vadd.f32 %v2216_v20, %v2154_v18  ;;  %v5014_v20 = vld [vmem:[#allocation13_spill] sm:$0xff] }
 0x1cc   :  { %5013 = vst [vmem:[#allocation11_spill] sm:$0xff] %v3911_v31  ;;  %v3917_v1 = vsub.f32 %v5014_v20, %v3677_v56  ;;  %v5015_v20 = vld [vmem:[#allocation17_spill] sm:$0xff]  ;;  %v2163_v23 = vmul.f32 %v3929_v7, %v3929_v7 }
 0x1cd   :  { %v2218_v48 = vadd.f32 %v2217_v14, %v2155_v54  ;;  %v2159_v54 = vmul.f32 %v3905_v57, %v3905_v57  ;;  %v3935_v57 = vsub.f32 %v5015_v20, %v3677_v56  ;;  %v3953_v20 = vsub.f32 %v3635_v22, %v3677_v56 }
 0x1cf   :  { %v2219_v49 = vadd.f32 %v2218_v48, %v2156_v33  ;;  %v2160_v33 = vmul.f32 %v3911_v31, %v3911_v31 }
 0x1d1   :  { %v2220_v18 = vadd.f32 %v2219_v49, %v2157_v37  ;;  %v2161_v37 = vmul.f32 %v3917_v1, %v3917_v1 }
 0x1d3   :  { %v2221_v14 = vadd.f32 %v2220_v18, %v2158_v41  ;;  %v5016_v18 = vld [vmem:[#allocation20_spill] sm:$0xff] }
 0x1d4   :  { %v3941_v31 = vsub.f32 %v5016_v18, %v3677_v56  ;;  %v3959_v18 = vsub.f32 %v3644_v32, %v3677_v56  ;;  %v3973_v32 = vsub.f32 %v3536_v42, %v3677_v56 }
 0x1d5   :  { %v2222_v48 = vadd.f32 %v2221_v14, %v2159_v54  ;;  %v3947_v14 = vsub.f32 %v3626_v55, %v3677_v56 }
 0x1d6   :  { %5017 = vst [vmem:[#allocation12_spill] sm:$0xff] %v3941_v31  ;;  %v2171_v42 = vmul.f32 %v3973_v32, %v3973_v32 }
 0x1d7   :  { %v2223_v49 = vadd.f32 %v2222_v48, %v2160_v33  ;;  %v2164_v33 = vmul.f32 %v3935_v57, %v3935_v57  ;;  %v2166_v55 = vmul.f32 %v3947_v14, %v3947_v14  ;;  %5020 = vst [vmem:[#allocation17_spill] sm:$0xff] %v3973_v32 }
 0x1d9   :  { %v2224_v41 = vadd.f32 %v2223_v49, %v2161_v37  ;;  %v2165_v37 = vmul.f32 %v3941_v31, %v3941_v31  ;;  %v2168_v31 = vmul.f32 %v3959_v18, %v3959_v18 }
 0x1db   :  { %v2225_v54 = vadd.f32 %v2224_v41, %v2162_v10  ;;  %v2167_v41 = vmul.f32 %v3953_v20, %v3953_v20 }
 0x1dd   :  { %v2226_v48 = vadd.f32 %v2225_v54, %v2163_v23  ;;  %v5018_v54 = vld [vmem:[#allocation10_spill] sm:$0xff] }
 0x1de   :  { %v3967_v22 = vsub.f32 %v5018_v54, %v3677_v56  ;;  %v3985_v54 = vsub.f32 %v3557_v53, %v3677_v56 }
 0x1df   :  { %v2227_v49 = vadd.f32 %v2226_v48, %v2164_v33  ;;  %v2169_v48 = vmul.f32 %v3680_v58, %v3680_v58 }
 0x1e0   :  { %5019 = vst [vmem:[#allocation13_spill] sm:$0xff] %v3967_v22  ;;  %v2173_v53 = vmul.f32 %v3985_v54, %v3985_v54 }
 0x1e1   :  { %v2228_v10 = vadd.f32 %v2227_v49, %v2165_v37  ;;  %v3979_v49 = vsub.f32 %v3544_v46, %v3677_v56  ;;  %5022 = vst [vmem:[#allocation10_spill] sm:$0xff] %v3985_v54 }
 0x1e3   :  { %v2229_v23 = vadd.f32 %v2228_v10, %v2166_v55  ;;  %5021 = vst [vmem:[#allocation20_spill] sm:$0xff] %v3979_v49  ;;  %v2170_v55 = vmul.f32 %v3967_v22, %v3967_v22  ;;  %v2172_v46 = vmul.f32 %v3979_v49, %v3979_v49 }
 0x1e5   :  { %v2230_v33 = vadd.f32 %v2229_v23, %v2167_v41  ;;  %v5023_v23 = vld [vmem:[#allocation14_spill] sm:$0xff] }
 0x1e6   :  { %v3991_v58 = vsub.f32 %v5023_v23, %v3677_v56  ;;  %v5028_v23 = vld [vmem:[#allocation18_spill] sm:$0xff] }
 0x1e7   :  { %v2231_v37 = vadd.f32 %v2230_v33, %v2168_v31  ;;  %v5025_v33 = vld [vmem:[#allocation15_spill] sm:$0xff]  ;;  %v4009_v49 = vsub.f32 %v5028_v23, %v3677_v56 }
 0x1e8   :  { %5024 = vst [vmem:[#allocation14_spill] sm:$0xff] %v3991_v58  ;;  %v3997_v22 = vsub.f32 %v5025_v33, %v3677_v56  ;;  %v5030_v33 = vld [vmem:[#allocation21_spill] sm:$0xff]  ;;  %v5034_v23 = vld [vmem:[#allocation23_spill] sm:$0xff] }
 0x1e9   :  { %v2232_v10 = vadd.f32 %v2231_v37, %v2169_v48  ;;  %v5027_v37 = vld [vmem:[#allocation16_spill] sm:$0xff]  ;;  %v4015_v54 = vsub.f32 %v5030_v33, %v3677_v56  ;;  %v4033_v33 = vsub.f32 %v3647_v4, %v3677_v56 }
 0x1ea   :  { %5026 = vst [vmem:[#allocation15_spill] sm:$0xff] %v3997_v22  ;;  %v4003_v32 = vsub.f32 %v5027_v37, %v3677_v56  ;;  %v5032_v37 = vld [vmem:[#allocation22_spill] sm:$0xff] }
 0x1eb   :  { %v2233_v41 = vadd.f32 %v2232_v10, %v2170_v55  ;;  %v2174_v55 = vmul.f32 %v3991_v58, %v3991_v58  ;;  %5029 = vst [vmem:[#allocation16_spill] sm:$0xff] %v4009_v49  ;;  %v4021_v58 = vsub.f32 %v5032_v37, %v3677_v56  ;;  %v5037_v37 = vld [vmem:[#allocation24_spill] sm:$0xff]  ;;  %v2181_v4 = vmul.f32 %v4033_v33, %v4033_v33 }
 0x1ec   :  { %5031 = vst [vmem:[#allocation18_spill] sm:$0xff] %v4015_v54 }
 0x1ed   :  { %v2234_v31 = vadd.f32 %v2233_v41, %v2171_v42  ;;  %v2175_v42 = vmul.f32 %v3997_v22, %v3997_v22  ;;  %5033 = vst [vmem:[#allocation21_spill] sm:$0xff] %v4021_v58  ;;  %v4027_v22 = vsub.f32 %v5034_v23, %v3677_v56  ;;  %v4045_v23 = vsub.f32 %v3660_v13, %v3677_v56 }
 0x1ee   :  { %5036 = vst [vmem:[#allocation23_spill] sm:$0xff] %v4033_v33  ;;  %v2185_v33 = vmul.f32 %v3683_v3, %v3683_v3 }
 0x1ef   :  { %v2235_v48 = vadd.f32 %v2234_v31, %v2172_v46  ;;  %v2176_v46 = vmul.f32 %v4003_v32, %v4003_v32  ;;  %5035 = vst [vmem:[#allocation22_spill] sm:$0xff] %v4027_v22 }
 0x1f0   :  { %5039 = vst [vmem:[#allocation26_spill] sm:$0xff] %v4045_v23 }
 0x1f1   :  { %v2236_v10 = vadd.f32 %v2235_v48, %v2173_v53  ;;  %v2177_v53 = vmul.f32 %v4009_v49, %v4009_v49  ;;  %v4039_v49 = vsub.f32 %v5037_v37, %v3677_v56  ;;  %v2183_v37 = vmul.f32 %v4045_v23, %v4045_v23 }
 0x1f3   :  { %v2237_v41 = vadd.f32 %v2236_v10, %v2174_v55  ;;  %v2178_v55 = vmul.f32 %v4015_v54, %v4015_v54  ;;  %5038 = vst [vmem:[#allocation24_spill] sm:$0xff] %v4039_v49 }
 0x1f5   :  { %v2238_v31 = vadd.f32 %v2237_v41, %v2175_v42  ;;  %v2179_v42 = vmul.f32 %v4021_v58, %v4021_v58 }
 0x1f7   :  { %v2239_v48 = vadd.f32 %v2238_v31, %v2176_v46  ;;  %v2180_v46 = vmul.f32 %v4027_v22, %v4027_v22 }
 0x1f9   :  { %v2240_v10 = vadd.f32 %v2239_v48, %v2177_v53  ;;  %v4051_v48 = vsub.f32 %v3667_v38, %v3677_v56 }
 0x1fb   :  { %v2241_v41 = vadd.f32 %v2240_v10, %v2178_v55  ;;  %5040 = vst [vmem:[#allocation27_spill] sm:$0xff] %v4051_v48  ;;  %v2182_v55 = vmul.f32 %v4039_v49, %v4039_v49  ;;  %v2184_v13 = vmul.f32 %v4051_v48, %v4051_v48 }
 0x1fd   :  { %v2242_v31 = vadd.f32 %v2241_v41, %v2179_v42 }
 0x1ff   :  { %v2243_v53 = vadd.f32 %v2242_v31, %v2180_v46 }
 0x201   :  { %v2244_v10 = vadd.f32 %v2243_v53, %v2181_v4 }
 0x203   :  { %v2245_v42 = vadd.f32 %v2244_v10, %v2182_v55 }
 0x205   :  { %v2246_v41 = vadd.f32 %v2245_v42, %v2183_v37 }
 0x207   :  { %v2247_v46 = vadd.f32 %v2246_v41, %v2184_v13  ;;  %v5043_v13 = vld [vmem:[#allocation9_spill] sm:$0xff]  ;;  %v5044_v41 = vld [vmem:[#allocation11_spill] sm:$0xff] }
 0x209   :  { %v2248_v31 = vadd.f32 %v2247_v46, %v2185_v33 }
 0x20b   :  { %v2249_v22 = vrot.slane %v2248_v31, 4 }
 0x20d   :  { %v2250_v38 = vadd.f32 %v2249_v22, %v2248_v31 }
 0x20f   :  { %v2251_v56 = vrot.slane %v2250_v38, 2 }
 0x211   :  { %v2252_v58 = vadd.f32 %v2251_v56, %v2250_v38  ;;  %v5045_v56 = vld [vmem:[#allocation12_spill] sm:$0xff] }
 0x213   :  { %v2253_v54 = vrot.slane %v2252_v58, 1 }
 0x215   :  { %v2254_v49 = vadd.f32 %v2253_v54, %v2252_v58 }
 0x217   :  { %v2255_v4 = vmul.f32 %v2254_v49, %v3674_v60 }
 0x219   :  { %v2256_v53 = vadd.f32 1e-05, %v2255_v4 }
 0x21b   :  { %3140 = vrsqrt.f32 %v2256_v53  ;;  %vm2263_vm3 = vweird.f32 %v2256_v53 }
 0x221   :  { %v3141_v55 = vpop.eup %3140 }
 0x222   :  { %v2258_v10 = vmul.f32 %v3141_v55, %v2256_v53  ;;  %vm2264_vm2 = vweird.f32 %v3141_v55  ;;  %v5046_v53 = vld [vmem:[#allocation25_spill] sm:$0xff] }
 0x223   :  { %vm2265_vm4 = vmor %vm2263_vm3, %vm2264_vm2 }
 0x224   :  { %v2259_v23 = vmul.f32 %v3141_v55, %v2258_v10 }
 0x226   :  { %v2260_v48 = vmul.f32 0.5, %v2259_v23  ;;  %v5041_v23 = vld [vmem:[#allocation19_spill] sm:$0xff] }
 0x228   :  { %v2261_v37 = vsub.f32 1.5, %v2260_v48  ;;  %v5042_v48 = vld [vmem:[#allocation8_spill] sm:$0xff] }
 0x22a   :  { %v2262_v42 = vmul.f32 %v3141_v55, %v2261_v37  ;;  %v5048_v37 = vld [vmem:[#allocation17_spill] sm:$0xff] }
 0x22c   :  { %v4062_v33 = vsel %vm2265_vm4, %v3141_v55, %v2262_v42  ;;  %v5047_v55 = vld [vmem:[#allocation13_spill] sm:$0xff]  ;;  %v5049_v42 = vld [vmem:[#allocation20_spill] sm:$0xff] }
 0x22d   :  { %v4066_v22 = vmul.f32 %v4062_v33, %v3687_v11  ;;  %v4070_v60 = vmul.f32 %v4062_v33, %v3691_v12  ;;  %v4074_v58 = vmul.f32 %v4062_v33, %v3695_v62  ;;  %v4078_v49 = vmul.f32 %v4062_v33, %v3703_v25 }
 0x22e   :  { %v4082_v54 = vmul.f32 %v4062_v33, %v3707_v0  ;;  %v4086_v11 = vmul.f32 %v4062_v33, %v3713_v15  ;;  %v4090_v12 = vmul.f32 %v4062_v33, %v3719_v21  ;;  %v4094_v62 = vmul.f32 %v4062_v33, %v3725_v16 }
 0x22f   :  { %v4098_v25 = vmul.f32 %v4062_v33, %v3731_v29  ;;  %v4102_v0 = vmul.f32 %v4062_v33, %v3737_v51  ;;  %v4106_v15 = vmul.f32 %v4062_v33, %v3743_v50  ;;  %v4110_v21 = vmul.f32 %v4062_v33, %v3749_v8 }
 0x230   :  { %v4114_v16 = vmul.f32 %v4062_v33, %v3755_v63  ;;  %v4118_v29 = vmul.f32 %v4062_v33, %v3761_v45  ;;  %v4122_v51 = vmul.f32 %v4062_v33, %v3767_v24  ;;  %v4126_v50 = vmul.f32 %v4062_v33, %v3773_v28 }
 0x231   :  { %v4130_v8 = vmul.f32 %v4062_v33, %v3779_v61  ;;  %v4134_v63 = vmul.f32 %v4062_v33, %v3785_v9  ;;  %v4138_v45 = vmul.f32 %v4062_v33, %v3791_v19  ;;  %v4142_v24 = vmul.f32 %v4062_v33, %v3797_v26 }
 0x232   :  { %v4146_v28 = vmul.f32 %v4062_v33, %v3803_v30  ;;  %v4150_v61 = vmul.f32 %v4062_v33, %v3809_v6  ;;  %v4154_v9 = vmul.f32 %v4062_v33, %v3815_v34  ;;  %v4158_v19 = vmul.f32 %v4062_v33, %v3821_v36 }
 0x233   :  { %v4162_v26 = vmul.f32 %v4062_v33, %v3827_v39  ;;  %v4166_v30 = vmul.f32 %v4062_v33, %v3833_v43  ;;  %v4170_v6 = vmul.f32 %v4062_v33, %v3839_v47  ;;  %v4174_v34 = vmul.f32 %v4062_v33, %v3845_v52 }
 0x234   :  { %v4178_v36 = vmul.f32 %v4062_v33, %v3851_v59  ;;  %v4182_v39 = vmul.f32 %v4062_v33, %v3857_v5  ;;  %v4186_v43 = vmul.f32 %v4062_v33, %v3863_v35  ;;  %v4190_v47 = vmul.f32 %v4062_v33, %v3869_v40 }
 0x235   :  { %v4194_v52 = vmul.f32 %v4062_v33, %v3875_v17  ;;  %v4198_v59 = vmul.f32 %v4062_v33, %v5041_v23  ;;  %v4202_v5 = vmul.f32 %v4062_v33, %v5042_v48  ;;  %v4206_v35 = vmul.f32 %v4062_v33, %v3893_v2  ;;  %v5051_v23 = vld [vmem:[#allocation10_spill] sm:$0xff]  ;;  %v4275_v48 = vld [vmem:[%s4946_s1] ss:$0 sm:$0xff] }
 0x236   :  { %v4210_v40 = vmul.f32 %v4062_v33, %v3899_v44  ;;  %v4214_v17 = vmul.f32 %v4062_v33, %v5043_v13  ;;  %v4218_v46 = vmul.f32 %v4062_v33, %v5044_v41  ;;  %v4222_v31 = vmul.f32 %v4062_v33, %v3917_v1  ;;  %v5053_v13 = vld [vmem:[#allocation14_spill] sm:$0xff] }
 0x237   :  { %v4226_v2 = vmul.f32 %v4062_v33, %v3923_v27  ;;  %v4230_v44 = vmul.f32 %v4062_v33, %v3929_v7  ;;  %v4234_v38 = vmul.f32 %v4062_v33, %v3935_v57  ;;  %v4238_v4 = vmul.f32 %v4062_v33, %v5045_v56  ;;  %v5055_v56 = vld [vmem:[#allocation15_spill] sm:$0xff] }
 0x238   :  { %v4242_v1 = vmul.f32 %v4062_v33, %v3947_v14  ;;  %v4246_v27 = vmul.f32 %v4062_v33, %v3953_v20  ;;  %v4250_v7 = vmul.f32 %v4062_v33, %v3959_v18  ;;  %v4254_v57 = vmul.f32 %v4062_v33, %v5046_v53 }
 0x239   :  { %v4258_v10 = vmul.f32 %v4062_v33, %v5047_v55  ;;  %v4262_v14 = vmul.f32 %v4062_v33, %v5048_v37  ;;  %v4266_v20 = vmul.f32 %v4062_v33, %v5049_v42  ;;  %v4270_v18 = vmul.f32 %v4062_v33, %v5051_v23  ;;  %v5058_v37 = vld [vmem:[#allocation16_spill] sm:$0xff]  ;;  %v5060_v23 = vld [vmem:[#allocation18_spill] sm:$0xff] }
 0x23a   :  { %v4279_v41 = vmul.f32 %v4062_v33, %v5053_v13  ;;  %v4283_v53 = vmul.f32 %v4062_v33, %v5055_v56  ;;  %v4287_v55 = vmul.f32 %v4062_v33, %v4003_v32  ;;  %v4291_v42 = vmul.f32 %v4062_v33, %v5058_v37 }
 0x23b   :  { %5050 = vst [vmem:[#allocation19_spill] sm:$0xff] %v4266_v20  ;;  %v5062_v20 = vld [vmem:[#allocation21_spill] sm:$0xff] }
 0x23c   :  { %5052 = vst [vmem:[#allocation8_spill] sm:$0xff] %v4270_v18  ;;  %v4295_v18 = vmul.f32 %v4062_v33, %v5060_v23  ;;  %v4299_v13 = vmul.f32 %v4062_v33, %v5062_v20 }
 0x23d   :  { %5054 = vst [vmem:[#allocation9_spill] sm:$0xff] %v4279_v41  ;;  %v5063_v41 = vld [vmem:[#allocation22_spill] sm:$0xff] }
 0x23e   :  { %5056 = vst [vmem:[#allocation11_spill] sm:$0xff] %v4283_v53  ;;  %v4303_v56 = vmul.f32 %v4062_v33, %v5063_v41  ;;  %v5064_v53 = vld [vmem:[#allocation23_spill] sm:$0xff]  ;;  %v4323_v41 = vmul.f32 %v4062_v33, %v3683_v3  ;;  %v4343_v3 = vmul.f32 %v4275_v48, %v4082_v54  ;;  %v4367_v54 = vmul.f32 %v4275_v48, %v4106_v15 }
 0x23f   :  { %5057 = vst [vmem:[#allocation12_spill] sm:$0xff] %v4287_v55  ;;  %v4307_v32 = vmul.f32 %v4062_v33, %v5064_v53  ;;  %v5065_v55 = vld [vmem:[#allocation24_spill] sm:$0xff]  ;;  %v4327_v53 = vmul.f32 %v4275_v48, %v4066_v22  ;;  %v4351_v22 = vmul.f32 %v4275_v48, %v4090_v12  ;;  %v4375_v12 = vmul.f32 %v4275_v48, %v4114_v16 }
 0x240   :  { %5059 = vst [vmem:[#allocation25_spill] sm:$0xff] %v4291_v42  ;;  %v4311_v37 = vmul.f32 %v4062_v33, %v5065_v55  ;;  %v5066_v42 = vld [vmem:[#allocation26_spill] sm:$0xff]  ;;  %v4331_v55 = vmul.f32 %v4275_v48, %v4070_v60  ;;  %v4355_v60 = vmul.f32 %v4275_v48, %v4094_v62  ;;  %v4379_v62 = vmul.f32 %v4275_v48, %v4118_v29 }
 0x241   :  { %5061 = vst [vmem:[#allocation13_spill] sm:$0xff] %v4295_v18  ;;  %v4315_v23 = vmul.f32 %v4062_v33, %v5066_v42  ;;  %v5067_v18 = vld [vmem:[#allocation27_spill] sm:$0xff]  ;;  %v4335_v42 = vmul.f32 %v4275_v48, %v4074_v58  ;;  %v4359_v58 = vmul.f32 %v4275_v48, %v4098_v25  ;;  %v4383_v25 = vmul.f32 %v4275_v48, %v4122_v51 }
 0x242   :  { %v4319_v20 = vmul.f32 %v4062_v33, %v5067_v18  ;;  %v4339_v18 = vmul.f32 %v4275_v48, %v4078_v49  ;;  %v4347_v33 = vmul.f32 %v4275_v48, %v4086_v11  ;;  %v4363_v49 = vmul.f32 %v4275_v48, %v4102_v0 }
 0x243   :  { %v4371_v11 = vmul.f32 %v4275_v48, %v4110_v21  ;;  %v4387_v0 = vmul.f32 %v4275_v48, %v4126_v50  ;;  %v4391_v15 = vmul.f32 %v4275_v48, %v4130_v8  ;;  %v4395_v21 = vmul.f32 %v4275_v48, %v4134_v63 }
 0x244   :  { %v4399_v16 = vmul.f32 %v4275_v48, %v4138_v45  ;;  %v4403_v29 = vmul.f32 %v4275_v48, %v4142_v24  ;;  %v4407_v51 = vmul.f32 %v4275_v48, %v4146_v28  ;;  %v4411_v50 = vmul.f32 %v4275_v48, %v4150_v61 }
 0x245   :  { %v4415_v8 = vmul.f32 %v4275_v48, %v4154_v9  ;;  %v4419_v63 = vmul.f32 %v4275_v48, %v4158_v19  ;;  %v4423_v45 = vmul.f32 %v4275_v48, %v4162_v26  ;;  %v4427_v24 = vmul.f32 %v4275_v48, %v4166_v30 }
 0x246   :  { %v4431_v28 = vmul.f32 %v4275_v48, %v4170_v6  ;;  %v4435_v61 = vmul.f32 %v4275_v48, %v4174_v34  ;;  %v4439_v9 = vmul.f32 %v4275_v48, %v4178_v36  ;;  %v4443_v19 = vmul.f32 %v4275_v48, %v4182_v39 }
 0x247   :  { %v4447_v26 = vmul.f32 %v4275_v48, %v4186_v43  ;;  %v4451_v30 = vmul.f32 %v4275_v48, %v4190_v47  ;;  %v4455_v6 = vmul.f32 %v4275_v48, %v4194_v52  ;;  %v4459_v34 = vmul.f32 %v4275_v48, %v4198_v59 }
 0x248   :  { %v4463_v36 = vmul.f32 %v4275_v48, %v4202_v5  ;;  %v4467_v39 = vmul.f32 %v4275_v48, %v4206_v35  ;;  %v4471_v43 = vmul.f32 %v4275_v48, %v4210_v40  ;;  %v4475_v47 = vmul.f32 %v4275_v48, %v4214_v17 }
 0x249   :  { %v4479_v52 = vmul.f32 %v4275_v48, %v4218_v46  ;;  %v4483_v59 = vmul.f32 %v4275_v48, %v4222_v31  ;;  %v4487_v5 = vmul.f32 %v4275_v48, %v4226_v2  ;;  %v4491_v35 = vmul.f32 %v4275_v48, %v4230_v44 }
 0x24a   :  { %v4495_v40 = vmul.f32 %v4275_v48, %v4234_v38  ;;  %v4499_v17 = vmul.f32 %v4275_v48, %v4238_v4  ;;  %v4503_v46 = vmul.f32 %v4275_v48, %v4242_v1  ;;  %v4507_v31 = vmul.f32 %v4275_v48, %v4246_v27  ;;  %v5073_v1 = vld [vmem:[#allocation19_spill] sm:$0xff] }
 0x24b   :  { %v4511_v2 = vmul.f32 %v4275_v48, %v4250_v7  ;;  %v4515_v44 = vmul.f32 %v4275_v48, %v4254_v57  ;;  %v4519_v38 = vmul.f32 %v4275_v48, %v4258_v10  ;;  %v4523_v4 = vmul.f32 %v4275_v48, %v4262_v14  ;;  %v4536_v57 = vld [vmem:[%s4946_s1 + $0x1] ss:$0 sm:$0xff] }
 0x24c   :  { %5068 = vst [vmem:[#allocation17_spill] sm:$0xff] %v4507_v31  ;;  %v4527_v27 = vmul.f32 %v4275_v48, %v5073_v1  ;;  %v5075_v31 = vld [vmem:[#allocation8_spill] sm:$0xff] }
 0x24d   :  { %5069 = vst [vmem:[#allocation20_spill] sm:$0xff] %v4511_v2  ;;  %v4531_v7 = vmul.f32 %v4275_v48, %v5075_v31 }
 0x24e   :  { %5070 = vst [vmem:[#allocation10_spill] sm:$0xff] %v4515_v44  ;;  %v5077_v44 = vld [vmem:[#allocation9_spill] sm:$0xff] }
 0x24f   :  { %5071 = vst [vmem:[#allocation14_spill] sm:$0xff] %v4519_v38  ;;  %v4540_v10 = vmul.f32 %v4275_v48, %v5077_v44  ;;  %v5078_v38 = vld [vmem:[#allocation11_spill] sm:$0xff]  ;;  %v4560_v44 = vmul.f32 %v4275_v48, %v4299_v13  ;;  %v4580_v13 = vmul.f32 %v4275_v48, %v4319_v20  ;;  %v2401_v20 = vadd.f32 %v4536_v57, %v4343_v3 }
 0x250   :  { %5072 = vst [vmem:[#allocation15_spill] sm:$0xff] %v4523_v4  ;;  %v4544_v14 = vmul.f32 %v4275_v48, %v5078_v38  ;;  %v5079_v4 = vld [vmem:[#allocation12_spill] sm:$0xff]  ;;  %v4564_v38 = vmul.f32 %v4275_v48, %v4303_v56  ;;  %v4584_v56 = vmul.f32 %v4275_v48, %v4323_v41  ;;  %v2404_v41 = vadd.f32 %v4536_v57, %v4355_v60 }
 0x251   :  { %5074 = vst [vmem:[#allocation16_spill] sm:$0xff] %v4527_v27  ;;  %v4548_v1 = vmul.f32 %v4275_v48, %v5079_v4  ;;  %v5080_v27 = vld [vmem:[#allocation25_spill] sm:$0xff]  ;;  %v4568_v4 = vmul.f32 %v4275_v48, %v4307_v32  ;;  %v2397_v32 = vadd.f32 %v4536_v57, %v4327_v53  ;;  %v2405_v53 = vadd.f32 %v4536_v57, %v4359_v58 }
 0x252   :  { %5076 = vst [vmem:[#allocation18_spill] sm:$0xff] %v4531_v7  ;;  %v4552_v31 = vmul.f32 %v4275_v48, %v5080_v27  ;;  %v5081_v7 = vld [vmem:[#allocation13_spill] sm:$0xff]  ;;  %v4572_v27 = vmul.f32 %v4275_v48, %v4311_v37  ;;  %v2399_v37 = vadd.f32 %v4536_v57, %v4335_v42  ;;  %v4608_v42 = vadd.f32 %v4536_v57, %v4367_v54 }
 0x253   :  { %v4556_v2 = vmul.f32 %v4275_v48, %v5081_v7  ;;  %5082 = vst [vmem:[#allocation21_spill] sm:$0xff] %v4568_v4  ;;  %v4576_v7 = vmul.f32 %v4275_v48, %v4315_v23  ;;  %v2398_v4 = vadd.f32 %v4536_v57, %v4331_v55  ;;  %v2400_v23 = vadd.f32 %v4536_v57, %v4339_v18 }
 0x254   :  { %5083 = vst [vmem:[#allocation22_spill] sm:$0xff] %v4572_v27  ;;  %v2403_v48 = vadd.f32 %v4536_v57, %v4351_v22  ;;  %v2406_v55 = vadd.f32 %v4536_v57, %v4363_v49  ;;  %v4612_v18 = vadd.f32 %v4536_v57, %v4371_v11  ;;  %v4616_v3 = vadd.f32 %v4536_v57, %v4375_v12 }
 0x255   :  { %5084 = vst [vmem:[#allocation23_spill] sm:$0xff] %v4576_v7  ;;  %v4624_v22 = vadd.f32 %v4536_v57, %v4383_v25  ;;  %v4628_v60 = vadd.f32 %v4536_v57, %v4387_v0  ;;  %v4632_v58 = vadd.f32 %v4536_v57, %v4391_v15  ;;  %v4636_v49 = vadd.f32 %v4536_v57, %v4395_v21 }
 0x256   :  { %5085 = vst [vmem:[#allocation24_spill] sm:$0xff] %v4580_v13  ;;  %v2402_v13 = vadd.f32 %v4536_v57, %v4347_v33  ;;  %v4620_v33 = vadd.f32 %v4536_v57, %v4379_v62  ;;  %v4640_v54 = vadd.f32 %v4536_v57, %v4399_v16  ;;  %v4644_v11 = vadd.f32 %v4536_v57, %v4403_v29 }
 0x257   :  { %5086 = vst [vmem:[#allocation26_spill] sm:$0xff] %v4584_v56  ;;  %v4648_v12 = vadd.f32 %v4536_v57, %v4407_v51  ;;  %v4652_v62 = vadd.f32 %v4536_v57, %v4411_v50  ;;  %v4656_v25 = vadd.f32 %v4536_v57, %v4415_v8  ;;  %v4660_v0 = vadd.f32 %v4536_v57, %v4419_v63 }
 0x258   :  { %v4664_v15 = vadd.f32 %v4536_v57, %v4423_v45  ;;  %v4668_v21 = vadd.f32 %v4536_v57, %v4427_v24  ;;  %v4672_v16 = vadd.f32 %v4536_v57, %v4431_v28  ;;  %v4676_v29 = vadd.f32 %v4536_v57, %v4435_v61 }
 0x259   :  { %v4680_v51 = vadd.f32 %v4536_v57, %v4439_v9  ;;  %v4684_v50 = vadd.f32 %v4536_v57, %v4443_v19  ;;  %v4688_v8 = vadd.f32 %v4536_v57, %v4447_v26  ;;  %v4692_v63 = vadd.f32 %v4536_v57, %v4451_v30 }
 0x25a   :  { %v4696_v45 = vadd.f32 %v4536_v57, %v4455_v6  ;;  %v4700_v24 = vadd.f32 %v4536_v57, %v4459_v34  ;;  %v4704_v28 = vadd.f32 %v4536_v57, %v4463_v36  ;;  %v4708_v61 = vadd.f32 %v4536_v57, %v4467_v39 }
 0x25b   :  { %v4712_v9 = vadd.f32 %v4536_v57, %v4471_v43  ;;  %v4716_v19 = vadd.f32 %v4536_v57, %v4475_v47  ;;  %v2461_v26 = vmax.f32 %v2397_v32, 0.0  ;;  %v2462_v30 = vmax.f32 %v2398_v4, 0.0 }
 0x25c   :  { %v2463_v6 = vmax.f32 %v2399_v37, 0.0  ;;  %v2464_v34 = vmax.f32 %v2400_v23, 0.0  ;;  %v2465_v56 = vmax.f32 %v2401_v20, 0.0  ;;  %v2466_v7 = vmax.f32 %v2402_v13, 0.0 }
 0x25d   :  { %v4720_v36 = vadd.f32 %v4536_v57, %v4479_v52  ;;  %v4724_v39 = vadd.f32 %v4536_v57, %v4483_v59  ;;  %v2467_v43 = vmax.f32 %v2403_v48, 0.0  ;;  %v2468_v27 = vmax.f32 %v2404_v41, 0.0 }
 0x25e   :  { %v4728_v47 = vadd.f32 %v4536_v57, %v4487_v5  ;;  %v4732_v4 = vadd.f32 %v4536_v57, %v4491_v35  ;;  %v2469_v32 = vmax.f32 %v2405_v53, 0.0  ;;  %v2470_v13 = vmax.f32 %v2406_v55, 0.0 }
 0x25f   :  { %v4736_v52 = vadd.f32 %v4536_v57, %v4495_v40  ;;  %v2471_v37 = vmax.f32 %v4608_v42, 0.0  ;;  %v2472_v59 = vmax.f32 %v4612_v18, 0.0  ;;  %v2473_v23 = vmax.f32 %v4616_v3, 0.0 }
 0x260   :  { %v2474_v20 = vmax.f32 %v4620_v33, 0.0  ;;  %v2923_v5 = vpack.c.bf16 %v2462_v30, %v2461_v26  ;;  %v2928_v48 = vpack.c.bf16 %v2464_v34, %v2463_v6  ;;  %v2933_v41 = vpack.c.bf16 %v2466_v7, %v2465_v56  ;;  %v5089_v26 = vld [vmem:[#allocation10_spill] sm:$0xff] }
 0x261   :  { %v4744_v35 = vadd.f32 %v4536_v57, %v4499_v17  ;;  %v2475_v53 = vmax.f32 %v4624_v22, 0.0  ;;  %v2476_v40 = vmax.f32 %v4628_v60, 0.0  ;;  %v2938_v55 = vpack.c.bf16 %v2468_v27, %v2467_v43  ;;  %v5087_v17 = vld [vmem:[#allocation17_spill] sm:$0xff]  ;;  %v5088_v22 = vld [vmem:[#allocation20_spill] sm:$0xff]  ;;  %v5090_v34 = vld [vmem:[#allocation14_spill] sm:$0xff] }
 0x262   :  { %v4750_v42 = vadd.f32 %v4536_v57, %v4503_v46  ;;  %v2477_v18 = vmax.f32 %v4632_v58, 0.0  ;;  %v2478_v3 = vmax.f32 %v4636_v49, 0.0  ;;  %2924 = vst [vmem:[%s4949_s4] sm:$0xff] %v2923_v5   ;;  %v2943_v7 = vpack.c.bf16 %v2470_v13, %v2469_v32  ;;  %v5091_v13 = vld [vmem:[#allocation15_spill] sm:$0xff] }
 0x263   :  { %v4759_v56 = vadd.f32 %v4536_v57, %v5087_v17  ;;  %v2479_v33 = vmax.f32 %v4640_v54, 0.0  ;;  %v2480_v27 = vmax.f32 %v4644_v11, 0.0  ;;  %3080 = vst [vmem:[%s4949_s4 + $0x8] sm:$0xff] %v2928_v48   ;;  %v2948_v46 = vpack.c.bf16 %v2472_v59, %v2471_v37  ;;  %v5093_v48 = vld [vmem:[#allocation18_spill] sm:$0xff] }
 0x264   :  { %v4768_v60 = vadd.f32 %v4536_v57, %v5088_v22  ;;  %v2481_v58 = vmax.f32 %v4648_v12, 0.0  ;;  %v2482_v49 = vmax.f32 %v4652_v62, 0.0  ;;  %3081 = vst [vmem:[%s4949_s4 + $0x10] sm:$0xff] %v2933_v41   ;;  %v2953_v54 = vpack.c.bf16 %v2474_v20, %v2473_v23  ;;  %v5092_v23 = vld [vmem:[#allocation16_spill] sm:$0xff] }
 0x265   :  { %v4777_v11 = vadd.f32 %v4536_v57, %v5089_v26  ;;  %v2483_v30 = vmax.f32 %v4656_v25, 0.0  ;;  %v2484_v6 = vmax.f32 %v4660_v0, 0.0  ;;  %3082 = vst [vmem:[%s4949_s4 + $0x18] sm:$0xff] %v2938_v55   ;;  %v2958_v12 = vpack.c.bf16 %v2476_v40, %v2475_v53 }
 0x266   :  { %v4786_v62 = vadd.f32 %v4536_v57, %v5090_v34  ;;  %v2485_v43 = vmax.f32 %v4664_v15, 0.0  ;;  %v2486_v32 = vmax.f32 %v4668_v21, 0.0  ;;  %3083 = vst [vmem:[%s4949_s4 + $0x20] sm:$0xff] %v2943_v7   ;;  %v2963_v25 = vpack.c.bf16 %v2478_v3, %v2477_v18  ;;  %v5097_v34 = vld [vmem:[#allocation24_spill] sm:$0xff] }
 0x267   :  { %v4795_v0 = vadd.f32 %v4536_v57, %v5091_v13  ;;  %v2487_v37 = vmax.f32 %v4672_v16, 0.0  ;;  %v2488_v59 = vmax.f32 %v4676_v29, 0.0  ;;  %3084 = vst [vmem:[%s4949_s4 + $0x28] sm:$0xff] %v2948_v46   ;;  %v2968_v15 = vpack.c.bf16 %v2480_v27, %v2479_v33  ;;  %v5098_v13 = vld [vmem:[#allocation26_spill] sm:$0xff] }
 0x268   :  { %v4804_v21 = vadd.f32 %v4536_v57, %v5092_v23  ;;  %v2489_v20 = vmax.f32 %v4680_v51, 0.0  ;;  %v2490_v5 = vmax.f32 %v4684_v50, 0.0  ;;  %3085 = vst [vmem:[%s4949_s4 + $0x30] sm:$0xff] %v2953_v54   ;;  %v2973_v16 = vpack.c.bf16 %v2482_v49, %v2481_v58 }
 0x269   :  { %v4813_v29 = vadd.f32 %v4536_v57, %v5093_v48  ;;  %v2491_v41 = vmax.f32 %v4688_v8, 0.0  ;;  %v2492_v53 = vmax.f32 %v4692_v63, 0.0  ;;  %3086 = vst [vmem:[%s4949_s4 + $0x38] sm:$0xff] %v2958_v12   ;;  %v2978_v51 = vpack.c.bf16 %v2484_v6, %v2483_v30 }
 0x26a   :  { %v4822_v50 = vadd.f32 %v4536_v57, %v4540_v10  ;;  %v2493_v40 = vmax.f32 %v4696_v45, 0.0  ;;  %v2494_v55 = vmax.f32 %v4700_v24, 0.0  ;;  %3087 = vst [vmem:[%s4949_s4 + $0x40] sm:$0xff] %v2963_v25   ;;  %v2983_v8 = vpack.c.bf16 %v2486_v32, %v2485_v43 }
 0x26b   :  { %v4831_v63 = vadd.f32 %v4536_v57, %v4544_v14  ;;  %v2495_v18 = vmax.f32 %v4704_v28, 0.0  ;;  %v2496_v3 = vmax.f32 %v4708_v61, 0.0  ;;  %3088 = vst [vmem:[%s4949_s4 + $0x48] sm:$0xff] %v2968_v15   ;;  %v2988_v10 = vpack.c.bf16 %v2488_v59, %v2487_v37 }
 0x26c   :  { %v4840_v45 = vadd.f32 %v4536_v57, %v4548_v1  ;;  %v2497_v24 = vmax.f32 %v4712_v9, 0.0  ;;  %v2498_v7 = vmax.f32 %v4716_v19, 0.0  ;;  %3089 = vst [vmem:[%s4949_s4 + $0x50] sm:$0xff] %v2973_v16   ;;  %v2993_v14 = vpack.c.bf16 %v2490_v5, %v2489_v20 }
 0x26d   :  { %v2452_v28 = vadd.f32 %v4536_v57, %v4552_v31  ;;  %v2499_v61 = vmax.f32 %v4720_v36, 0.0  ;;  %v2500_v17 = vmax.f32 %v4724_v39, 0.0  ;;  %3090 = vst [vmem:[%s4949_s4 + $0x58] sm:$0xff] %v2978_v51   ;;  %v2998_v1 = vpack.c.bf16 %v2492_v53, %v2491_v41 }
 0x26e   :  { %v2453_v9 = vadd.f32 %v4536_v57, %v4556_v2  ;;  %v2501_v19 = vmax.f32 %v4728_v47, 0.0  ;;  %v2502_v33 = vmax.f32 %v4732_v4, 0.0  ;;  %3091 = vst [vmem:[%s4949_s4 + $0x60] sm:$0xff] %v2983_v8   ;;  %v3003_v31 = vpack.c.bf16 %v2494_v55, %v2493_v40 }
 0x26f   :  { %v2454_v36 = vadd.f32 %v4536_v57, %v4560_v44  ;;  %v2503_v39 = vmax.f32 %v4736_v52, 0.0  ;;  %v2504_v27 = vmax.f32 %v4744_v35, 0.0  ;;  %3092 = vst [vmem:[%s4949_s4 + $0x68] sm:$0xff] %v2988_v10   ;;  %v3008_v2 = vpack.c.bf16 %v2496_v3, %v2495_v18  ;;  %v5094_v52 = vld [vmem:[#allocation21_spill] sm:$0xff] }
 0x270   :  { %v2455_v47 = vadd.f32 %v4536_v57, %v4564_v38  ;;  %v2505_v4 = vmax.f32 %v4750_v42, 0.0  ;;  %v2506_v46 = vmax.f32 %v4759_v56, 0.0  ;;  %3093 = vst [vmem:[%s4949_s4 + $0x70] sm:$0xff] %v2993_v14   ;;  %v3013_v44 = vpack.c.bf16 %v2498_v7, %v2497_v24  ;;  %v5095_v42 = vld [vmem:[#allocation22_spill] sm:$0xff] }
 0x271   :  { %v2456_v35 = vadd.f32 %v4536_v57, %v5094_v52  ;;  %v2507_v22 = vmax.f32 %v4768_v60, 0.0  ;;  %v2508_v58 = vmax.f32 %v4777_v11, 0.0  ;;  %3094 = vst [vmem:[%s4949_s4 + $0x78] sm:$0xff] %v2998_v1   ;;  %v3018_v38 = vpack.c.bf16 %v2500_v17, %v2499_v61  ;;  %v5096_v60 = vld [vmem:[#allocation23_spill] sm:$0xff] }
 0x272   :  { %v2457_v56 = vadd.f32 %v4536_v57, %v5095_v42  ;;  %v2509_v49 = vmax.f32 %v4786_v62, 0.0  ;;  %v2510_v54 = vmax.f32 %v4795_v0, 0.0  ;;  %3095 = vst [vmem:[%s4949_s4 + $0x80] sm:$0xff] %v3003_v31   ;;  %v3023_v26 = vpack.c.bf16 %v2502_v33, %v2501_v19 }
 0x273   :  { %v2458_v11 = vadd.f32 %v4536_v57, %v5096_v60  ;;  %v2511_v30 = vmax.f32 %v4804_v21, 0.0  ;;  %v2512_v6 = vmax.f32 %v4813_v29, 0.0  ;;  %3096 = vst [vmem:[%s4949_s4 + $0x88] sm:$0xff] %v3008_v2   ;;  %v3028_v12 = vpack.c.bf16 %v2504_v27, %v2503_v39 }
 0x274   :  { %v2459_v62 = vadd.f32 %v4536_v57, %v5097_v34  ;;  %v2513_v43 = vmax.f32 %v4822_v50, 0.0  ;;  %v2514_v32 = vmax.f32 %v4831_v63, 0.0  ;;  %3097 = vst [vmem:[%s4949_s4 + $0x90] sm:$0xff] %v3013_v44   ;;  %v3033_v25 = vpack.c.bf16 %v2506_v46, %v2505_v4 }
 0x275   :  { %v2460_v0 = vadd.f32 %v4536_v57, %v5098_v13  ;;  %v2515_v37 = vmax.f32 %v4840_v45, 0.0  ;;  %v2516_v59 = vmax.f32 %v2452_v28, 0.0  ;;  %3098 = vst [vmem:[%s4949_s4 + $0x98] sm:$0xff] %v3018_v38   ;;  %v3038_v15 = vpack.c.bf16 %v2508_v58, %v2507_v22 }
 0x276   :  { %v2517_v23 = vmax.f32 %v2453_v9, 0.0  ;;  %v2518_v21 = vmax.f32 %v2454_v36, 0.0  ;;  %3099 = vst [vmem:[%s4949_s4 + $0xa0] sm:$0xff] %v3023_v26   ;;  %v3043_v20 = vpack.c.bf16 %v2510_v54, %v2509_v49  ;;  %v2519_v5 = vmax.f32 %v2455_v47, 0.0 }
 0x277   :  { %v2520_v16 = vmax.f32 %v2456_v35, 0.0  ;;  %3100 = vst [vmem:[%s4949_s4 + $0xa8] sm:$0xff] %v3028_v12   ;;  %v3048_v57 = vpack.c.bf16 %v2512_v6, %v2511_v30  ;;  %v2521_v48 = vmax.f32 %v2457_v56, 0.0  ;;  %v2522_v29 = vmax.f32 %v2458_v11, 0.0 }
 0x278   :  { %3101 = vst [vmem:[%s4949_s4 + $0xb0] sm:$0xff] %v3033_v25   ;;  %v3053_v41 = vpack.c.bf16 %v2514_v32, %v2513_v43  ;;  %v2523_v53 = vmax.f32 %v2459_v62, 0.0  ;;  %v2524_v51 = vmax.f32 %v2460_v0, 0.0  ;;  %v3058_v50 = vpack.c.bf16 %v2516_v59, %v2515_v37 }
 0x279   :  { %3102 = vst [vmem:[%s4949_s4 + $0xb8] sm:$0xff] %v3038_v15   ;;  %v3063_v40 = vpack.c.bf16 %v2518_v21, %v2517_v23  ;;  %v3068_v55 = vpack.c.bf16 %v2520_v16, %v2519_v5  ;;  %v3073_v8 = vpack.c.bf16 %v2522_v29, %v2521_v48 }
 0x27a   :  { %3103 = vst [vmem:[%s4949_s4 + $0xc0] sm:$0xff] %v3043_v20   ;;  %v3078_v63 = vpack.c.bf16 %v2524_v51, %v2523_v53 }
 0x27b   :  { %3104 = vst [vmem:[%s4949_s4 + $0xc8] sm:$0xff] %v3048_v57  }
 0x27c   :  { %3105 = vst [vmem:[%s4949_s4 + $0xd0] sm:$0xff] %v3053_v41  }
 0x27d   :  { %3106 = vst [vmem:[%s4949_s4 + $0xd8] sm:$0xff] %v3058_v50  }
 0x27e   :  { %3107 = vst [vmem:[%s4949_s4 + $0xe0] sm:$0xff] %v3063_v40  }
 0x27f   :  { %3108 = vst [vmem:[%s4949_s4 + $0xe8] sm:$0xff] %v3068_v55  }
 0x280   :  { %3109 = vst [vmem:[%s4949_s4 + $0xf0] sm:$0xff] %v3073_v8  }
 0x281   :  { %3110 = vst [vmem:[%s4949_s4 + $0xf8] sm:$0xff] %v3078_v63  }

// kernel: encoder_forward.3
= control target key start
LH: loop header
LB: loop body
LE: loop exit
PB: predicated region body
PF: predicated region fallthrough
CT: control target
= control target key end

     0   :  { %vm676_vm0 = vcmask 523264   ;;  %s7580_s24 = smov 64   ;;  %vm2262_vm9 = vcmask 261120   ;;  %s10445_s1 = inlined_call_operand.vmem [shape: bf16[512,64], index: 1, kind: input, shape index: {}]   ;;  %s10446_s0 = inlined_call_operand.vmem [shape: bf16[128,512], index: 0, kind: input, shape index: {}]   ;;  %s10447_s7 = inlined_call_operand.vmem [shape: f32[8,256], index: 7, kind: input, shape index: {}]   ;;  %s10448_s5 = inlined_call_operand.vmem [shape: bf16[512,128], index: 5, kind: input, shape index: {}]   ;;  %s10449_s2 = inlined_call_operand.vmem [shape: bf16[1024,128], index: 2, kind: input, shape index: {}]   ;;  %s10450_s6 = inlined_call_operand.vmem [shape: bf16[128,32], index: 6, kind: input, shape index: {}]   ;;  %s10451_s3 = inlined_call_operand.vmem [shape: bf16[2048,256], index: 3, kind: input, shape index: {}]   ;;  %s10452_s4 = inlined_call_operand.vmem [shape: bf16[1024,128], index: 4, kind: input, shape index: {}]   ;;  %s10453_s8 = inlined_call_operand.vmem [shape: f32[2,128], index: 8, kind: output, shape index: {}]  }
   0x1   :  { %v7032_v0 = vld [vmem:[%s10445_s1 + $0x38] sm:$0xff]  ;;  %v7031_v4 = vld [vmem:[%s10445_s1 + $0x30] sm:$0xff]  ;;  %v7030_v8 = vld [vmem:[%s10445_s1 + $0x28] sm:$0xff] }
   0x2   :  { %v7040_v1 = vld [vmem:[%s10445_s1 + $0x78] sm:$0xff]  ;;  %478 = vmatpush.bf16.msra.mxu0 %v7032_v0  ;;  %v7039_v5 = vld [vmem:[%s10445_s1 + $0x70] sm:$0xff]  ;;  %v7038_v9 = vld [vmem:[%s10445_s1 + $0x68] sm:$0xff] }
   0x3   :  { %v7048_v2 = vld [vmem:[%s10445_s1 + $0xb8] sm:$0xff]  ;;  %527 = vmatpush.bf16.msra.mxu1 %v7040_v1  ;;  %v7047_v6 = vld [vmem:[%s10445_s1 + $0xb0] sm:$0xff]  ;;  %v7046_v10 = vld [vmem:[%s10445_s1 + $0xa8] sm:$0xff] }
   0x4   :  { %v7056_v3 = vld [vmem:[%s10445_s1 + $0xf8] sm:$0xff]  ;;  %576 = vmatpush.bf16.msra.mxu2 %v7048_v2  ;;  %v7055_v7 = vld [vmem:[%s10445_s1 + $0xf0] sm:$0xff]  ;;  %v7054_v11 = vld [vmem:[%s10445_s1 + $0xe8] sm:$0xff] }
   0x5   :  { %625 = vmatpush.bf16.msra.mxu3 %v7056_v3  ;;  %v7029_v12 = vld [vmem:[%s10445_s1 + $0x20] sm:$0xff]  ;;  %v7028_v16 = vld [vmem:[%s10445_s1 + $0x18] sm:$0xff]  ;;  %v7027_v20 = vld [vmem:[%s10445_s1 + $0x10] sm:$0xff] }
   0x6   :  { %479 = vmatpush.bf16.msra.mxu0 %v7031_v4  ;;  %v7037_v13 = vld [vmem:[%s10445_s1 + $0x60] sm:$0xff]  ;;  %v7036_v17 = vld [vmem:[%s10445_s1 + $0x58] sm:$0xff]  ;;  %v7035_v21 = vld [vmem:[%s10445_s1 + $0x50] sm:$0xff] }
   0x7   :  { %528 = vmatpush.bf16.msra.mxu1 %v7039_v5  ;;  %v7045_v14 = vld [vmem:[%s10445_s1 + $0xa0] sm:$0xff]  ;;  %v7044_v18 = vld [vmem:[%s10445_s1 + $0x98] sm:$0xff]  ;;  %v7043_v22 = vld [vmem:[%s10445_s1 + $0x90] sm:$0xff] }
   0x8   :  { %577 = vmatpush.bf16.msra.mxu2 %v7047_v6  ;;  %v7053_v15 = vld [vmem:[%s10445_s1 + $0xe0] sm:$0xff]  ;;  %v7052_v19 = vld [vmem:[%s10445_s1 + $0xd8] sm:$0xff]  ;;  %v7051_v23 = vld [vmem:[%s10445_s1 + $0xd0] sm:$0xff] }
   0x9   :  { %626 = vmatpush.bf16.msra.mxu3 %v7055_v7  ;;  %v7026_v24 = vld [vmem:[%s10445_s1 + $0x8] sm:$0xff]  ;;  %v7025_v28 = vld [vmem:[%s10445_s1] sm:$0xff]  ;;  %v6995_v33 = vld [vmem:[%s10446_s0 + $0xc] sm:$0xf0] }
   0xa   :  { %480 = vmatpush.bf16.msra.mxu0 %v7030_v8  ;;  %v7034_v25 = vld [vmem:[%s10445_s1 + $0x48] sm:$0xff]  ;;  %v7033_v29 = vld [vmem:[%s10445_s1 + $0x40] sm:$0xff]  ;;  %v5035_v35 = vld [vmem:[%s10446_s0 + $0x10] sm:$0xf0] }
   0xb   :  { %529 = vmatpush.bf16.msra.mxu1 %v7038_v9  ;;  %v7042_v26 = vld [vmem:[%s10445_s1 + $0x88] sm:$0xff]  ;;  %v7041_v30 = vld [vmem:[%s10445_s1 + $0x80] sm:$0xff]  ;;  %v6996_v37 = vld [vmem:[%s10446_s0 + $0x14] sm:$0xf0] }
   0xc   :  { %578 = vmatpush.bf16.msra.mxu2 %v7046_v10  ;;  %v7050_v27 = vld [vmem:[%s10445_s1 + $0xc8] sm:$0xff]  ;;  %v7049_v31 = vld [vmem:[%s10445_s1 + $0xc0] sm:$0xff]  ;;  %v5043_v39 = vld [vmem:[%s10446_s0 + $0x18] sm:$0xf0] }
   0xd   :  { %627 = vmatpush.bf16.msra.mxu3 %v7054_v11  ;;  %v5033_v32 = vld [vmem:[%s10446_s0] sm:$0xf]  ;;  %v6993_v34 = vld [vmem:[%s10446_s0 + $0x4] sm:$0xf]  ;;  %v5041_v36 = vld [vmem:[%s10446_s0 + $0x8] sm:$0xf] }
   0xe   :  { %481 = vmatpush.bf16.msra.mxu0 %v7029_v12  ;;  %v6994_v38 = vld [vmem:[%s10446_s0 + $0xc] sm:$0xf]  ;;  %v5034_v40 = vor.u32 %v6995_v33, %v5033_v32  ;;  %v5038_v41 = vor.u32 %v6993_v34, %v5035_v35  ;;  %v5042_v42 = vor.u32 %v6996_v37, %v5041_v36  ;;  %v5049_v44 = vld [vmem:[%s10446_s0 + $0x20] sm:$0xf]  ;;  %v6999_v45 = vld [vmem:[%s10446_s0 + $0x2c] sm:$0xf0] }
   0xf   :  { %530 = vmatpush.bf16.msra.mxu1 %v7037_v13  ;;  %v5046_v43 = vor.u32 %v6994_v38, %v5043_v39  ;;  %v6997_v46 = vld [vmem:[%s10446_s0 + $0x24] sm:$0xf]  ;;  %v5051_v47 = vld [vmem:[%s10446_s0 + $0x30] sm:$0xf0]  ;;  %v5057_v48 = vld [vmem:[%s10446_s0 + $0x28] sm:$0xf]  ;;  %v5050_v52 = vor.u32 %v6999_v45, %v5049_v44 }
  0x10   :  { %579 = vmatpush.bf16.msra.mxu2 %v7045_v14  ;;  %v7000_v49 = vld [vmem:[%s10446_s0 + $0x34] sm:$0xf0]  ;;  %v6998_v50 = vld [vmem:[%s10446_s0 + $0x2c] sm:$0xf]  ;;  %v5059_v51 = vld [vmem:[%s10446_s0 + $0x38] sm:$0xf0]  ;;  %v5054_v53 = vor.u32 %v6997_v46, %v5051_v47 }
  0x11   :  { %628 = vmatpush.bf16.msra.mxu3 %v7053_v15  ;;  %v5058_v54 = vor.u32 %v7000_v49, %v5057_v48  ;;  %v5062_v55 = vor.u32 %v6998_v50, %v5059_v51  ;;  %v5065_v56 = vld [vmem:[%s10446_s0 + $0x40] sm:$0xf]  ;;  %v7003_v57 = vld [vmem:[%s10446_s0 + $0x4c] sm:$0xf0]  ;;  %v7001_v58 = vld [vmem:[%s10446_s0 + $0x44] sm:$0xf] }
  0x12   :  { %482 = vmatpush.bf16.msra.mxu0 %v7028_v16  ;;  %v5067_v59 = vld [vmem:[%s10446_s0 + $0x50] sm:$0xf0]  ;;  %v5073_v60 = vld [vmem:[%s10446_s0 + $0x48] sm:$0xf]  ;;  %v7004_v61 = vld [vmem:[%s10446_s0 + $0x54] sm:$0xf0]  ;;  %v5066_v0 = vor.u32 %v7003_v57, %v5065_v56 }
  0x13   :  { %531 = vmatpush.bf16.msra.mxu1 %v7036_v17  ;;  %v7002_v62 = vld [vmem:[%s10446_s0 + $0x4c] sm:$0xf]  ;;  %v5075_v63 = vld [vmem:[%s10446_s0 + $0x58] sm:$0xf0]  ;;  %v5070_v1 = vor.u32 %v7001_v58, %v5067_v59  ;;  %v5074_v2 = vor.u32 %v7004_v61, %v5073_v60  ;;  %v5081_v4 = vld [vmem:[%s10446_s0 + $0x60] sm:$0xf] }
  0x14   :  { %580 = vmatpush.bf16.msra.mxu2 %v7044_v18  ;;  %v5078_v3 = vor.u32 %v7002_v62, %v5075_v63  ;;  %v7007_v5 = vld [vmem:[%s10446_s0 + $0x6c] sm:$0xf0]  ;;  %v7005_v6 = vld [vmem:[%s10446_s0 + $0x64] sm:$0xf]  ;;  %v5083_v7 = vld [vmem:[%s10446_s0 + $0x70] sm:$0xf0] }
  0x15   :  { %629 = vmatpush.bf16.msra.mxu3 %v7052_v19  ;;  %v5089_v8 = vld [vmem:[%s10446_s0 + $0x68] sm:$0xf]  ;;  %v7008_v9 = vld [vmem:[%s10446_s0 + $0x74] sm:$0xf0]  ;;  %v7006_v10 = vld [vmem:[%s10446_s0 + $0x6c] sm:$0xf]  ;;  %v5082_v12 = vor.u32 %v7007_v5, %v5081_v4  ;;  %v5086_v13 = vor.u32 %v7005_v6, %v5083_v7 }
  0x16   :  { %483 = vmatpush.bf16.msra.mxu0 %v7027_v20  ;;  %v5091_v11 = vld [vmem:[%s10446_s0 + $0x78] sm:$0xf0]  ;;  %v5090_v14 = vor.u32 %v7008_v9, %v5089_v8  ;;  %v5097_v16 = vld [vmem:[%s10446_s0 + $0x80] sm:$0xf]  ;;  %v7011_v17 = vld [vmem:[%s10446_s0 + $0x8c] sm:$0xf0] }
  0x17   :  { %532 = vmatpush.bf16.msra.mxu1 %v7035_v21  ;;  %v5094_v15 = vor.u32 %v7006_v10, %v5091_v11  ;;  %v7009_v18 = vld [vmem:[%s10446_s0 + $0x84] sm:$0xf]  ;;  %v5099_v19 = vld [vmem:[%s10446_s0 + $0x90] sm:$0xf0]  ;;  %v5105_v20 = vld [vmem:[%s10446_s0 + $0x88] sm:$0xf] }
  0x18   :  { %581 = vmatpush.bf16.msra.mxu2 %v7043_v22  ;;  %v7012_v21 = vld [vmem:[%s10446_s0 + $0x94] sm:$0xf0]  ;;  %v7010_v22 = vld [vmem:[%s10446_s0 + $0x8c] sm:$0xf]  ;;  %v5121_v32 = vld [vmem:[%s10446_s0 + $0xa8] sm:$0xf] }
  0x19   :  { %630 = vmatpush.bf16.msra.mxu3 %v7051_v23  ;;  %v5107_v23 = vld [vmem:[%s10446_s0 + $0x98] sm:$0xf0]  ;;  %v7016_v33 = vld [vmem:[%s10446_s0 + $0xb4] sm:$0xf0]  ;;  %v7014_v34 = vld [vmem:[%s10446_s0 + $0xac] sm:$0xf] }
  0x1a   :  { %484 = vmatpush.bf16.msra.mxu0 %v7026_v24  ;;  %v5098_v24 = vor.u32 %v7011_v17, %v5097_v16  ;;  %v5123_v35 = vld [vmem:[%s10446_s0 + $0xb8] sm:$0xf0]  ;;  %v5122_v38 = vor.u32 %v7016_v33, %v5121_v32  ;;  %v5137_v44 = vld [vmem:[%s10446_s0 + $0xc8] sm:$0xf]  ;;  %v7020_v45 = vld [vmem:[%s10446_s0 + $0xd4] sm:$0xf0] }
  0x1b   :  { %533 = vmatpush.bf16.msra.mxu1 %v7034_v25  ;;  %v5102_v25 = vor.u32 %v7009_v18, %v5099_v19  ;;  %v5126_v39 = vor.u32 %v7014_v34, %v5123_v35  ;;  %v7018_v46 = vld [vmem:[%s10446_s0 + $0xcc] sm:$0xf]  ;;  %v5139_v47 = vld [vmem:[%s10446_s0 + $0xd8] sm:$0xf0]  ;;  %v5138_v50 = vor.u32 %v7020_v45, %v5137_v44  ;;  %v5153_v56 = vld [vmem:[%s10446_s0 + $0xe8] sm:$0xf] }
  0x1c   :  { %582 = vmatpush.bf16.msra.mxu2 %v7042_v26  ;;  %v5106_v26 = vor.u32 %v7012_v21, %v5105_v20  ;;  %v5142_v51 = vor.u32 %v7018_v46, %v5139_v47  ;;  %v7024_v57 = vld [vmem:[%s10446_s0 + $0xf4] sm:$0xf0]  ;;  %v7022_v58 = vld [vmem:[%s10446_s0 + $0xec] sm:$0xf]  ;;  %v5155_v59 = vld [vmem:[%s10446_s0 + $0xf8] sm:$0xf0] }
  0x1d   :  { %631 = vmatpush.bf16.msra.mxu3 %v7050_v27  ;;  %v5110_v27 = vor.u32 %v7010_v22, %v5107_v23  ;;  %v5154_v62 = vor.u32 %v7024_v57, %v5153_v56  ;;  %v5158_v63 = vor.u32 %v7022_v58, %v5155_v59 }
  0x1e   :  { %485 = vmatpush.bf16.msra.mxu0 %v7025_v28  ;;  %v5113_v28 = vld [vmem:[%s10446_s0 + $0xa0] sm:$0xf] }
  0x1f   :  { %534 = vmatpush.bf16.msra.mxu1 %v7033_v29  ;;  %v7015_v29 = vld [vmem:[%s10446_s0 + $0xac] sm:$0xf0] }
  0x20   :  { %583 = vmatpush.bf16.msra.mxu2 %v7041_v30  ;;  %v7013_v30 = vld [vmem:[%s10446_s0 + $0xa4] sm:$0xf]  ;;  %v5114_v36 = vor.u32 %v7015_v29, %v5113_v28 }
  0x21   :  { %632 = vmatpush.bf16.msra.mxu3 %v7049_v31  ;;  %486 = vmatmul.bf16.vlgmr.msra.gmra.mxu0 %v5034_v40  ;;  %v5115_v31 = vld [vmem:[%s10446_s0 + $0xb0] sm:$0xf0]  ;;  %v5129_v40 = vld [vmem:[%s10446_s0 + $0xc0] sm:$0xf] }
  0x22   :  { %535 = vmatmul.bf16.vlgmr.msra.gmra.mxu1 %v5038_v41  ;;  %v5118_v37 = vor.u32 %v7013_v30, %v5115_v31  ;;  %v7019_v41 = vld [vmem:[%s10446_s0 + $0xcc] sm:$0xf0] }
  0x23   :  { %584 = vmatmul.bf16.vlgmr.msra.gmra.mxu2 %v5042_v42  ;;  %v7017_v42 = vld [vmem:[%s10446_s0 + $0xc4] sm:$0xf]  ;;  %v5130_v48 = vor.u32 %v7019_v41, %v5129_v40 }
  0x24   :  { %633 = vmatmul.bf16.vlgmr.msra.gmra.mxu3 %v5046_v43  ;;  %v5131_v43 = vld [vmem:[%s10446_s0 + $0xd0] sm:$0xf0] }
  0x25   :  { %v5134_v49 = vor.u32 %v7017_v42, %v5131_v43 }
  0x31   :  { %491 = vmatmul.bf16.gmra.mxu0 %v5050_v52  ;;  %v5145_v52 = vld [vmem:[%s10446_s0 + $0xe0] sm:$0xf] }
  0x32   :  { %540 = vmatmul.bf16.gmra.mxu1 %v5054_v53  ;;  %v7023_v53 = vld [vmem:[%s10446_s0 + $0xec] sm:$0xf0] }
  0x33   :  { %589 = vmatmul.bf16.gmra.mxu2 %v5058_v54  ;;  %v7021_v54 = vld [vmem:[%s10446_s0 + $0xe4] sm:$0xf]  ;;  %v5146_v60 = vor.u32 %v7023_v53, %v5145_v52 }
  0x34   :  { %638 = vmatmul.bf16.gmra.mxu3 %v5062_v55  ;;  %v5147_v55 = vld [vmem:[%s10446_s0 + $0xf0] sm:$0xf0] }
  0x35   :  { %v5150_v61 = vor.u32 %v7021_v54, %v5147_v55 }
  0x41   :  { %496 = vmatmul.bf16.gmra.mxu0 %v5066_v0 }
  0x42   :  { %545 = vmatmul.bf16.gmra.mxu1 %v5070_v1 }
  0x43   :  { %594 = vmatmul.bf16.gmra.mxu2 %v5074_v2 }
  0x44   :  { %643 = vmatmul.bf16.gmra.mxu3 %v5078_v3 }
  0x51   :  { %501 = vmatmul.bf16.gmra.mxu0 %v5082_v12 }
  0x52   :  { %550 = vmatmul.bf16.gmra.mxu1 %v5086_v13 }
  0x53   :  { %599 = vmatmul.bf16.gmra.mxu2 %v5090_v14 }
  0x54   :  { %648 = vmatmul.bf16.gmra.mxu3 %v5094_v15 }
  0x61   :  { %506 = vmatmul.bf16.gmra.mxu0 %v5098_v24 }
  0x62   :  { %555 = vmatmul.bf16.gmra.mxu1 %v5102_v25 }
  0x63   :  { %604 = vmatmul.bf16.gmra.mxu2 %v5106_v26 }
  0x64   :  { %653 = vmatmul.bf16.gmra.mxu3 %v5110_v27 }
  0x71   :  { %511 = vmatmul.bf16.gmra.mxu0 %v5114_v36 }
  0x72   :  { %560 = vmatmul.bf16.gmra.mxu1 %v5118_v37 }
  0x73   :  { %609 = vmatmul.bf16.gmra.mxu2 %v5122_v38 }
  0x74   :  { %658 = vmatmul.bf16.gmra.mxu3 %v5126_v39 }
  0x81   :  { %516 = vmatmul.bf16.gmra.mxu0 %v5130_v48 }
  0x82   :  { %565 = vmatmul.bf16.gmra.mxu1 %v5134_v49 }
  0x83   :  { %614 = vmatmul.bf16.gmra.mxu2 %v5138_v50 }
  0x84   :  { %663 = vmatmul.bf16.gmra.mxu3 %v5142_v51 }
  0x91   :  { %521 = vmatmul.bf16.gmra.mxu0 %v5146_v60 }
  0x92   :  { %570 = vmatmul.bf16.gmra.mxu1 %v5150_v61 }
  0x93   :  { %619 = vmatmul.bf16.gmra.mxu2 %v5154_v62 }
  0x94   :  { %668 = vmatmul.bf16.gmra.mxu3 %v5158_v63 }
  0x9e   :  { %v487_v0 = vpop.f32.mrf.mxu0 }
  0x9f   :  { %v536_v1 = vpop.f32.mrf.mxu1 }
  0xa0   :  { %v537_v2 = vadd.f32 %v536_v1, %v487_v0 }
  0xa6   :  { %v585_v3 = vpop.f32.mrf.mxu2  ;;  %v489_v6 = vpop.f32.mrf.mxu0 }
  0xa7   :  { %v634_v4 = vpop.f32.mrf.mxu3  ;;  %v586_v5 = vadd.f32 %v585_v3, %v537_v2  ;;  %v538_v7 = vpop.f32.mrf.mxu1 }
  0xa8   :  { %v539_v9 = vadd.f32 %v538_v7, %v489_v6 }
  0xa9   :  { %v7916_v8 = vadd.f32 %v634_v4, %v586_v5 }
  0xab   :  { %v677_v23 = vsel %vm676_vm0, %v7916_v8, 0.0 }
  0xae   :  { %v587_v10 = vpop.f32.mrf.mxu2  ;;  %v492_v13 = vpop.f32.mrf.mxu0 }
  0xaf   :  { %v636_v11 = vpop.f32.mrf.mxu3  ;;  %v588_v12 = vadd.f32 %v587_v10, %v539_v9  ;;  %v541_v14 = vpop.f32.mrf.mxu1 }
  0xb0   :  { %v542_v15 = vadd.f32 %v541_v14, %v492_v13 }
  0xb1   :  { %v7918_v16 = vadd.f32 %v636_v11, %v588_v12 }
  0xb3   :  { %v678_v19 = vsel %vm676_vm0, %v7918_v16, 0.0 }
  0xb4   :  { %v679_v25 = vadd.f32 %v678_v19, %v677_v23 }
  0xb6   :  { %v590_v17 = vpop.f32.mrf.mxu2  ;;  %v494_v21 = vpop.f32.mrf.mxu0 }
  0xb7   :  { %v639_v18 = vpop.f32.mrf.mxu3  ;;  %v591_v20 = vadd.f32 %v590_v17, %v542_v15  ;;  %v543_v22 = vpop.f32.mrf.mxu1 }
  0xb8   :  { %v544_v28 = vadd.f32 %v543_v22, %v494_v21 }
  0xb9   :  { %v7924_v24 = vadd.f32 %v639_v18, %v591_v20 }
  0xbb   :  { %v680_v26 = vsel %vm676_vm0, %v7924_v24, 0.0 }
  0xbc   :  { %v681_v27 = vadd.f32 %v680_v26, %v679_v25 }
  0xbe   :  { %v592_v29 = vpop.f32.mrf.mxu2  ;;  %v497_v32 = vpop.f32.mrf.mxu0 }
  0xbf   :  { %v641_v30 = vpop.f32.mrf.mxu3  ;;  %v593_v31 = vadd.f32 %v592_v29, %v544_v28  ;;  %v546_v33 = vpop.f32.mrf.mxu1 }
  0xc0   :  { %v547_v34 = vadd.f32 %v546_v33, %v497_v32 }
  0xc1   :  { %v7928_v35 = vadd.f32 %v641_v30, %v593_v31 }
  0xc3   :  { %v682_v38 = vsel %vm676_vm0, %v7928_v35, 0.0 }
  0xc4   :  { %v683_v43 = vadd.f32 %v682_v38, %v681_v27 }
  0xc6   :  { %v595_v36 = vpop.f32.mrf.mxu2  ;;  %v499_v40 = vpop.f32.mrf.mxu0 }
  0xc7   :  { %v644_v37 = vpop.f32.mrf.mxu3  ;;  %v596_v39 = vadd.f32 %v595_v36, %v547_v34  ;;  %v548_v41 = vpop.f32.mrf.mxu1 }
  0xc8   :  { %v549_v11 = vadd.f32 %v548_v41, %v499_v40 }
  0xc9   :  { %v7932_v42 = vadd.f32 %v644_v37, %v596_v39 }
  0xcb   :  { %v684_v44 = vsel %vm676_vm0, %v7932_v42, 0.0 }
  0xcc   :  { %v685_v45 = vadd.f32 %v684_v44, %v683_v43 }
  0xce   :  { %v597_v46 = vpop.f32.mrf.mxu2  ;;  %v502_v48 = vpop.f32.mrf.mxu0 }
  0xcf   :  { %v646_v47 = vpop.f32.mrf.mxu3  ;;  %v551_v49 = vpop.f32.mrf.mxu1  ;;  %v598_v13 = vadd.f32 %v597_v46, %v549_v11 }
  0xd0   :  { %v552_v12 = vadd.f32 %v551_v49, %v502_v48 }
  0xd1   :  { %v7936_v22 = vadd.f32 %v646_v47, %v598_v13 }
  0xd3   :  { %v686_v29 = vsel %vm676_vm0, %v7936_v22, 0.0 }
  0xd4   :  { %v687_v40 = vadd.f32 %v686_v29, %v685_v45 }
  0xd6   :  { %v600_v50 = vpop.f32.mrf.mxu2  ;;  %v504_v52 = vpop.f32.mrf.mxu0 }
  0xd7   :  { %v649_v51 = vpop.f32.mrf.mxu3  ;;  %v553_v53 = vpop.f32.mrf.mxu1  ;;  %v601_v18 = vadd.f32 %v600_v50, %v552_v12 }
  0xd8   :  { %v554_v19 = vadd.f32 %v553_v53, %v504_v52 }
  0xd9   :  { %v7938_v27 = vadd.f32 %v649_v51, %v601_v18 }
  0xdb   :  { %v688_v37 = vsel %vm676_vm0, %v7938_v27, 0.0 }
  0xdc   :  { %v689_v48 = vadd.f32 %v688_v37, %v687_v40 }
  0xde   :  { %v602_v54 = vpop.f32.mrf.mxu2  ;;  %v507_v56 = vpop.f32.mrf.mxu0 }
  0xdf   :  { %v651_v55 = vpop.f32.mrf.mxu3  ;;  %v556_v57 = vpop.f32.mrf.mxu1  ;;  %v603_v23 = vadd.f32 %v602_v54, %v554_v19 }
  0xe0   :  { %v557_v14 = vadd.f32 %v556_v57, %v507_v56 }
  0xe1   :  { %v7942_v30 = vadd.f32 %v651_v55, %v603_v23 }
  0xe3   :  { %v690_v44 = vsel %vm676_vm0, %v7942_v30, 0.0 }
  0xe4   :  { %v691_v54 = vadd.f32 %v690_v44, %v689_v48 }
  0xe6   :  { %v605_v58 = vpop.f32.mrf.mxu2  ;;  %v509_v60 = vpop.f32.mrf.mxu0 }
  0xe7   :  { %v654_v59 = vpop.f32.mrf.mxu3  ;;  %v558_v61 = vpop.f32.mrf.mxu1  ;;  %v606_v25 = vadd.f32 %v605_v58, %v557_v14 }
  0xe8   :  { %v559_v28 = vadd.f32 %v558_v61, %v509_v60  ;;  %v7579_v60 = vmov 128.0  }
  0xe9   :  { %v7944_v32 = vadd.f32 %v654_v59, %v606_v25  ;;  %7565 = vrcp.f32 %v7579_v60 }
  0xeb   :  { %v692_v49 = vsel %vm676_vm0, %v7944_v32, 0.0 }
  0xec   :  { %v693_v57 = vadd.f32 %v692_v49, %v691_v54 }
  0xee   :  { %v607_v62 = vpop.f32.mrf.mxu2  ;;  %v512_v0 = vpop.f32.mrf.mxu0 }
  0xef   :  { %v656_v63 = vpop.f32.mrf.mxu3  ;;  %v561_v1 = vpop.f32.mrf.mxu1  ;;  %v608_v31 = vadd.f32 %v607_v62, %v559_v28 }
  0xf0   :  { %v562_v26 = vadd.f32 %v561_v1, %v512_v0 }
  0xf1   :  { %v7950_v46 = vadd.f32 %v656_v63, %v608_v31 }
  0xf3   :  { %v694_v45 = vsel %vm676_vm0, %v7950_v46, 0.0 }
  0xf4   :  { %v695_v0 = vadd.f32 %v694_v45, %v693_v57 }
  0xf6   :  { %v610_v2 = vpop.f32.mrf.mxu2  ;;  %v514_v4 = vpop.f32.mrf.mxu0 }
  0xf7   :  { %v659_v3 = vpop.f32.mrf.mxu3  ;;  %v563_v5 = vpop.f32.mrf.mxu1  ;;  %v611_v33 = vadd.f32 %v610_v2, %v562_v26 }
  0xf8   :  { %v564_v38 = vadd.f32 %v563_v5, %v514_v4 }
  0xf9   :  { %v7954_v50 = vadd.f32 %v659_v3, %v611_v33 }
  0xfb   :  { %v696_v61 = vsel %vm676_vm0, %v7954_v50, 0.0 }
  0xfc   :  { %v697_v3 = vadd.f32 %v696_v61, %v695_v0 }
  0xfe   :  { %v612_v6 = vpop.f32.mrf.mxu2  ;;  %v517_v9 = vpop.f32.mrf.mxu0 }
  0xff   :  { %v661_v7 = vpop.f32.mrf.mxu3  ;;  %v566_v10 = vpop.f32.mrf.mxu1  ;;  %v613_v47 = vadd.f32 %v612_v6, %v564_v38 }
 0x100   :  { %v567_v39 = vadd.f32 %v566_v10, %v517_v9  ;;  %v7566_v9 = vpop.eup %7565 }
 0x101   :  { %v7958_v55 = vadd.f32 %v661_v7, %v613_v47  ;;  %v715_v18 = vmul.f32 128.0, %v7566_v9  ;;  %vm719_vm1 = vweird.f32 %v7566_v9 }
 0x103   :  { %v698_v1 = vsel %vm676_vm0, %v7958_v55, 0.0  ;;  %v716_v26 = vsub.f32 1.0, %v715_v18 }
 0x104   :  { %v699_v10 = vadd.f32 %v698_v1, %v697_v3 }
 0x105   :  { %v717_v31 = vmul.f32 %v7566_v9, %v716_v26 }
 0x106   :  { %v615_v15 = vpop.f32.mrf.mxu2  ;;  %v519_v20 = vpop.f32.mrf.mxu0 }
 0x107   :  { %v664_v17 = vpop.f32.mrf.mxu3  ;;  %v568_v21 = vpop.f32.mrf.mxu1  ;;  %v616_v51 = vadd.f32 %v615_v15, %v567_v39 }
 0x108   :  { %v569_v52 = vadd.f32 %v568_v21, %v519_v20 }
 0x109   :  { %v7962_v62 = vadd.f32 %v664_v17, %v616_v51 }
 0x10b   :  { %v700_v6 = vsel %vm676_vm0, %v7962_v62, 0.0 }
 0x10c   :  { %v701_v13 = vadd.f32 %v700_v6, %v699_v10 }
 0x10e   :  { %v617_v34 = vpop.f32.mrf.mxu2  ;;  %v522_v41 = vpop.f32.mrf.mxu0 }
 0x10f   :  { %v666_v36 = vpop.f32.mrf.mxu3  ;;  %v571_v43 = vpop.f32.mrf.mxu1  ;;  %v618_v56 = vadd.f32 %v617_v34, %v569_v52 }
 0x110   :  { %v572_v53 = vadd.f32 %v571_v43, %v522_v41 }
 0x111   :  { %v7966_v2 = vadd.f32 %v666_v36, %v618_v56  ;;  %v718_v36 = vadd.f32 %v7566_v9, %v717_v31 }
 0x113   :  { %v702_v11 = vsel %vm676_vm0, %v7966_v2, 0.0  ;;  %v7980_v39 = vsel %vm719_vm1, %v7566_v9, %v718_v36 }
 0x114   :  { %v703_v19 = vadd.f32 %v702_v11, %v701_v13 }
 0x116   :  { %v620_v58 = vpop.f32.mrf.mxu2  ;;  %v524_v4 = vpop.f32.mrf.mxu0 }
 0x117   :  { %v669_v59 = vpop.f32.mrf.mxu3  ;;  %v621_v63 = vadd.f32 %v620_v58, %v572_v53  ;;  %v573_v5 = vpop.f32.mrf.mxu1 }
 0x118   :  { %v574_v12 = vadd.f32 %v573_v5, %v524_v4 }
 0x119   :  { %v7970_v7 = vadd.f32 %v669_v59, %v621_v63 }
 0x11b   :  { %v704_v15 = vsel %vm676_vm0, %v7970_v7, 0.0 }
 0x11c   :  { %v705_v23 = vadd.f32 %v704_v15, %v703_v19 }
 0x11e   :  { %v622_v14 = vpop.f32.mrf.mxu2 }
 0x11f   :  { %v623_v17 = vadd.f32 %v622_v14, %v574_v12  ;;  %v671_v20 = vpop.f32.mrf.mxu3 }
 0x121   :  { %v7976_v21 = vadd.f32 %v671_v20, %v623_v17 }
 0x123   :  { %v706_v25 = vsel %vm676_vm0, %v7976_v21, 0.0 }
 0x124   :  { %v707_v28 = vadd.f32 %v706_v25, %v705_v23 }
 0x126   :  { %v708_v29 = vrot.slane %v707_v28, 4 }
 0x128   :  { %v709_v33 = vadd.f32 %v708_v29, %v707_v28 }
 0x12a   :  { %v710_v34 = vrot.slane %v709_v33, 2 }
 0x12c   :  { %v711_v37 = vadd.f32 %v710_v34, %v709_v33 }
 0x12e   :  { %v712_v38 = vrot.slane %v711_v37, 1 }
 0x130   :  { %v713_v40 = vadd.f32 %v712_v38, %v711_v37 }
 0x132   :  { %v721_v41 = vmul.f32 %v7980_v39, %v713_v40 }
 0x134   :  { %v7984_v43 = vsub.f32 %v7916_v8, %v721_v41  ;;  %v7987_v44 = vsub.f32 %v7918_v16, %v721_v41  ;;  %v7990_v47 = vsub.f32 %v7924_v24, %v721_v41  ;;  %v7993_v48 = vsub.f32 %v7932_v42, %v721_v41 }
 0x135   :  { %v7996_v49 = vsub.f32 %v7928_v35, %v721_v41  ;;  %v8005_v16 = vsub.f32 %v7936_v22, %v721_v41  ;;  %v8012_v54 = vsub.f32 %v7938_v27, %v721_v41  ;;  %v8018_v22 = vsub.f32 %v7942_v30, %v721_v41 }
 0x136   :  { %v738_v51 = vmul.f32 %v7984_v43, %v7984_v43  ;;  %v739_v52 = vmul.f32 %v7987_v44, %v7987_v44  ;;  %v740_v8 = vmul.f32 %v7990_v47, %v7990_v47  ;;  %v742_v45 = vmul.f32 %v7993_v48, %v7993_v48 }
 0x137   :  { %v741_v24 = vmul.f32 %v7996_v49, %v7996_v49  ;;  %v743_v58 = vmul.f32 %v8005_v16, %v8005_v16  ;;  %v8024_v61 = vsub.f32 %v7944_v32, %v721_v41  ;;  %v744_v27 = vmul.f32 %v8012_v54, %v8012_v54 }
 0x138   :  { %v754_v42 = vsel %vm676_vm0, %v738_v51, 0.0  ;;  %v755_v35 = vsel %vm676_vm0, %v739_v52, 0.0  ;;  %v757_v56 = vsel %vm676_vm0, %v740_v8, 0.0  ;;  %v761_v63 = vsel %vm676_vm0, %v742_v45, 0.0 }
 0x139   :  { %v756_v53 = vadd.f32 %v755_v35, %v754_v42  ;;  %v759_v59 = vsel %vm676_vm0, %v741_v24, 0.0  ;;  %v8030_v1 = vsub.f32 %v7950_v46, %v721_v41  ;;  %v745_v30 = vmul.f32 %v8018_v22, %v8018_v22 }
 0x13a   :  { %v763_v3 = vsel %vm676_vm0, %v743_v58, 0.0  ;;  %v732_v5 = vsub.f32 %v7954_v50, %v721_v41  ;;  %v746_v32 = vmul.f32 %v8024_v61, %v8024_v61  ;;  %v765_v6 = vsel %vm676_vm0, %v744_v27, 0.0 }
 0x13b   :  { %v758_v57 = vadd.f32 %v757_v56, %v756_v53  ;;  %v733_v10 = vsub.f32 %v7958_v55, %v721_v41  ;;  %v747_v46 = vmul.f32 %v8030_v1, %v8030_v1  ;;  %v767_v11 = vsel %vm676_vm0, %v745_v30, 0.0 }
 0x13c   :  { %v734_v13 = vsub.f32 %v7962_v62, %v721_v41  ;;  %v748_v14 = vmul.f32 %v732_v5, %v732_v5  ;;  %v769_v15 = vsel %vm676_vm0, %v746_v32, 0.0  ;;  %v735_v17 = vsub.f32 %v7966_v2, %v721_v41  ;;  %v8064_v32 = vld [vmem:[%s10447_s7 + $0x1] ss:$0 sm:$0xff] }
 0x13d   :  { %v760_v60 = vadd.f32 %v759_v59, %v758_v57  ;;  %v749_v18 = vmul.f32 %v733_v10, %v733_v10  ;;  %v771_v19 = vsel %vm676_vm0, %v747_v46, 0.0  ;;  %v736_v55 = vsub.f32 %v7970_v7, %v721_v41 }
 0x13e   :  { %v750_v23 = vmul.f32 %v734_v13, %v734_v13  ;;  %v773_v25 = vsel %vm676_vm0, %v748_v14, 0.0  ;;  %v737_v28 = vsub.f32 %v7976_v21, %v721_v41  ;;  %v751_v29 = vmul.f32 %v735_v17, %v735_v17 }
 0x13f   :  { %v762_v0 = vadd.f32 %v761_v63, %v760_v60  ;;  %v775_v62 = vsel %vm676_vm0, %v749_v18, 0.0  ;;  %v752_v33 = vmul.f32 %v736_v55, %v736_v55 }
 0x140   :  { %v777_v34 = vsel %vm676_vm0, %v750_v23, 0.0  ;;  %v753_v36 = vmul.f32 %v737_v28, %v737_v28  ;;  %v779_v37 = vsel %vm676_vm0, %v751_v29, 0.0 }
 0x141   :  { %v764_v4 = vadd.f32 %v763_v3, %v762_v0  ;;  %v781_v7 = vsel %vm676_vm0, %v752_v33, 0.0  ;;  %v8059_v0 = vld [vmem:[%s10447_s7] ss:$0 sm:$0xff] }
 0x142   :  { %v783_v51 = vsel %vm676_vm0, %v753_v36, 0.0 }
 0x143   :  { %v766_v9 = vadd.f32 %v765_v6, %v764_v4 }
 0x145   :  { %v768_v12 = vadd.f32 %v767_v11, %v766_v9 }
 0x147   :  { %v770_v50 = vadd.f32 %v769_v15, %v768_v12 }
 0x149   :  { %v772_v20 = vadd.f32 %v771_v19, %v770_v50 }
 0x14b   :  { %v774_v26 = vadd.f32 %v773_v25, %v772_v20 }
 0x14d   :  { %v776_v31 = vadd.f32 %v775_v62, %v774_v26 }
 0x14f   :  { %v778_v2 = vadd.f32 %v777_v34, %v776_v31 }
 0x151   :  { %v780_v38 = vadd.f32 %v779_v37, %v778_v2 }
 0x153   :  { %v782_v40 = vadd.f32 %v781_v7, %v780_v38 }
 0x155   :  { %v784_v52 = vadd.f32 %v783_v51, %v782_v40 }
 0x157   :  { %v785_v8 = vrot.slane %v784_v52, 4 }
 0x159   :  { %v786_v21 = vadd.f32 %v785_v8, %v784_v52 }
 0x15b   :  { %v787_v41 = vrot.slane %v786_v21, 2 }
 0x15d   :  { %v788_v24 = vadd.f32 %v787_v41, %v786_v21 }
 0x15f   :  { %v789_v42 = vrot.slane %v788_v24, 1 }
 0x161   :  { %v790_v35 = vadd.f32 %v789_v42, %v788_v24 }
 0x163   :  { %v791_v53 = vmul.f32 %v790_v35, %v7980_v39 }
 0x165   :  { %v792_v45 = vadd.f32 1e-05, %v791_v53 }
 0x167   :  { %7567 = vrsqrt.f32 %v792_v45  ;;  %vm799_vm3 = vweird.f32 %v792_v45 }
 0x16d   :  { %v7568_v56 = vpop.eup %7567 }
 0x16e   :  { %v794_v57 = vmul.f32 %v7568_v56, %v792_v45  ;;  %vm800_vm2 = vweird.f32 %v7568_v56 }
 0x16f   :  { %vm801_vm4 = vmor %vm799_vm3, %vm800_vm2 }
 0x170   :  { %v795_v58 = vmul.f32 %v7568_v56, %v794_v57 }
 0x172   :  { %v796_v59 = vmul.f32 0.5, %v795_v58 }
 0x174   :  { %v797_v60 = vsub.f32 1.5, %v796_v59 }
 0x176   :  { %v798_v27 = vmul.f32 %v7568_v56, %v797_v60 }
 0x178   :  { %v802_v63 = vsel %vm801_vm4, %v7568_v56, %v798_v27 }
 0x179   :  { %v818_v30 = vmul.f32 %v802_v63, %v737_v28  ;;  %v817_v3 = vmul.f32 %v802_v63, %v736_v55  ;;  %v815_v39 = vmul.f32 %v802_v63, %v734_v13  ;;  %v816_v4 = vmul.f32 %v802_v63, %v735_v17 }
 0x17a   :  { %v813_v6 = vmul.f32 %v802_v63, %v732_v5  ;;  %v814_v9 = vmul.f32 %v802_v63, %v733_v10  ;;  %v811_v46 = vmul.f32 %v802_v63, %v8024_v61  ;;  %v812_v11 = vmul.f32 %v802_v63, %v8030_v1 }
 0x17b   :  { %v833_v12 = vmul.f32 %v817_v3, %v8059_v0  ;;  %v834_v14 = vmul.f32 %v818_v30, %v8059_v0  ;;  %v831_v15 = vmul.f32 %v815_v39, %v8059_v0  ;;  %v832_v13 = vmul.f32 %v816_v4, %v8059_v0 }
 0x17c   :  { %v829_v50 = vmul.f32 %v813_v6, %v8059_v0  ;;  %v830_v17 = vmul.f32 %v814_v9, %v8059_v0  ;;  %v827_v18 = vmul.f32 %v811_v46, %v8059_v0  ;;  %v828_v5 = vmul.f32 %v812_v11, %v8059_v0 }
 0x17d   :  { %v849_v61 = vadd.f32 %v833_v12, %v8064_v32  ;;  %v850_v1 = vadd.f32 %v834_v14, %v8064_v32  ;;  %v847_v10 = vadd.f32 %v831_v15, %v8064_v32  ;;  %v848_v19 = vadd.f32 %v832_v13, %v8064_v32  ;;  %v7058_v15 = vld [vmem:[%s10448_s5 + $0x8] sm:$0xff]  ;;  %v7060_v13 = vld [vmem:[%s10448_s5 + $0x18] sm:$0xff] }
 0x17e   :  { %v843_v20 = vadd.f32 %v827_v18, %v8064_v32  ;;  %v844_v55 = vadd.f32 %v828_v5, %v8064_v32  ;;  %v845_v26 = vadd.f32 %v829_v50, %v8064_v32  ;;  %v846_v28 = vadd.f32 %v830_v17, %v8064_v32  ;;  %v7061_v50 = vld [vmem:[%s10448_s5 + $0x20] sm:$0xff]  ;;  %v7062_v17 = vld [vmem:[%s10448_s5 + $0x28] sm:$0xff]  ;;  %v7063_v18 = vld [vmem:[%s10448_s5 + $0x30] sm:$0xff] }
 0x17f   :  { %v865_v23 = vmax.f32 %v849_v61, 0.0  ;;  %v866_v25 = vmax.f32 %v850_v1, 0.0  ;;  %v863_v29 = vmax.f32 %v847_v10, 0.0  ;;  %v864_v62 = vmax.f32 %v848_v19, 0.0  ;;  %v7064_v5 = vld [vmem:[%s10448_s5 + $0x38] sm:$0xff]  ;;  %v7065_v61 = vld [vmem:[%s10448_s5 + $0x40] sm:$0xff] }
 0x180   :  { %v859_v31 = vmax.f32 %v843_v20, 0.0  ;;  %v860_v33 = vmax.f32 %v844_v55, 0.0  ;;  %v809_v2 = vmul.f32 %v802_v63, %v8012_v54  ;;  %v810_v36 = vmul.f32 %v802_v63, %v8018_v22  ;;  %v7066_v19 = vld [vmem:[%s10448_s5 + $0x48] sm:$0xff] }
 0x181   :  { %v874_v34 = vpack.c.bf16 %v866_v25, %v865_v23  ;;  %v873_v38 = vpack.c.bf16 %v864_v62, %v863_v29  ;;  %v861_v7 = vmax.f32 %v845_v26, 0.0  ;;  %v862_v40 = vmax.f32 %v846_v28, 0.0  ;;  %v7067_v23 = vld [vmem:[%s10448_s5 + $0x50] sm:$0xff]  ;;  %v7068_v29 = vld [vmem:[%s10448_s5 + $0x58] sm:$0xff] }
 0x182   :  { %v871_v37 = vpack.c.bf16 %v860_v33, %v859_v31  ;;  %v825_v51 = vmul.f32 %v809_v2, %v8059_v0  ;;  %v826_v52 = vmul.f32 %v810_v36, %v8059_v0  ;;  %v807_v8 = vmul.f32 %v802_v63, %v7993_v48 }
 0x183   :  { %1131 = vmatpush.bf16.msrb.mxu0 %v874_v34  ;;  %v808_v21 = vmul.f32 %v802_v63, %v8005_v16  ;;  %v872_v41 = vpack.c.bf16 %v862_v40, %v861_v7  ;;  %v805_v24 = vmul.f32 %v802_v63, %v7990_v47  ;;  %v806_v54 = vmul.f32 %v802_v63, %v7996_v49  ;;  %v7069_v34 = vld [vmem:[%s10448_s5 + $0x60] sm:$0xff]  ;;  %v7071_v40 = vld [vmem:[%s10448_s5 + $0x70] sm:$0xff] }
 0x184   :  { %v841_v22 = vadd.f32 %v825_v51, %v8064_v32  ;;  %v842_v42 = vadd.f32 %v826_v52, %v8064_v32  ;;  %v823_v35 = vmul.f32 %v807_v8, %v8059_v0  ;;  %v803_v16 = vmul.f32 %v802_v63, %v7984_v43 }
 0x185   :  { %v824_v53 = vmul.f32 %v808_v21, %v8059_v0  ;;  %v821_v45 = vmul.f32 %v805_v24, %v8059_v0  ;;  %v822_v48 = vmul.f32 %v806_v54, %v8059_v0  ;;  %v804_v56 = vmul.f32 %v802_v63, %v7987_v44  ;;  %v7072_v21 = vld [vmem:[%s10448_s5 + $0x78] sm:$0xff] }
 0x186   :  { %v857_v47 = vmax.f32 %v841_v22, 0.0  ;;  %v858_v57 = vmax.f32 %v842_v42, 0.0  ;;  %v839_v49 = vadd.f32 %v823_v35, %v8064_v32  ;;  %v819_v60 = vmul.f32 %v803_v16, %v8059_v0  ;;  %v7073_v22 = vld [vmem:[%s10448_s5 + $0x80] sm:$0xff]  ;;  %v7075_v16 = vld [vmem:[%s10448_s5 + $0x90] sm:$0xff] }
 0x187   :  { %1132 = vmatpush.bf16.msrb.mxu0 %v873_v38  ;;  %v840_v58 = vadd.f32 %v824_v53, %v8064_v32  ;;  %v837_v59 = vadd.f32 %v821_v45, %v8064_v32  ;;  %v820_v27 = vmul.f32 %v804_v56, %v8059_v0  ;;  %v838_v43 = vadd.f32 %v822_v48, %v8064_v32  ;;  %v7057_v0 = vld [vmem:[%s10448_s5] sm:$0xff]  ;;  %v7074_v53 = vld [vmem:[%s10448_s5 + $0x88] sm:$0xff] }
 0x188   :  { %v870_v30 = vpack.c.bf16 %v858_v57, %v857_v47  ;;  %v855_v3 = vmax.f32 %v839_v49, 0.0  ;;  %v835_v44 = vadd.f32 %v819_v60, %v8064_v32  ;;  %v7104_v47 = vld [vmem:[%s10449_s2 + $0x78] sm:$0xff]  ;;  %v7103_v49 = vld [vmem:[%s10449_s2 + $0x70] sm:$0xff]  ;;  %v7102_v60 = vld [vmem:[%s10449_s2 + $0x68] sm:$0xff] }
 0x189   :  { %v856_v39 = vmax.f32 %v840_v58, 0.0  ;;  %v853_v4 = vmax.f32 %v837_v59, 0.0  ;;  %v854_v6 = vmax.f32 %v838_v43, 0.0  ;;  %v836_v9 = vadd.f32 %v820_v27, %v8064_v32  ;;  %v7059_v32 = vld [vmem:[%s10448_s5 + $0x10] sm:$0xff]  ;;  %2007 = vmatpush.bf16.msrb.mxu2 %v7104_v47  ;;  %v7096_v58 = vld [vmem:[%s10449_s2 + $0x38] sm:$0xff]  ;;  %v7094_v43 = vld [vmem:[%s10449_s2 + $0x28] sm:$0xff] }
 0x18a   :  { %v851_v11 = vmax.f32 %v835_v44, 0.0  ;;  %1988 = vmatpush.bf16.msrb.mxu1 %v7096_v58  ;;  %v7076_v27 = vld [vmem:[%s10448_s5 + $0x98] sm:$0xff] }
 0x18b   :  { %1133 = vmatpush.bf16.msrb.mxu0 %v872_v41  ;;  %v869_v63 = vpack.c.bf16 %v856_v39, %v855_v3  ;;  %v868_v46 = vpack.c.bf16 %v854_v6, %v853_v4  ;;  %v852_v12 = vmax.f32 %v836_v9, 0.0  ;;  %v7095_v3 = vld [vmem:[%s10449_s2 + $0x30] sm:$0xff]  ;;  %v7101_v39 = vld [vmem:[%s10449_s2 + $0x60] sm:$0xff]  ;;  %v7100_v44 = vld [vmem:[%s10449_s2 + $0x58] sm:$0xff] }
 0x18c   :  { %v7093_v4 = vld [vmem:[%s10449_s2 + $0x20] sm:$0xff]  ;;  %v7099_v6 = vld [vmem:[%s10449_s2 + $0x50] sm:$0xff] }
 0x18d   :  { %v867_v14 = vpack.c.bf16 %v852_v12, %v851_v11  ;;  %2008 = vmatpush.bf16.msrb.mxu2 %v7103_v49  ;;  %v7098_v11 = vld [vmem:[%s10449_s2 + $0x48] sm:$0xff]  ;;  %v7077_v12 = vld [vmem:[%s10448_s5 + $0xa0] sm:$0xff] }
 0x18e   :  { %1989 = vmatpush.bf16.msrb.mxu1 %v7095_v3 }
 0x18f   :  { %1134 = vmatpush.bf16.msrb.mxu0 %v871_v37  ;;  %v7070_v37 = vld [vmem:[%s10448_s5 + $0x68] sm:$0xff] }
 0x191   :  { %2009 = vmatpush.bf16.msrb.mxu2 %v7102_v60 }
 0x192   :  { %1990 = vmatpush.bf16.msrb.mxu1 %v7094_v43 }
 0x193   :  { %1135 = vmatpush.bf16.msrb.mxu0 %v870_v30 }
 0x195   :  { %2010 = vmatpush.bf16.msrb.mxu2 %v7101_v39 }
 0x196   :  { %1991 = vmatpush.bf16.msrb.mxu1 %v7093_v4 }
 0x197   :  { %1136 = vmatpush.bf16.msrb.mxu0 %v869_v63 }
 0x199   :  { %2011 = vmatpush.bf16.msrb.mxu2 %v7100_v44 }
 0x19b   :  { %1137 = vmatpush.bf16.msrb.mxu0 %v868_v46  ;;  %v7092_v46 = vld [vmem:[%s10449_s2 + $0x18] sm:$0xff] }
 0x19c   :  { %1992 = vmatpush.bf16.msrb.mxu1 %v7092_v46 }
 0x19d   :  { %2012 = vmatpush.bf16.msrb.mxu2 %v7099_v6 }
 0x19f   :  { %1138 = vmatpush.bf16.msrb.mxu0 %v867_v14 }
 0x1a1   :  { %2013 = vmatpush.bf16.msrb.mxu2 %v7098_v11  ;;  %v7082_v11 = vld [vmem:[%s10448_s5 + $0xc8] sm:$0xff] }
 0x1a2   :  { %1139 = vmatmul.bf16.vlgmr.msrb.gmra.mxu0 %v7057_v0  ;;  %v7091_v0 = vld [vmem:[%s10449_s2 + $0x10] sm:$0xff] }
 0x1a3   :  { %1993 = vmatpush.bf16.msrb.mxu1 %v7091_v0 }
 0x1b2   :  { %1144 = vmatmul.bf16.gmra.mxu0 %v7058_v15  ;;  %v7097_v15 = vld [vmem:[%s10449_s2 + $0x40] sm:$0xff] }
 0x1b3   :  { %2014 = vmatpush.bf16.msrb.mxu2 %v7097_v15  ;;  %v7083_v15 = vld [vmem:[%s10448_s5 + $0xd0] sm:$0xff] }
 0x1c2   :  { %1149 = vmatmul.bf16.gmra.mxu0 %v7059_v32  ;;  %v7090_v32 = vld [vmem:[%s10449_s2 + $0x8] sm:$0xff] }
 0x1c3   :  { %1994 = vmatpush.bf16.msrb.mxu1 %v7090_v32 }
 0x1d2   :  { %1154 = vmatmul.bf16.gmra.mxu0 %v7060_v13 }
 0x1e2   :  { %1159 = vmatmul.bf16.gmra.mxu0 %v7061_v50  ;;  %v7089_v50 = vld [vmem:[%s10449_s2] sm:$0xff] }
 0x1e3   :  { %1995 = vmatpush.bf16.msrb.mxu1 %v7089_v50  ;;  %v7119_v50 = vld [vmem:[%s10449_s2 + $0xf0] sm:$0xff] }
 0x1f2   :  { %1164 = vmatmul.bf16.gmra.mxu0 %v7062_v17  ;;  %v7112_v17 = vld [vmem:[%s10449_s2 + $0xb8] sm:$0xff] }
 0x1f3   :  { %2026 = vmatpush.bf16.msrb.mxu3 %v7112_v17 }
 0x202   :  { %1169 = vmatmul.bf16.gmra.mxu0 %v7063_v18  ;;  %v7078_v18 = vld [vmem:[%s10448_s5 + $0xa8] sm:$0xff] }
 0x212   :  { %1174 = vmatmul.bf16.gmra.mxu0 %v7064_v5 }
 0x21f   :  { %v8135_v1 = vpop.f32.mrf.mxu0 }
 0x222   :  { %1179 = vmatmul.bf16.gmra.mxu0 %v7065_v61  ;;  %v7111_v61 = vld [vmem:[%s10449_s2 + $0xb0] sm:$0xff] }
 0x223   :  { %2027 = vmatpush.bf16.msrb.mxu3 %v7111_v61 }
 0x227   :  { %v8137_v10 = vpop.f32.mrf.mxu0 }
 0x22f   :  { %v8142_v20 = vpop.f32.mrf.mxu0 }
 0x232   :  { %1184 = vmatmul.bf16.gmra.mxu0 %v7066_v19  ;;  %v7110_v19 = vld [vmem:[%s10449_s2 + $0xa8] sm:$0xff] }
 0x233   :  { %2028 = vmatpush.bf16.msrb.mxu3 %v7110_v19 }
 0x237   :  { %v8144_v55 = vpop.f32.mrf.mxu0 }
 0x23f   :  { %v1150_v25 = vpop.f32.mrf.mxu0 }
 0x242   :  { %1189 = vmatmul.bf16.gmra.mxu0 %v7067_v23 }
 0x247   :  { %v1152_v26 = vpop.f32.mrf.mxu0 }
 0x248   :  { %v7490_v28 = vpack.i.bf16 %v1152_v26, %v1150_v25  ;;  %v7109_v25 = vld [vmem:[%s10449_s2 + $0xa0] sm:$0xff]  ;;  %v7108_v26 = vld [vmem:[%s10449_s2 + $0x98] sm:$0xff] }
 0x249   :  { %2029 = vmatpush.bf16.msrb.mxu3 %v7109_v25 }
 0x24d   :  { %2030 = vmatpush.bf16.msrb.mxu3 %v7108_v26  ;;  %v7084_v26 = vld [vmem:[%s10448_s5 + $0xd8] sm:$0xff] }
 0x24f   :  { %v1155_v62 = vpop.f32.mrf.mxu0 }
 0x252   :  { %1194 = vmatmul.bf16.gmra.mxu0 %v7068_v29 }
 0x257   :  { %v1157_v31 = vpop.f32.mrf.mxu0 }
 0x258   :  { %v7500_v33 = vpack.i.bf16 %v1157_v31, %v1155_v62  ;;  %v7079_v31 = vld [vmem:[%s10448_s5 + $0xb0] sm:$0xff] }
 0x25f   :  { %v8155_v2 = vpop.f32.mrf.mxu0 }
 0x262   :  { %1199 = vmatmul.bf16.gmra.mxu0 %v7069_v34 }
 0x267   :  { %v8157_v36 = vpop.f32.mrf.mxu0 }
 0x26f   :  { %v8162_v38 = vpop.f32.mrf.mxu0 }
 0x272   :  { %1204 = vmatmul.bf16.gmra.mxu0 %v7070_v37 }
 0x277   :  { %v8164_v7 = vpop.f32.mrf.mxu0 }
 0x27f   :  { %v1170_v51 = vpop.f32.mrf.mxu0 }
 0x282   :  { %1209 = vmatmul.bf16.gmra.mxu0 %v7071_v40  ;;  %v7107_v40 = vld [vmem:[%s10449_s2 + $0x90] sm:$0xff] }
 0x283   :  { %2031 = vmatpush.bf16.msrb.mxu3 %v7107_v40 }
 0x287   :  { %v1172_v52 = vpop.f32.mrf.mxu0 }
 0x288   :  { %v7485_v8 = vpack.i.bf16 %v1172_v52, %v1170_v51  ;;  %v7106_v52 = vld [vmem:[%s10449_s2 + $0x88] sm:$0xff] }
 0x289   :  { %2032 = vmatpush.bf16.msrb.mxu3 %v7106_v52 }
 0x28a   :  { %7486 = vrot.lane.b32.xlu0 %v7485_v8, %s7580_s24 }
 0x28f   :  { %v1175_v41 = vpop.f32.mrf.mxu0 }
 0x292   :  { %1214 = vmatmul.bf16.gmra.mxu0 %v7072_v21  ;;  %7491 = vrot.lane.b32.xlu0 %v7490_v28, %s7580_s24 }
 0x297   :  { %v1177_v24 = vpop.f32.mrf.mxu0 }
 0x298   :  { %v7495_v54 = vpack.i.bf16 %v1177_v24, %v1175_v41 }
 0x29a   :  { %7496 = vrot.lane.b32.xlu1 %v7495_v54, %s7580_s24  ;;  %v7105_v54 = vld [vmem:[%s10449_s2 + $0x80] sm:$0xff] }
 0x29b   :  { %2033 = vmatpush.bf16.msrb.mxu3 %v7105_v54  ;;  %v7126_v54 = vld [vmem:[%s10449_s2 + $0x128] sm:$0xff] }
 0x29f   :  { %v8178_v42 = vpop.f32.mrf.mxu0 }
 0x2a2   :  { %1219 = vmatmul.bf16.gmra.mxu0 %v7073_v22  ;;  %7501 = vrot.lane.b32.xlu1 %v7500_v33, %s7580_s24 }
 0x2a7   :  { %v8181_v35 = vpop.f32.mrf.mxu0 }
 0x2af   :  { %v8186_v45 = vpop.f32.mrf.mxu0 }
 0x2b2   :  { %1224 = vmatmul.bf16.gmra.mxu0 %v7074_v53 }
 0x2b7   :  { %v8188_v48 = vpop.f32.mrf.mxu0 }
 0x2bf   :  { %v1190_v56 = vpop.f32.mrf.mxu0 }
 0x2c2   :  { %1229 = vmatmul.bf16.gmra.mxu0 %v7075_v16 }
 0x2c7   :  { %v1192_v57 = vpop.f32.mrf.mxu0 }
 0x2c8   :  { %v7505_v59 = vpack.i.bf16 %v1192_v57, %v1190_v56 }
 0x2ca   :  { %7506 = vrot.lane.b32.xlu2 %v7505_v59, %s7580_s24 }
 0x2cf   :  { %v1195_v30 = vpop.f32.mrf.mxu0 }
 0x2d2   :  { %1234 = vmatmul.bf16.gmra.mxu0 %v7076_v27 }
 0x2d7   :  { %v1197_v63 = vpop.f32.mrf.mxu0 }
 0x2d8   :  { %v7520_v9 = vpack.i.bf16 %v1197_v63, %v1195_v30 }
 0x2da   :  { %7521 = vrot.lane.b32.xlu1 %v7520_v9, %s7580_s24 }
 0x2df   :  { %v8237_v14 = vpop.f32.mrf.mxu0 }
 0x2e2   :  { %1239 = vmatmul.bf16.gmra.mxu0 %v7077_v12 }
 0x2e7   :  { %v8248_v13 = vpop.f32.mrf.mxu0 }
 0x2ef   :  { %v8259_v5 = vpop.f32.mrf.mxu0 }
 0x2f2   :  { %1244 = vmatmul.bf16.gmra.mxu0 %v7078_v18  ;;  %v7118_v18 = vld [vmem:[%s10449_s2 + $0xe8] sm:$0xff] }
 0x2f7   :  { %v8267_v23 = vpop.f32.mrf.mxu0 }
 0x2fc   :  { %v7487_v28 = vpop.permute.xlu0 %7486 }
 0x2fd   :  { %v7489_v29 = vunpack.i.h.bf16 %v7487_v28  ;;  %v7488_v62 = vunpack.i.l.bf16 %v7487_v28 }
 0x2ff   :  { %v1210_v33 = vpop.f32.mrf.mxu0  ;;  %v1432_v34 = vsel %vm676_vm0, %v8155_v2, %v7488_v62  ;;  %v1433_v37 = vsel %vm676_vm0, %v8157_v36, %v7489_v29 }
 0x300   :  { %v1461_v51 = vpack.c.bf16 %v1433_v37, %v1432_v34  ;;  %v7116_v34 = vld [vmem:[%s10449_s2 + $0xd8] sm:$0xff] }
 0x302   :  { %1249 = vmatmul.bf16.gmra.mxu0 %v7079_v31  ;;  %2015 = vmatmul.bf16.vlgmr.msrb.gmra.mxu2 %v1461_v51  ;;  %v7117_v31 = vld [vmem:[%s10449_s2 + $0xe0] sm:$0xff] }
 0x303   :  { %v7085_v51 = vld [vmem:[%s10448_s5 + $0xe0] sm:$0xff] }
 0x304   :  { %v7492_v8 = vpop.permute.xlu0 %7491 }
 0x305   :  { %v7494_v21 = vunpack.i.h.bf16 %v7492_v8  ;;  %v7493_v41 = vunpack.i.l.bf16 %v7492_v8  ;;  %v7113_v8 = vld [vmem:[%s10449_s2 + $0xc0] sm:$0xff] }
 0x307   :  { %v1212_v24 = vpop.f32.mrf.mxu0  ;;  %v1428_v2 = vsel %vm676_vm0, %v8135_v1, %v7493_v41  ;;  %v1429_v36 = vsel %vm676_vm0, %v8137_v10, %v7494_v21  ;;  %v7080_v1 = vld [vmem:[%s10448_s5 + $0xb8] sm:$0xff] }
 0x308   :  { %v7515_v22 = vpack.i.bf16 %v1212_v24, %v1210_v33  ;;  %v1460_v53 = vpack.c.bf16 %v1429_v36, %v1428_v2  ;;  %v7128_v41 = vld [vmem:[%s10449_s2 + $0x138] sm:$0xff]  ;;  %v7086_v24 = vld [vmem:[%s10448_s5 + $0xe8] sm:$0xff]  ;;  %v7127_v36 = vld [vmem:[%s10449_s2 + $0x130] sm:$0xff] }
 0x309   :  { %2064 = vmatpush.bf16.msra.mxu2 %v7128_v41  ;;  %v7130_v41 = vld [vmem:[%s10449_s2 + $0x148] sm:$0xff] }
 0x30a   :  { %1996 = vmatmul.bf16.vlgmr.msrb.gmra.mxu1 %v1460_v53  ;;  %7516 = vrot.lane.b32.xlu0 %v7515_v22, %s7580_s24  ;;  %v7125_v53 = vld [vmem:[%s10449_s2 + $0x120] sm:$0xff] }
 0x30c   :  { %v7497_v16 = vpop.permute.xlu1 %7496 }
 0x30d   :  { %v7499_v56 = vunpack.i.h.bf16 %v7497_v16  ;;  %v7498_v47 = vunpack.i.l.bf16 %v7497_v16  ;;  %2065 = vmatpush.bf16.msra.mxu2 %v7127_v36  ;;  %v7124_v16 = vld [vmem:[%s10449_s2 + $0x118] sm:$0xff]  ;;  %v7129_v36 = vld [vmem:[%s10449_s2 + $0x140] sm:$0xff] }
 0x30f   :  { %v1215_v57 = vpop.f32.mrf.mxu0  ;;  %v1434_v10 = vsel %vm676_vm0, %v8162_v38, %v7498_v47  ;;  %v1435_v49 = vsel %vm676_vm0, %v8164_v7, %v7499_v56  ;;  %v7081_v38 = vld [vmem:[%s10448_s5 + $0xc0] sm:$0xff] }
 0x310   :  { %v1469_v58 = vpack.c.bf16 %v1435_v49, %v1434_v10 }
 0x311   :  { %2066 = vmatpush.bf16.msra.mxu2 %v7126_v54 }
 0x312   :  { %1254 = vmatmul.bf16.gmra.mxu0 %v7080_v1  ;;  %2020 = vmatmul.bf16.gmra.mxu2 %v1469_v58 }
 0x314   :  { %v7502_v59 = vpop.permute.xlu1 %7501 }
 0x315   :  { %v7504_v60 = vunpack.i.h.bf16 %v7502_v59  ;;  %v7503_v27 = vunpack.i.l.bf16 %v7502_v59  ;;  %2067 = vmatpush.bf16.msra.mxu2 %v7125_v53 }
 0x317   :  { %v1217_v30 = vpop.f32.mrf.mxu0  ;;  %v1430_v3 = vsel %vm676_vm0, %v8142_v20, %v7503_v27  ;;  %v1431_v39 = vsel %vm676_vm0, %v8144_v55, %v7504_v60  ;;  %v7123_v60 = vld [vmem:[%s10449_s2 + $0x110] sm:$0xff]  ;;  %v7122_v27 = vld [vmem:[%s10449_s2 + $0x108] sm:$0xff] }
 0x318   :  { %v7530_v43 = vpack.i.bf16 %v1217_v30, %v1215_v57  ;;  %v1468_v44 = vpack.c.bf16 %v1431_v39, %v1430_v3  ;;  %v7087_v57 = vld [vmem:[%s10448_s5 + $0xf0] sm:$0xff] }
 0x319   :  { %2068 = vmatpush.bf16.msra.mxu2 %v7124_v16 }
 0x31a   :  { %2001 = vmatmul.bf16.gmra.mxu1 %v1468_v44  ;;  %7531 = vrot.lane.b32.xlu0 %v7530_v43, %s7580_s24 }
 0x31d   :  { %2069 = vmatpush.bf16.msra.mxu2 %v7123_v60 }
 0x31f   :  { %v8311_v7 = vpop.f32.mrf.mxu0 }
 0x321   :  { %2070 = vmatpush.bf16.msra.mxu2 %v7122_v27  ;;  %v7142_v27 = vld [vmem:[%s10449_s2 + $0x1a8] sm:$0xff] }
 0x322   :  { %1259 = vmatmul.bf16.gmra.mxu0 %v7081_v38 }
 0x324   :  { %v7507_v63 = vpop.permute.xlu2 %7506 }
 0x325   :  { %v7509_v4 = vunpack.i.h.bf16 %v7507_v63  ;;  %v7508_v6 = vunpack.i.l.bf16 %v7507_v63 }
 0x327   :  { %v8313_v9 = vpop.f32.mrf.mxu0  ;;  %v1436_v20 = vsel %vm676_vm0, %v8178_v42, %v7508_v6  ;;  %v1437_v55 = vsel %vm676_vm0, %v8181_v35, %v7509_v4  ;;  %v7120_v42 = vld [vmem:[%s10449_s2 + $0xf8] sm:$0xff] }
 0x328   :  { %v1462_v46 = vpack.c.bf16 %v1437_v55, %v1436_v20  ;;  %2045 = vmatpush.bf16.msra.mxu1 %v7120_v42  ;;  %v7088_v4 = vld [vmem:[%s10448_s5 + $0xf8] sm:$0xff] }
 0x32a   :  { %2034 = vmatmul.bf16.vlgmr.msrb.gmra.mxu3 %v1462_v46 }
 0x32c   :  { %2046 = vmatpush.bf16.msra.mxu1 %v7119_v50 }
 0x32f   :  { %v8322_v12 = vpop.f32.mrf.mxu0 }
 0x330   :  { %2047 = vmatpush.bf16.msra.mxu1 %v7118_v18 }
 0x332   :  { %1264 = vmatmul.bf16.gmra.mxu0 %v7082_v11 }
 0x334   :  { %2048 = vmatpush.bf16.msra.mxu1 %v7117_v31  ;;  %v7136_v31 = vld [vmem:[%s10449_s2 + $0x178] sm:$0xff] }
 0x335   :  { %2083 = vmatpush.bf16.msra.mxu3 %v7136_v31 }
 0x337   :  { %v8324_v0 = vpop.f32.mrf.mxu0 }
 0x338   :  { %2049 = vmatpush.bf16.msra.mxu1 %v7116_v34  ;;  %v7135_v34 = vld [vmem:[%s10449_s2 + $0x170] sm:$0xff] }
 0x339   :  { %2084 = vmatpush.bf16.msra.mxu3 %v7135_v34 }
 0x33f   :  { %v1230_v32 = vpop.f32.mrf.mxu0 }
 0x342   :  { %1269 = vmatmul.bf16.gmra.mxu0 %v7083_v15 }
 0x347   :  { %v1232_v35 = vpop.f32.mrf.mxu0 }
 0x348   :  { %v7510_v17 = vpack.i.bf16 %v1232_v35, %v1230_v32 }
 0x34a   :  { %7511 = vrot.lane.b32.xlu2 %v7510_v17, %s7580_s24 }
 0x34c   :  { %v7522_v61 = vpop.permute.xlu1 %7521 }
 0x34d   :  { %v7524_v19 = vunpack.i.h.bf16 %v7522_v61  ;;  %v7523_v25 = vunpack.i.l.bf16 %v7522_v61 }
 0x34f   :  { %v1235_v28 = vpop.f32.mrf.mxu0  ;;  %v1438_v29 = vsel %vm676_vm0, %v8186_v45, %v7523_v25  ;;  %v1439_v62 = vsel %vm676_vm0, %v8188_v48, %v7524_v19  ;;  %v7115_v45 = vld [vmem:[%s10449_s2 + $0xd0] sm:$0xff]  ;;  %v7114_v48 = vld [vmem:[%s10449_s2 + $0xc8] sm:$0xff] }
 0x350   :  { %v1470_v33 = vpack.c.bf16 %v1439_v62, %v1438_v29  ;;  %2050 = vmatpush.bf16.msra.mxu1 %v7115_v45  ;;  %v7133_v45 = vld [vmem:[%s10449_s2 + $0x160] sm:$0xff] }
 0x352   :  { %1274 = vmatmul.bf16.gmra.mxu0 %v7084_v26  ;;  %2039 = vmatmul.bf16.gmra.mxu3 %v1470_v33 }
 0x354   :  { %2051 = vmatpush.bf16.msra.mxu1 %v7114_v48 }
 0x357   :  { %v1237_v37 = vpop.f32.mrf.mxu0 }
 0x358   :  { %v7525_v40 = vpack.i.bf16 %v1237_v37, %v1235_v28  ;;  %2052 = vmatpush.bf16.msra.mxu1 %v7113_v8 }
 0x35a   :  { %7526 = vrot.lane.b32.xlu2 %v7525_v40, %s7580_s24  ;;  %v7132_v40 = vld [vmem:[%s10449_s2 + $0x158] sm:$0xff] }
 0x35f   :  { %v8362_v52 = vpop.f32.mrf.mxu0 }
 0x362   :  { %1279 = vmatmul.bf16.gmra.mxu0 %v7085_v51  ;;  %v7131_v51 = vld [vmem:[%s10449_s2 + $0x150] sm:$0xff] }
 0x367   :  { %v8367_v21 = vpop.f32.mrf.mxu0 }
 0x36f   :  { %v8375_v2 = vpop.f32.mrf.mxu0 }
 0x372   :  { %1284 = vmatmul.bf16.gmra.mxu0 %v7086_v24 }
 0x377   :  { %v8383_v22 = vpop.f32.mrf.mxu0 }
 0x37c   :  { %v7517_v56 = vpop.permute.xlu0 %7516 }
 0x37d   :  { %v7519_v47 = vunpack.i.h.bf16 %v7517_v56  ;;  %v7518_v1 = vunpack.i.l.bf16 %v7517_v56  ;;  %v7144_v56 = vld [vmem:[%s10449_s2 + $0x1b8] sm:$0xff] }
 0x37e   :  { %2102 = vmatpush.bf16.msrb.mxu1 %v7144_v56 }
 0x37f   :  { %v1441_v10 = vsel %vm676_vm0, %v8248_v13, %v7519_v47  ;;  %v1440_v49 = vsel %vm676_vm0, %v8237_v14, %v7518_v1  ;;  %v1250_v58 = vpop.f32.mrf.mxu0  ;;  %v7121_v14 = vld [vmem:[%s10449_s2 + $0x100] sm:$0xff]  ;;  %v7143_v1 = vld [vmem:[%s10449_s2 + $0x1b0] sm:$0xff] }
 0x380   :  { %v1463_v59 = vpack.c.bf16 %v1441_v10, %v1440_v49  ;;  %2071 = vmatpush.bf16.msra.mxu2 %v7121_v14 }
 0x382   :  { %1289 = vmatmul.bf16.gmra.mxu0 %v7087_v57  ;;  %2053 = vmatmul.bf16.vlgmr.msra.gmra.mxu1 %v1463_v59 }
 0x383   :  { %2103 = vmatpush.bf16.msrb.mxu1 %v7143_v1 }
 0x385   :  { %v2016_v30 = vpop.f32.mrf.mxu2 }
 0x387   :  { %v1252_v3 = vpop.f32.mrf.mxu0  ;;  %v1997_v39 = vpop.f32.mrf.mxu1  ;;  %2104 = vmatpush.bf16.msrb.mxu1 %v7142_v27 }
 0x388   :  { %v7535_v13 = vpack.i.bf16 %v1252_v3, %v1250_v58  ;;  %v8404_v43 = vadd.f32 %v2016_v30, %v1997_v39 }
 0x38a   :  { %7536 = vrot.lane.b32.xlu1 %v7535_v13, %s7580_s24 }
 0x38c   :  { %v7532_v44 = vpop.permute.xlu0 %7531 }
 0x38d   :  { %v7534_v38 = vunpack.i.h.bf16 %v7532_v44  ;;  %v7533_v63 = vunpack.i.l.bf16 %v7532_v44  ;;  %v2018_v56 = vpop.f32.mrf.mxu2 }
 0x38f   :  { %v1255_v6 = vpop.f32.mrf.mxu0  ;;  %v1442_v20 = vsel %vm676_vm0, %v8259_v5, %v7533_v63  ;;  %v1443_v55 = vsel %vm676_vm0, %v8267_v23, %v7534_v38 }
 0x390   :  { %v1471_v46 = vpack.c.bf16 %v1443_v55, %v1442_v20 }
 0x392   :  { %1294 = vmatmul.bf16.gmra.mxu0 %v7088_v4  ;;  %2058 = vmatmul.bf16.gmra.mxu1 %v1471_v46  ;;  %v7140_v4 = vld [vmem:[%s10449_s2 + $0x198] sm:$0xff] }
 0x393   :  { %v7152_v46 = vld [vmem:[%s10449_s2 + $0x1f8] sm:$0xff] }
 0x394   :  { %2121 = vmatpush.bf16.msrb.mxu2 %v7152_v46 }
 0x397   :  { %v1257_v11 = vpop.f32.mrf.mxu0 }
 0x398   :  { %v7550_v15 = vpack.i.bf16 %v1257_v11, %v1255_v6  ;;  %v7139_v6 = vld [vmem:[%s10449_s2 + $0x190] sm:$0xff] }
 0x399   :  { %v7151_v11 = vld [vmem:[%s10449_s2 + $0x1f0] sm:$0xff] }
 0x39a   :  { %7551 = vrot.lane.b32.xlu1 %v7550_v15, %s7580_s24  ;;  %2122 = vmatpush.bf16.msrb.mxu2 %v7151_v11  ;;  %v7150_v15 = vld [vmem:[%s10449_s2 + $0x1e8] sm:$0xff] }
 0x39e   :  { %2123 = vmatpush.bf16.msrb.mxu2 %v7150_v15 }
 0x39f   :  { %v8418_v32 = vpop.f32.mrf.mxu0 }
 0x3a4   :  { %v7512_v42 = vpop.permute.xlu2 %7511 }
 0x3a5   :  { %v7514_v35 = vunpack.i.h.bf16 %v7512_v42  ;;  %v7513_v50 = vunpack.i.l.bf16 %v7512_v42  ;;  %v7149_v42 = vld [vmem:[%s10449_s2 + $0x1e0] sm:$0xff] }
 0x3a6   :  { %2124 = vmatpush.bf16.msrb.mxu2 %v7149_v42 }
 0x3a7   :  { %v1445_v17 = vsel %vm676_vm0, %v8313_v9, %v7514_v35  ;;  %v1444_v5 = vsel %vm676_vm0, %v8311_v7, %v7513_v50  ;;  %v8424_v18 = vpop.f32.mrf.mxu0  ;;  %v7148_v35 = vld [vmem:[%s10449_s2 + $0x1d8] sm:$0xff] }
 0x3a8   :  { %v1464_v23 = vpack.c.bf16 %v1445_v17, %v1444_v5  ;;  %v7147_v17 = vld [vmem:[%s10449_s2 + $0x1d0] sm:$0xff] }
 0x3aa   :  { %2072 = vmatmul.bf16.vlgmr.msra.gmra.mxu2 %v1464_v23 }
 0x3ab   :  { %2125 = vmatpush.bf16.msrb.mxu2 %v7148_v35 }
 0x3af   :  { %v8426_v61 = vpop.f32.mrf.mxu0  ;;  %2126 = vmatpush.bf16.msrb.mxu2 %v7147_v17 }
 0x3b4   :  { %v7527_v19 = vpop.permute.xlu2 %7526 }
 0x3b5   :  { %v7529_v25 = vunpack.i.h.bf16 %v7527_v19  ;;  %v7528_v26 = vunpack.i.l.bf16 %v7527_v19 }
 0x3b7   :  { %v8428_v28 = vpop.f32.mrf.mxu0  ;;  %v1446_v29 = vsel %vm676_vm0, %v8322_v12, %v7528_v26  ;;  %v1447_v9 = vsel %vm676_vm0, %v8324_v0, %v7529_v25  ;;  %v7134_v12 = vld [vmem:[%s10449_s2 + $0x168] sm:$0xff] }
 0x3b8   :  { %v1472_v62 = vpack.c.bf16 %v1447_v9, %v1446_v29  ;;  %2085 = vmatpush.bf16.msra.mxu3 %v7134_v12  ;;  %v7146_v29 = vld [vmem:[%s10449_s2 + $0x1c8] sm:$0xff]  ;;  %v7145_v9 = vld [vmem:[%s10449_s2 + $0x1c0] sm:$0xff] }
 0x3b9   :  { %2127 = vmatpush.bf16.msrb.mxu2 %v7146_v29 }
 0x3ba   :  { %2077 = vmatmul.bf16.gmra.mxu2 %v1472_v62 }
 0x3bc   :  { %2086 = vmatpush.bf16.msra.mxu3 %v7133_v45 }
 0x3bd   :  { %2128 = vmatpush.bf16.msrb.mxu2 %v7145_v9 }
 0x3bf   :  { %v1270_v7 = vpop.f32.mrf.mxu0 }
 0x3c0   :  { %2087 = vmatpush.bf16.msra.mxu3 %v7132_v40 }
 0x3c4   :  { %2088 = vmatpush.bf16.msra.mxu3 %v7131_v51 }
 0x3c7   :  { %v1272_v33 = vpop.f32.mrf.mxu0 }
 0x3c8   :  { %v7545_v37 = vpack.i.bf16 %v1272_v33, %v1270_v7  ;;  %2089 = vmatpush.bf16.msra.mxu3 %v7130_v41 }
 0x3ca   :  { %7546 = vrot.lane.b32.xlu0 %v7545_v37, %s7580_s24 }
 0x3cc   :  { %2090 = vmatpush.bf16.msra.mxu3 %v7129_v36  ;;  %v1999_v36 = vpop.f32.mrf.mxu1 }
 0x3cf   :  { %v1275_v0 = vpop.f32.mrf.mxu0 }
 0x3d7   :  { %v1277_v48 = vpop.f32.mrf.mxu0 }
 0x3d8   :  { %v7560_v8 = vpack.i.bf16 %v1277_v48, %v1275_v0 }
 0x3da   :  { %7561 = vrot.lane.b32.xlu0 %v7560_v8, %s7580_s24 }
 0x3df   :  { %v8457_v24 = vpop.f32.mrf.mxu0 }
 0x3e7   :  { %v8462_v54 = vpop.f32.mrf.mxu0 }
 0x3ef   :  { %v8464_v53 = vpop.f32.mrf.mxu0 }
 0x3f7   :  { %v8466_v16 = vpop.f32.mrf.mxu0 }
 0x3fc   :  { %v7537_v47 = vpop.permute.xlu1 %7536 }
 0x3fd   :  { %v7539_v57 = vunpack.i.h.bf16 %v7537_v47  ;;  %v7538_v10 = vunpack.i.l.bf16 %v7537_v47  ;;  %v2002_v47 = vpop.f32.mrf.mxu1 }
 0x3ff   :  { %v1449_v49 = vsel %vm676_vm0, %v8367_v21, %v7539_v57  ;;  %v1448_v58 = vsel %vm676_vm0, %v8362_v52, %v7538_v10  ;;  %v1290_v59 = vpop.f32.mrf.mxu0  ;;  %v7141_v52 = vld [vmem:[%s10449_s2 + $0x1a0] sm:$0xff]  ;;  %v2035_v57 = vpop.f32.mrf.mxu3 }
 0x400   :  { %v1465_v60 = vpack.c.bf16 %v1449_v49, %v1448_v58  ;;  %2105 = vmatpush.bf16.msrb.mxu1 %v7141_v52 }
 0x402   :  { %2091 = vmatmul.bf16.vlgmr.msra.gmra.mxu3 %v1465_v60 }
 0x404   :  { %2106 = vmatpush.bf16.msrb.mxu1 %v7140_v4 }
 0x405   :  { %v2004_v1 = vpop.f32.mrf.mxu1 }
 0x407   :  { %v1292_v30 = vpop.f32.mrf.mxu0  ;;  %v2037_v49 = vpop.f32.mrf.mxu3 }
 0x408   :  { %v7540_v3 = vpack.i.bf16 %v1292_v30, %v1290_v59  ;;  %2107 = vmatpush.bf16.msrb.mxu1 %v7139_v6 }
 0x40a   :  { %7541 = vrot.lane.b32.xlu2 %v7540_v3, %s7580_s24 }
 0x40c   :  { %v7552_v39 = vpop.permute.xlu1 %7551 }
 0x40d   :  { %v7554_v13 = vunpack.i.h.bf16 %v7552_v39  ;;  %v7553_v14 = vunpack.i.l.bf16 %v7552_v39 }
 0x40f   :  { %v1295_v21 = vpop.f32.mrf.mxu0  ;;  %v1450_v44 = vsel %vm676_vm0, %v8375_v2, %v7553_v14  ;;  %v1451_v38 = vsel %vm676_vm0, %v8383_v22, %v7554_v13  ;;  %v7138_v2 = vld [vmem:[%s10449_s2 + $0x188] sm:$0xff]  ;;  %v7137_v22 = vld [vmem:[%s10449_s2 + $0x180] sm:$0xff]  ;;  %v2040_v60 = vpop.f32.mrf.mxu3 }
 0x410   :  { %v1473_v63 = vpack.c.bf16 %v1451_v38, %v1450_v44  ;;  %2108 = vmatpush.bf16.msrb.mxu1 %v7138_v2  ;;  %v2019_v38 = vadd.f32 %v2018_v56, %v1999_v36  ;;  %v2036_v2 = vadd.f32 %v2035_v57, %v8404_v43 }
 0x412   :  { %2096 = vmatmul.bf16.gmra.mxu3 %v1473_v63 }
 0x414   :  { %2109 = vmatpush.bf16.msrb.mxu1 %v7137_v22 }
 0x417   :  { %v1297_v20 = vpop.f32.mrf.mxu0 }
 0x418   :  { %v7555_v55 = vpack.i.bf16 %v1297_v20, %v1295_v21  ;;  %v2038_v20 = vadd.f32 %v2037_v49, %v2019_v38 }
 0x41a   :  { %7556 = vrot.lane.b32.xlu2 %v7555_v55, %s7580_s24 }
 0x43c   :  { %v7547_v50 = vpop.permute.xlu0 %7546 }
 0x43d   :  { %v7549_v5 = vunpack.i.h.bf16 %v7547_v50  ;;  %v7548_v23 = vunpack.i.l.bf16 %v7547_v50  ;;  %v7581_v50 = vmov 32.0  }
 0x43e   :  { %7569 = vrcp.f32 %v7581_v50 }
 0x43f   :  { %v1453_v19 = vsel %vm676_vm0, %v8424_v18, %v7549_v5  ;;  %v1452_v25 = vsel %vm676_vm0, %v8418_v32, %v7548_v23 }
 0x440   :  { %v1466_v26 = vpack.c.bf16 %v1453_v19, %v1452_v25 }
 0x442   :  { %2110 = vmatmul.bf16.vlgmr.msrb.gmra.mxu1 %v1466_v26 }
 0x44c   :  { %v7562_v62 = vpop.permute.xlu0 %7561 }
 0x44d   :  { %v7564_v7 = vunpack.i.h.bf16 %v7562_v62  ;;  %v7563_v31 = vunpack.i.l.bf16 %v7562_v62 }
 0x44f   :  { %v1454_v18 = vsel %vm676_vm0, %v8426_v61, %v7563_v31  ;;  %v1455_v32 = vsel %vm676_vm0, %v8428_v28, %v7564_v7  ;;  %v7570_v31 = vpop.eup %7569 }
 0x450   :  { %v1474_v33 = vpack.c.bf16 %v1455_v32, %v1454_v18  ;;  %vm2156_vm5 = vweird.f32 %v7570_v31 }
 0x452   :  { %2115 = vmatmul.bf16.gmra.mxu1 %v1474_v33 }
 0x464   :  { %v7542_v34 = vpop.permute.xlu2 %7541 }
 0x465   :  { %v7544_v37 = vunpack.i.h.bf16 %v7542_v34  ;;  %v7543_v12 = vunpack.i.l.bf16 %v7542_v34 }
 0x467   :  { %v1457_v0 = vsel %vm676_vm0, %v8462_v54, %v7544_v37  ;;  %v1456_v45 = vsel %vm676_vm0, %v8457_v24, %v7543_v12  ;;  %v2021_v54 = vpop.f32.mrf.mxu2  ;;  %v2054_v24 = vpop.f32.mrf.mxu1 }
 0x468   :  { %v1467_v40 = vpack.c.bf16 %v1457_v0, %v1456_v45  ;;  %v2022_v6 = vadd.f32 %v2021_v54, %v2002_v47  ;;  %v2055_v15 = vadd.f32 %v2054_v24, %v2036_v2  ;;  %v2152_v45 = vmul.f32 32.0, %v7570_v31 }
 0x46a   :  { %2129 = vmatmul.bf16.vlgmr.msrb.gmra.mxu2 %v1467_v40  ;;  %v2041_v22 = vadd.f32 %v2040_v60, %v2022_v6 }
 0x46f   :  { %v2023_v10 = vpop.f32.mrf.mxu2  ;;  %v2056_v58 = vpop.f32.mrf.mxu1 }
 0x470   :  { %v2057_v46 = vadd.f32 %v2056_v58, %v2038_v20  ;;  %v2024_v11 = vadd.f32 %v2023_v10, %v2004_v1 }
 0x474   :  { %v7557_v48 = vpop.permute.xlu2 %7556 }
 0x475   :  { %v7559_v51 = vunpack.i.h.bf16 %v7557_v48  ;;  %v7558_v8 = vunpack.i.l.bf16 %v7557_v48 }
 0x477   :  { %v1458_v61 = vsel %vm676_vm0, %v8464_v53, %v7558_v8  ;;  %v1459_v28 = vsel %vm676_vm0, %v8466_v16, %v7559_v51  ;;  %v2073_v59 = vpop.f32.mrf.mxu2  ;;  %v2059_v27 = vpop.f32.mrf.mxu1 }
 0x478   :  { %v1475_v41 = vpack.c.bf16 %v1459_v28, %v1458_v61  ;;  %v2042_v53 = vpop.f32.mrf.mxu3  ;;  %v2060_v42 = vadd.f32 %v2059_v27, %v2041_v22  ;;  %v2074_v5 = vadd.f32 %v2073_v59, %v2055_v15  ;;  %v2153_v28 = vsub.f32 1.0, %v2152_v45  ;;  %v7153_v45 = vld [vmem:[%s10450_s6] sm:$0xff] }
 0x479   :  { %v2043_v17 = vadd.f32 %v2042_v53, %v2024_v11 }
 0x47a   :  { %2134 = vmatmul.bf16.gmra.mxu2 %v1475_v41  ;;  %v2154_v56 = vmul.f32 %v7570_v31, %v2153_v28  ;;  %v7156_v28 = vld [vmem:[%s10450_s6 + $0x18] sm:$0xff] }
 0x47c   :  { %v2155_v1 = vadd.f32 %v7570_v31, %v2154_v56  ;;  %v5753_v56 = vld [vmem:[%s10451_s3 + $0x50] sm:$0xf] }
 0x47e   :  { %v2157_v10 = vsel %vm2156_vm5, %v7570_v31, %v2155_v1  ;;  %v5833_v1 = vld [vmem:[%s10451_s3 + $0xf0] sm:$0xf] }
 0x47f   :  { %v2075_v30 = vpop.f32.mrf.mxu2  ;;  %v2061_v3 = vpop.f32.mrf.mxu1 }
 0x480   :  { %v2076_v35 = vadd.f32 %v2075_v30, %v2057_v46  ;;  %v2062_v26 = vadd.f32 %v2061_v3, %v2043_v17 }
 0x485   :  { %v2092_v16 = vpop.f32.mrf.mxu3 }
 0x486   :  { %v2093_v29 = vadd.f32 %v2092_v16, %v2074_v5 }
 0x487   :  { %v2078_v39 = vpop.f32.mrf.mxu2 }
 0x488   :  { %v2079_v23 = vadd.f32 %v2078_v39, %v2060_v42 }
 0x48d   :  { %v2094_v52 = vpop.f32.mrf.mxu3 }
 0x48e   :  { %v2095_v19 = vadd.f32 %v2094_v52, %v2076_v35  ;;  %v2140_v35 = vld [vmem:[%s10447_s7 + $0x2] ss:$0 sm:$0xff] }
 0x48f   :  { %v2080_v14 = vpop.f32.mrf.mxu2 }
 0x490   :  { %v2081_v43 = vadd.f32 %v2080_v14, %v2062_v26 }
 0x495   :  { %v2097_v63 = vpop.f32.mrf.mxu3 }
 0x496   :  { %v2098_v9 = vadd.f32 %v2097_v63, %v2079_v23 }
 0x49d   :  { %v2099_v7 = vpop.f32.mrf.mxu3 }
 0x49e   :  { %v2100_v37 = vadd.f32 %v2099_v7, %v2081_v43 }
 0x4bf   :  { %v2111_v13 = vpop.f32.mrf.mxu1 }
 0x4c0   :  { %v2112_v18 = vadd.f32 %v2111_v13, %v2093_v29 }
 0x4c7   :  { %v2113_v21 = vpop.f32.mrf.mxu1 }
 0x4c8   :  { %v2114_v62 = vadd.f32 %v2113_v21, %v2095_v19 }
 0x4cf   :  { %v2116_v55 = vpop.f32.mrf.mxu1 }
 0x4d0   :  { %v2117_v32 = vadd.f32 %v2116_v55, %v2098_v9 }
 0x4d7   :  { %v2118_v34 = vpop.f32.mrf.mxu1 }
 0x4d8   :  { %v2119_v40 = vadd.f32 %v2118_v34, %v2100_v37 }
 0x4ed   :  { %v2130_v44 = vpop.f32.mrf.mxu2 }
 0x4ee   :  { %v2131_v12 = vadd.f32 %v2130_v44, %v2112_v18 }
 0x4f5   :  { %v2132_v4 = vpop.f32.mrf.mxu2 }
 0x4f6   :  { %v2133_v33 = vadd.f32 %v2132_v4, %v2114_v62 }
 0x4f8   :  { %v2142_v48 = vadd.f32 %v2133_v33, %v2131_v12 }
 0x4fd   :  { %v2135_v25 = vpop.f32.mrf.mxu2 }
 0x4fe   :  { %v2136_v0 = vadd.f32 %v2135_v25, %v2117_v32  ;;  %v2141_v25 = vld [vmem:[%s10447_s7 + $0x3] ss:$0 sm:$0xff] }
 0x500   :  { %v2143_v8 = vadd.f32 %v2142_v48, %v2136_v0  ;;  %v7155_v48 = vld [vmem:[%s10450_s6 + $0x10] sm:$0xff] }
 0x505   :  { %v2137_v51 = vpop.f32.mrf.mxu2 }
 0x506   :  { %v2138_v61 = vadd.f32 %v2137_v51, %v2119_v40  ;;  %v7154_v40 = vld [vmem:[%s10450_s6 + $0x8] sm:$0xff]  ;;  %v5769_v51 = vld [vmem:[%s10451_s3 + $0x70] sm:$0xf] }
 0x508   :  { %v2144_v41 = vadd.f32 %v2143_v8, %v2138_v61  ;;  %v7176_v8 = vld [vmem:[%s10451_s3 + $0x74] sm:$0xf0] }
 0x50a   :  { %v2145_v36 = vrot.slane %v2144_v41, 4 }
 0x50c   :  { %v2146_v47 = vadd.f32 %v2145_v36, %v2144_v41  ;;  %v5761_v41 = vld [vmem:[%s10451_s3 + $0x60] sm:$0xf]  ;;  %v7174_v36 = vld [vmem:[%s10451_s3 + $0x64] sm:$0xf0] }
 0x50e   :  { %v2147_v54 = vrot.slane %v2146_v47, 2 }
 0x510   :  { %v2148_v57 = vadd.f32 %v2147_v54, %v2146_v47  ;;  %v5762_v47 = vor.u32 %v7174_v36, %v5761_v41  ;;  %v7172_v54 = vld [vmem:[%s10451_s3 + $0x54] sm:$0xf0]  ;;  %v5865_v36 = vld [vmem:[%s10451_s3 + $0x130] sm:$0xf] }
 0x512   :  { %v2149_v24 = vrot.slane %v2148_v57, 1 }
 0x514   :  { %v2150_v49 = vadd.f32 %v2149_v24, %v2148_v57  ;;  %v7192_v57 = vld [vmem:[%s10451_s3 + $0xf4] sm:$0xf0] }
 0x515   :  { %v5834_v24 = vor.u32 %v7192_v57, %v5833_v1 }
 0x516   :  { %v2158_v58 = vmul.f32 %v2157_v10, %v2150_v49  ;;  %v5754_v49 = vor.u32 %v7172_v54, %v5753_v56  ;;  %v7200_v56 = vld [vmem:[%s10451_s3 + $0x134] sm:$0xf0] }
 0x517   :  { %3901 = vmatpush.bf16.msra.mxu2 %v5834_v24  ;;  %v7220_v54 = vld [vmem:[%s10451_s3 + $0x1d4] sm:$0xf0]  ;;  %v5866_v1 = vor.u32 %v7200_v56, %v5865_v36  ;;  %v5857_v24 = vld [vmem:[%s10451_s3 + $0x120] sm:$0xf]  ;;  %v6089_v36 = vld [vmem:[%s10451_s3 + $0x2f0] sm:$0xf] }
 0x518   :  { %v2159_v59 = vsub.f32 %v2131_v12, %v2158_v58  ;;  %v2160_v60 = vsub.f32 %v2133_v33, %v2158_v58  ;;  %v2161_v27 = vsub.f32 %v2136_v0, %v2158_v58  ;;  %v2162_v30 = vsub.f32 %v2138_v61, %v2158_v58  ;;  %v7190_v58 = vld [vmem:[%s10451_s3 + $0xe4] sm:$0xf0]  ;;  %v7256_v56 = vld [vmem:[%s10451_s3 + $0x2f4] sm:$0xf0] }
 0x519   :  { %v5770_v61 = vor.u32 %v7176_v8, %v5769_v51  ;;  %v7202_v51 = vld [vmem:[%s10451_s3 + $0x144] sm:$0xf0]  ;;  %v5953_v8 = vld [vmem:[%s10451_s3 + $0x1e0] sm:$0xf] }
 0x51a   :  { %v2163_v53 = vmul.f32 %v2159_v59, %v2159_v59  ;;  %v2164_v3 = vmul.f32 %v2160_v60, %v2160_v60  ;;  %v2165_v39 = vmul.f32 %v2161_v27, %v2161_v27  ;;  %v2166_v13 = vmul.f32 %v2162_v30, %v2162_v30 }
 0x51b   :  { %3888 = vmatpush.bf16.msra.mxu1 %v5770_v61  ;;  %v7222_v61 = vld [vmem:[%s10451_s3 + $0x1e4] sm:$0xf0] }
 0x51c   :  { %v2167_v16 = vadd.f32 %v2164_v3, %v2163_v53  ;;  %v7188_v53 = vld [vmem:[%s10451_s3 + $0xd4] sm:$0xf0]  ;;  %v5954_v41 = vor.u32 %v7222_v61, %v5953_v8  ;;  %v6009_v8 = vld [vmem:[%s10451_s3 + $0x250] sm:$0xf] }
 0x51e   :  { %v2168_v14 = vadd.f32 %v2167_v16, %v2165_v39  ;;  %v5737_v39 = vld [vmem:[%s10451_s3 + $0x30] sm:$0xf]  ;;  %v7168_v16 = vld [vmem:[%s10451_s3 + $0x34] sm:$0xf0] }
 0x51f   :  { %3889 = vmatpush.bf16.msra.mxu1 %v5762_v47  ;;  %v5945_v47 = vld [vmem:[%s10451_s3 + $0x1d0] sm:$0xf] }
 0x520   :  { %v2169_v52 = vadd.f32 %v2168_v14, %v2166_v13  ;;  %v5738_v14 = vor.u32 %v7168_v16, %v5737_v39  ;;  %v5946_v57 = vor.u32 %v7220_v54, %v5945_v47  ;;  %v7216_v39 = vld [vmem:[%s10451_s3 + $0x1b4] sm:$0xf0]  ;;  %v6225_v47 = vld [vmem:[%s10451_s3 + $0x400] sm:$0xf]  ;;  %v7290_v54 = vld [vmem:[%s10451_s3 + $0x404] sm:$0xf0] }
 0x522   :  { %v2170_v21 = vrot.slane %v2169_v52, 4 }
 0x523   :  { %3890 = vmatpush.bf16.msra.mxu1 %v5754_v49  ;;  %v5937_v49 = vld [vmem:[%s10451_s3 + $0x1c0] sm:$0xf] }
 0x524   :  { %v2171_v44 = vadd.f32 %v2170_v21, %v2169_v52  ;;  %v7157_v52 = vld [vmem:[%s10450_s6 + $0x20] sm:$0xff] }
 0x525   :  { %v5729_v21 = vld [vmem:[%s10451_s3 + $0x20] sm:$0xf] }
 0x526   :  { %v2172_v38 = vrot.slane %v2171_v44, 2 }
 0x528   :  { %v2173_v63 = vadd.f32 %v2172_v38, %v2171_v44  ;;  %v7166_v44 = vld [vmem:[%s10451_s3 + $0x24] sm:$0xf0]  ;;  %v5809_v38 = vld [vmem:[%s10451_s3 + $0xc0] sm:$0xf] }
 0x52a   :  { %v2174_v4 = vrot.slane %v2173_v63, 1 }
 0x52c   :  { %v2175_v6 = vadd.f32 %v2174_v4, %v2173_v63  ;;  %v5730_v63 = vor.u32 %v7166_v44, %v5729_v21  ;;  %v7186_v4 = vld [vmem:[%s10451_s3 + $0xc4] sm:$0xf0]  ;;  %v5921_v21 = vld [vmem:[%s10451_s3 + $0x1a0] sm:$0xf] }
 0x52e   :  { %v2176_v20 = vmul.f32 %v2175_v6, %v2157_v10  ;;  %v5825_v10 = vld [vmem:[%s10451_s3 + $0xe0] sm:$0xf]  ;;  %v5721_v6 = vld [vmem:[%s10451_s3 + $0x10] sm:$0xf] }
 0x530   :  { %v2177_v55 = vadd.f32 1e-05, %v2176_v20  ;;  %v7164_v20 = vld [vmem:[%s10451_s3 + $0x14] sm:$0xf0] }
 0x532   :  { %7571 = vrsqrt.f32 %v2177_v55  ;;  %vm2184_vm7 = vweird.f32 %v2177_v55 }
 0x538   :  { %v7572_v2 = vpop.eup %7571 }
 0x539   :  { %v2179_v22 = vmul.f32 %v7572_v2, %v2177_v55  ;;  %vm2185_vm6 = vweird.f32 %v7572_v2  ;;  %v5810_v55 = vor.u32 %v7186_v4, %v5809_v38  ;;  %v7214_v38 = vld [vmem:[%s10451_s3 + $0x1a4] sm:$0xf0]  ;;  %v5913_v4 = vld [vmem:[%s10451_s3 + $0x190] sm:$0xf] }
 0x53a   :  { %vm2186_vm8 = vmor %vm2184_vm7, %vm2185_vm6 }
 0x53b   :  { %v2180_v46 = vmul.f32 %v7572_v2, %v2179_v22  ;;  %v7184_v22 = vld [vmem:[%s10451_s3 + $0xb4] sm:$0xf0] }
 0x53d   :  { %v2181_v11 = vmul.f32 0.5, %v2180_v46  ;;  %v5722_v46 = vor.u32 %v7164_v20, %v5721_v6  ;;  %v7212_v6 = vld [vmem:[%s10451_s3 + $0x194] sm:$0xf0] }
 0x53e   :  { %v5914_v20 = vor.u32 %v7212_v6, %v5913_v4  ;;  %v6457_v4 = vld [vmem:[%s10451_s3 + $0x5d0] sm:$0xf]  ;;  %v7348_v6 = vld [vmem:[%s10451_s3 + $0x5d4] sm:$0xf0] }
 0x53f   :  { %v2182_v15 = vsub.f32 1.5, %v2181_v11 }
 0x541   :  { %v2183_v42 = vmul.f32 %v7572_v2, %v2182_v15  ;;  %v5713_v15 = vld [vmem:[%s10451_s3] sm:$0xf] }
 0x543   :  { %v2187_v50 = vsel %vm2186_vm8, %v7572_v2, %v2183_v42  ;;  %v5801_v2 = vld [vmem:[%s10451_s3 + $0xb0] sm:$0xf]  ;;  %v7162_v42 = vld [vmem:[%s10451_s3 + $0x4] sm:$0xf0] }
 0x544   :  { %v2190_v17 = vmul.f32 %v2187_v50, %v2161_v27  ;;  %v2191_v5 = vmul.f32 %v2187_v50, %v2162_v30  ;;  %v2188_v23 = vmul.f32 %v2187_v50, %v2159_v59  ;;  %v2189_v19 = vmul.f32 %v2187_v50, %v2160_v60  ;;  %v5745_v59 = vld [vmem:[%s10451_s3 + $0x40] sm:$0xf]  ;;  %v7170_v60 = vld [vmem:[%s10451_s3 + $0x44] sm:$0xf0]  ;;  %v5817_v30 = vld [vmem:[%s10451_s3 + $0xd0] sm:$0xf] }
 0x545   :  { %v5826_v27 = vor.u32 %v7190_v58, %v5825_v10  ;;  %v5746_v3 = vor.u32 %v7170_v60, %v5745_v59  ;;  %v5818_v13 = vor.u32 %v7188_v53, %v5817_v30  ;;  %v5802_v11 = vor.u32 %v7184_v22, %v5801_v2  ;;  %v7182_v50 = vld [vmem:[%s10451_s3 + $0xa4] sm:$0xf0]  ;;  %v7159_v59 = vld [vmem:[%s10450_s6 + $0x30] sm:$0xff]  ;;  %v7196_v53 = vld [vmem:[%s10451_s3 + $0x114] sm:$0xf0] }
 0x546   :  { %v2195_v26 = vmul.f32 %v2191_v5, %v2140_v35  ;;  %v2194_v29 = vmul.f32 %v2190_v17, %v2140_v35  ;;  %v2192_v9 = vmul.f32 %v2188_v23, %v2140_v35  ;;  %v2193_v62 = vmul.f32 %v2189_v19, %v2140_v35  ;;  %v5793_v35 = vld [vmem:[%s10451_s3 + $0xa0] sm:$0xf]  ;;  %v5897_v17 = vld [vmem:[%s10451_s3 + $0x170] sm:$0xf]  ;;  %v7208_v5 = vld [vmem:[%s10451_s3 + $0x174] sm:$0xf0] }
 0x547   :  { %3902 = vmatpush.bf16.msra.mxu2 %v5826_v27  ;;  %3891 = vmatpush.bf16.msra.mxu1 %v5746_v3  ;;  %v5714_v23 = vor.u32 %v7162_v42, %v5713_v15  ;;  %v5794_v19 = vor.u32 %v7182_v50, %v5793_v35  ;;  %v7198_v10 = vld [vmem:[%s10451_s3 + $0x124] sm:$0xf0]  ;;  %v5849_v30 = vld [vmem:[%s10451_s3 + $0x110] sm:$0xf]  ;;  %v7304_v22 = vld [vmem:[%s10451_s3 + $0x474] sm:$0xf0] }
 0x548   :  { %v2199_v7 = vadd.f32 %v2195_v26, %v2141_v25  ;;  %v2198_v31 = vadd.f32 %v2194_v29, %v2141_v25  ;;  %v2196_v43 = vadd.f32 %v2192_v9, %v2141_v25  ;;  %v2197_v18 = vadd.f32 %v2193_v62, %v2141_v25  ;;  %v5785_v26 = vld [vmem:[%s10451_s3 + $0x90] sm:$0xf]  ;;  %v7180_v29 = vld [vmem:[%s10451_s3 + $0x94] sm:$0xf0]  ;;  %v5889_v9 = vld [vmem:[%s10451_s3 + $0x160] sm:$0xf] }
 0x549   :  { %v5898_v25 = vor.u32 %v7208_v5, %v5897_v17  ;;  %v7206_v62 = vld [vmem:[%s10451_s3 + $0x164] sm:$0xf0]  ;;  %v5858_v60 = vor.u32 %v7198_v10, %v5857_v24  ;;  %v5929_v3 = vld [vmem:[%s10451_s3 + $0x1b0] sm:$0xf]  ;;  %v5850_v16 = vor.u32 %v7196_v53, %v5849_v30  ;;  %v7456_v42 = vld [vmem:[%s10452_s4 + $0x138] sm:$0xff] }
 0x54a   :  { %v2202_v32 = vmax.f32 %v2198_v31, 0.0  ;;  %v2203_v33 = vmax.f32 %v2199_v7, 0.0  ;;  %v2200_v37 = vmax.f32 %v2196_v43, 0.0  ;;  %v2201_v12 = vmax.f32 %v2197_v18, 0.0  ;;  %v7158_v7 = vld [vmem:[%s10450_s6 + $0x28] sm:$0xff]  ;;  %4974 = vmatpush.bf16.msra.mxu0 %v7456_v42 }
 0x54b   :  { %3903 = vmatpush.bf16.msra.mxu2 %v5818_v13  ;;  %3892 = vmatpush.bf16.msra.mxu1 %v5738_v14  ;;  %v5786_v31 = vor.u32 %v7180_v29, %v5785_v26  ;;  %v5890_v43 = vor.u32 %v7206_v62, %v5889_v9  ;;  %v5777_v18 = vld [vmem:[%s10451_s3 + $0x80] sm:$0xf]  ;;  %v7218_v58 = vld [vmem:[%s10451_s3 + $0x1c4] sm:$0xf0]  ;;  %v5930_v13 = vor.u32 %v7216_v39, %v5929_v3  ;;  %v6281_v2 = vld [vmem:[%s10451_s3 + $0x470] sm:$0xf] }
 0x54c   :  { %v2205_v34 = vpack.c.bf16 %v2203_v33, %v2202_v32  ;;  %v2204_v0 = vpack.c.bf16 %v2201_v12, %v2200_v37  ;;  %v7178_v32 = vld [vmem:[%s10451_s3 + $0x84] sm:$0xf0]  ;;  %v5881_v33 = vld [vmem:[%s10451_s3 + $0x150] sm:$0xf]  ;;  %v7204_v37 = vld [vmem:[%s10451_s3 + $0x154] sm:$0xf0]  ;;  %v5938_v27 = vor.u32 %v7218_v58, %v5937_v49 }
 0x54d   :  { %v5961_v12 = vld [vmem:[%s10451_s3 + $0x1f0] sm:$0xf]  ;;  %v5841_v14 = vld [vmem:[%s10451_s3 + $0x100] sm:$0xf]  ;;  %v7210_v15 = vld [vmem:[%s10451_s3 + $0x184] sm:$0xf0] }
 0x54e   :  { %2293 = vmatpush.bf16.msrb.mxu3 %v2205_v34  ;;  %v5778_v34 = vor.u32 %v7178_v32, %v5777_v18  ;;  %v6273_v50 = vld [vmem:[%s10451_s3 + $0x460] sm:$0xf]  ;;  %v7302_v17 = vld [vmem:[%s10451_s3 + $0x464] sm:$0xf0]  ;;  %v6249_v62 = vld [vmem:[%s10451_s3 + $0x430] sm:$0xf] }
 0x54f   :  { %3893 = vmatpush.bf16.msra.mxu1 %v5730_v63  ;;  %3904 = vmatpush.bf16.msra.mxu2 %v5810_v55  ;;  %v5922_v63 = vor.u32 %v7214_v38, %v5921_v21  ;;  %v7160_v55 = vld [vmem:[%s10450_s6 + $0x38] sm:$0xff]  ;;  %v6274_v5 = vor.u32 %v7302_v17, %v6273_v50  ;;  %v6257_v26 = vld [vmem:[%s10451_s3 + $0x440] sm:$0xf]  ;;  %v7298_v29 = vld [vmem:[%s10451_s3 + $0x444] sm:$0xf0] }
 0x550   :  { %v6258_v9 = vor.u32 %v7298_v29, %v6257_v26  ;;  %v6025_v18 = vld [vmem:[%s10451_s3 + $0x270] sm:$0xf]  ;;  %v7240_v32 = vld [vmem:[%s10451_s3 + $0x274] sm:$0xf0]  ;;  %v7234_v30 = vld [vmem:[%s10451_s3 + $0x244] sm:$0xf0] }
 0x551   :  { %v7352_v24 = vld [vmem:[%s10451_s3 + $0x5f4] sm:$0xf0]  ;;  %v6081_v53 = vld [vmem:[%s10451_s3 + $0x2e0] sm:$0xf]  ;;  %v7254_v3 = vld [vmem:[%s10451_s3 + $0x2e4] sm:$0xf0] }
 0x552   :  { %2294 = vmatpush.bf16.msrb.mxu3 %v2204_v0  ;;  %v7224_v0 = vld [vmem:[%s10451_s3 + $0x1f4] sm:$0xf0]  ;;  %v6465_v39 = vld [vmem:[%s10451_s3 + $0x5e0] sm:$0xf]  ;;  %v5993_v21 = vld [vmem:[%s10451_s3 + $0x230] sm:$0xf] }
 0x553   :  { %3894 = vmatpush.bf16.msra.mxu1 %v5722_v46  ;;  %3905 = vmatpush.bf16.msra.mxu2 %v5802_v11  ;;  %v5905_v46 = vld [vmem:[%s10451_s3 + $0x180] sm:$0xf]  ;;  %v6282_v11 = vor.u32 %v7304_v22, %v6281_v2  ;;  %v6073_v38 = vld [vmem:[%s10451_s3 + $0x2d0] sm:$0xf]  ;;  %v7346_v17 = vld [vmem:[%s10451_s3 + $0x5c4] sm:$0xf0] }
 0x554   :  { %v5906_v35 = vor.u32 %v7210_v15, %v5905_v46  ;;  %v5985_v46 = vld [vmem:[%s10451_s3 + $0x220] sm:$0xf]  ;;  %v7230_v15 = vld [vmem:[%s10451_s3 + $0x224] sm:$0xf0]  ;;  %v7228_v26 = vld [vmem:[%s10451_s3 + $0x214] sm:$0xf0] }
 0x555   :  { %5703 = vmatmul.msk.bf16.vlgmr.msrb.gmra.mxu3 %vm2262_vm9, %v7153_v45  ;;  %v5882_v45 = vor.u32 %v7204_v37, %v5881_v33  ;;  %v7294_v33 = vld [vmem:[%s10451_s3 + $0x424] sm:$0xf0]  ;;  %v6065_v42 = vld [vmem:[%s10451_s3 + $0x2c0] sm:$0xf]  ;;  %v6057_v29 = vld [vmem:[%s10451_s3 + $0x2b0] sm:$0xf] }
 0x556   :  { %3992 = vmatpush.bf16.msra.mxu3 %v6282_v11  ;;  %v6449_v50 = vld [vmem:[%s10451_s3 + $0x5c0] sm:$0xf] }
 0x557   :  { %3895 = vmatpush.bf16.msra.mxu1 %v5714_v23  ;;  %3906 = vmatpush.bf16.msra.mxu2 %v5794_v19  ;;  %v6265_v23 = vld [vmem:[%s10451_s3 + $0x450] sm:$0xf]  ;;  %v7300_v19 = vld [vmem:[%s10451_s3 + $0x454] sm:$0xf0] }
 0x55a   :  { %3993 = vmatpush.bf16.msra.mxu3 %v6274_v5  ;;  %v6450_v5 = vor.u32 %v7346_v17, %v6449_v50  ;;  %v6201_v50 = vld [vmem:[%s10451_s3 + $0x3d0] sm:$0xf]  ;;  %v7284_v17 = vld [vmem:[%s10451_s3 + $0x3d4] sm:$0xf0] }
 0x55b   :  { %3914 = vmatpush.bf16.msrb.mxu1 %v5898_v25  ;;  %3907 = vmatpush.bf16.msra.mxu2 %v5786_v31  ;;  %v6266_v25 = vor.u32 %v7300_v19, %v6265_v23  ;;  %v5986_v23 = vor.u32 %v7230_v15, %v5985_v46 }
 0x55e   :  { %3994 = vmatpush.bf16.msra.mxu3 %v6266_v25  ;;  %v5977_v25 = vld [vmem:[%s10451_s3 + $0x210] sm:$0xf] }
 0x55f   :  { %3915 = vmatpush.bf16.msrb.mxu1 %v5890_v43  ;;  %3908 = vmatpush.bf16.msra.mxu2 %v5778_v34  ;;  %v6241_v43 = vld [vmem:[%s10451_s3 + $0x420] sm:$0xf] }
 0x560   :  { %v6242_v34 = vor.u32 %v7294_v33, %v6241_v43  ;;  %v5969_v33 = vld [vmem:[%s10451_s3 + $0x200] sm:$0xf] }
 0x562   :  { %3995 = vmatpush.bf16.msra.mxu3 %v6258_v9  ;;  %v7248_v9 = vld [vmem:[%s10451_s3 + $0x2b4] sm:$0xf0] }
 0x563   :  { %3916 = vmatpush.bf16.msrb.mxu1 %v5882_v45  ;;  %v6017_v45 = vld [vmem:[%s10451_s3 + $0x260] sm:$0xf] }
 0x565   :  { %5704 = vmatmul.msk.bf16.gmra.mxu3 %vm2262_vm9, %v7154_v40  ;;  %v5962_v40 = vor.u32 %v7224_v0, %v5961_v12  ;;  %v6026_v12 = vor.u32 %v7240_v32, %v6025_v18  ;;  %v5978_v18 = vor.u32 %v7228_v26, %v5977_v25  ;;  %v6058_v32 = vor.u32 %v7248_v9, %v6057_v29  ;;  %v6113_v25 = vld [vmem:[%s10451_s3 + $0x320] sm:$0xf]  ;;  %v7262_v26 = vld [vmem:[%s10451_s3 + $0x324] sm:$0xf0] }
 0x566   :  { %v6193_v29 = vld [vmem:[%s10451_s3 + $0x3c0] sm:$0xf]  ;;  %v7282_v9 = vld [vmem:[%s10451_s3 + $0x3c4] sm:$0xf0] }
 0x567   :  { %3927 = vmatpush.bf16.msrb.mxu2 %v5962_v40  ;;  %v7238_v40 = vld [vmem:[%s10451_s3 + $0x264] sm:$0xf0] }
 0x56b   :  { %3928 = vmatpush.bf16.msrb.mxu2 %v5954_v41  ;;  %v7236_v41 = vld [vmem:[%s10451_s3 + $0x254] sm:$0xf0] }
 0x56c   :  { %v6010_v58 = vor.u32 %v7236_v41, %v6009_v8  ;;  %v7342_v8 = vld [vmem:[%s10451_s3 + $0x5a4] sm:$0xf0] }
 0x56f   :  { %3929 = vmatpush.bf16.msrb.mxu2 %v5946_v57  ;;  %v6226_v57 = vor.u32 %v7290_v54, %v6225_v47  ;;  %v7244_v47 = vld [vmem:[%s10451_s3 + $0x294] sm:$0xf0]  ;;  %v6145_v54 = vld [vmem:[%s10451_s3 + $0x360] sm:$0xf] }
 0x573   :  { %3930 = vmatpush.bf16.msrb.mxu2 %v5938_v27 }
 0x575   :  { %5705 = vmatmul.msk.bf16.gmra.mxu3 %vm2262_vm9, %v7155_v48  ;;  %v5873_v48 = vld [vmem:[%s10451_s3 + $0x140] sm:$0xf] }
 0x577   :  { %3931 = vmatpush.bf16.msrb.mxu2 %v5930_v13 }
 0x57b   :  { %3932 = vmatpush.bf16.msrb.mxu2 %v5922_v63  ;;  %v7252_v63 = vld [vmem:[%s10451_s3 + $0x2d4] sm:$0xf0] }
 0x57c   :  { %v6074_v22 = vor.u32 %v7252_v63, %v6073_v38 }
 0x57f   :  { %3933 = vmatpush.bf16.msrb.mxu2 %v5914_v20  ;;  %v6458_v20 = vor.u32 %v7348_v6, %v6457_v4  ;;  %v6129_v4 = vld [vmem:[%s10451_s3 + $0x340] sm:$0xf]  ;;  %v7266_v6 = vld [vmem:[%s10451_s3 + $0x344] sm:$0xf0] }
 0x580   :  { %v6130_v46 = vor.u32 %v7266_v6, %v6129_v4 }
 0x583   :  { %3934 = vmatpush.bf16.msrb.mxu2 %v5906_v35  ;;  %v7250_v35 = vld [vmem:[%s10451_s3 + $0x2c4] sm:$0xf0] }
 0x584   :  { %v6066_v19 = vor.u32 %v7250_v35, %v6065_v42  ;;  %v6121_v42 = vld [vmem:[%s10451_s3 + $0x330] sm:$0xf]  ;;  %v7264_v35 = vld [vmem:[%s10451_s3 + $0x334] sm:$0xf0] }
 0x585   :  { %5706 = vmatmul.msk.bf16.gmra.mxu3 %vm2262_vm9, %v7156_v28  ;;  %v5874_v28 = vor.u32 %v7202_v51, %v5873_v48  ;;  %v6233_v48 = vld [vmem:[%s10451_s3 + $0x410] sm:$0xf]  ;;  %v7292_v51 = vld [vmem:[%s10451_s3 + $0x414] sm:$0xf0] }
 0x586   :  { %v6234_v61 = vor.u32 %v7292_v51, %v6233_v48  ;;  %v7272_v48 = vld [vmem:[%s10451_s3 + $0x374] sm:$0xf0]  ;;  %v6433_v51 = vld [vmem:[%s10451_s3 + $0x5a0] sm:$0xf] }
 0x587   :  { %3917 = vmatpush.bf16.msrb.mxu1 %v5874_v28  ;;  %v6018_v28 = vor.u32 %v7238_v40, %v6017_v45  ;;  %v7246_v45 = vld [vmem:[%s10451_s3 + $0x2a4] sm:$0xf0]  ;;  %v6153_v40 = vld [vmem:[%s10451_s3 + $0x370] sm:$0xf] }
 0x58b   :  { %3918 = vmatpush.bf16.msrb.mxu1 %v5866_v1  ;;  %v6473_v1 = vld [vmem:[%s10451_s3 + $0x5f0] sm:$0xf] }
 0x58c   :  { %v6474_v10 = vor.u32 %v7352_v24, %v6473_v1  ;;  %v7270_v1 = vld [vmem:[%s10451_s3 + $0x364] sm:$0xf0]  ;;  %v7340_v24 = vld [vmem:[%s10451_s3 + $0x594] sm:$0xf0] }
 0x58f   :  { %3919 = vmatpush.bf16.msrb.mxu1 %v5858_v60  ;;  %v6001_v60 = vld [vmem:[%s10451_s3 + $0x240] sm:$0xf] }
 0x593   :  { %3920 = vmatpush.bf16.msrb.mxu1 %v5850_v16  ;;  %v7350_v16 = vld [vmem:[%s10451_s3 + $0x5e4] sm:$0xf0] }
 0x594   :  { %v6466_v13 = vor.u32 %v7350_v16, %v6465_v39  ;;  %v7268_v39 = vld [vmem:[%s10451_s3 + $0x354] sm:$0xf0]  ;;  %v6217_v16 = vld [vmem:[%s10451_s3 + $0x3f0] sm:$0xf] }
 0x595   :  { %5707 = vmatmul.msk.bf16.gmra.mxu3 %vm2262_vm9, %v7157_v52  ;;  %v7194_v52 = vld [vmem:[%s10451_s3 + $0x104] sm:$0xf0] }
 0x596   :  { %v5842_v44 = vor.u32 %v7194_v52, %v5841_v14  ;;  %v6002_v14 = vor.u32 %v7234_v30, %v6001_v60  ;;  %v6082_v52 = vor.u32 %v7254_v3, %v6081_v53  ;;  %v7242_v60 = vld [vmem:[%s10451_s3 + $0x284] sm:$0xf0]  ;;  %v6146_v53 = vor.u32 %v7270_v1, %v6145_v54  ;;  %v6137_v3 = vld [vmem:[%s10451_s3 + $0x350] sm:$0xf]  ;;  %v7276_v54 = vld [vmem:[%s10451_s3 + $0x394] sm:$0xf0] }
 0x597   :  { %v6138_v38 = vor.u32 %v7268_v39, %v6137_v3  ;;  %v6337_v1 = vld [vmem:[%s10451_s3 + $0x4e0] sm:$0xf]  ;;  %v6329_v3 = vld [vmem:[%s10451_s3 + $0x4d0] sm:$0xf]  ;;  %v7316_v39 = vld [vmem:[%s10451_s3 + $0x4d4] sm:$0xf0] }
 0x598   :  { %3921 = vmatpush.bf16.msrb.mxu1 %v5842_v44  ;;  %v7232_v44 = vld [vmem:[%s10451_s3 + $0x234] sm:$0xf0]  ;;  %v6330_v4 = vor.u32 %v7316_v39, %v6329_v3  ;;  %v6617_v39 = vld [vmem:[%s10451_s3 + $0x710] sm:$0xf] }
 0x599   :  { %v5994_v2 = vor.u32 %v7232_v44, %v5993_v21  ;;  %v7368_v3 = vld [vmem:[%s10451_s3 + $0x674] sm:$0xf0] }
 0x5a5   :  { %5708 = vmatmul.msk.bf16.gmra.mxu3 %vm2262_vm9, %v7158_v7  ;;  %v7296_v7 = vld [vmem:[%s10451_s3 + $0x434] sm:$0xf0] }
 0x5a6   :  { %v6250_v31 = vor.u32 %v7296_v7, %v6249_v62  ;;  %v6441_v62 = vld [vmem:[%s10451_s3 + $0x5b0] sm:$0xf]  ;;  %v7344_v7 = vld [vmem:[%s10451_s3 + $0x5b4] sm:$0xf0] }
 0x5a8   :  { %3996 = vmatpush.bf16.msra.mxu3 %v6250_v31  ;;  %v6442_v31 = vor.u32 %v7344_v7, %v6441_v62  ;;  %v6114_v7 = vor.u32 %v7262_v26, %v6113_v25  ;;  %v6393_v25 = vld [vmem:[%s10451_s3 + $0x550] sm:$0xf]  ;;  %v7332_v26 = vld [vmem:[%s10451_s3 + $0x554] sm:$0xf0] }
 0x5ac   :  { %3997 = vmatpush.bf16.msra.mxu3 %v6242_v34  ;;  %v7226_v34 = vld [vmem:[%s10451_s3 + $0x204] sm:$0xf0] }
 0x5b0   :  { %3998 = vmatpush.bf16.msra.mxu3 %v6234_v61  ;;  %v6434_v61 = vor.u32 %v7342_v8, %v6433_v51  ;;  %v7278_v51 = vld [vmem:[%s10451_s3 + $0x3a4] sm:$0xf0]  ;;  %v6345_v8 = vld [vmem:[%s10451_s3 + $0x4f0] sm:$0xf] }
 0x5b4   :  { %3999 = vmatpush.bf16.msra.mxu3 %v6226_v57  ;;  %v6425_v57 = vld [vmem:[%s10451_s3 + $0x590] sm:$0xf] }
 0x5b5   :  { %5709 = vmatmul.msk.bf16.gmra.mxu3 %vm2262_vm9, %v7159_v59  ;;  %v6090_v59 = vor.u32 %v7256_v56, %v6089_v36  ;;  %v6154_v36 = vor.u32 %v7272_v48, %v6153_v40  ;;  %v6041_v56 = vld [vmem:[%s10451_s3 + $0x290] sm:$0xf]  ;;  %v7258_v40 = vld [vmem:[%s10451_s3 + $0x304] sm:$0xf0]  ;;  %v6177_v48 = vld [vmem:[%s10451_s3 + $0x3a0] sm:$0xf] }
 0x5b8   :  { %4031 = vmatpush.bf16.msrb.mxu3 %v6474_v10  ;;  %v6426_v10 = vor.u32 %v7340_v24, %v6425_v57  ;;  %v7318_v57 = vld [vmem:[%s10451_s3 + $0x4e4] sm:$0xf0] }
 0x5bc   :  { %4032 = vmatpush.bf16.msrb.mxu3 %v6466_v13  ;;  %v7288_v13 = vld [vmem:[%s10451_s3 + $0x3f4] sm:$0xf0] }
 0x5bd   :  { %v6218_v63 = vor.u32 %v7288_v13, %v6217_v16  ;;  %v6409_v16 = vld [vmem:[%s10451_s3 + $0x570] sm:$0xf]  ;;  %v7336_v13 = vld [vmem:[%s10451_s3 + $0x574] sm:$0xf0] }
 0x5be   :  { %v6410_v6 = vor.u32 %v7336_v13, %v6409_v16  ;;  %v7388_v16 = vld [vmem:[%s10451_s3 + $0x714] sm:$0xf0] }
 0x5c0   :  { %4033 = vmatpush.bf16.msrb.mxu3 %v6458_v20  ;;  %v6209_v20 = vld [vmem:[%s10451_s3 + $0x3e0] sm:$0xf] }
 0x5c4   :  { %4034 = vmatpush.bf16.msrb.mxu3 %v6450_v5  ;;  %v7455_v5 = vld [vmem:[%s10452_s4 + $0x130] sm:$0xff] }
 0x5c5   :  { %5710 = vmatmul.msk.bf16.gmra.mxu3 %vm2262_vm9, %v7160_v55  ;;  %4975 = vmatpush.bf16.msra.mxu0 %v7455_v5 }
 0x5c8   :  { %4035 = vmatpush.bf16.msrb.mxu3 %v6442_v31  ;;  %v6194_v31 = vor.u32 %v7282_v9, %v6193_v29 }
 0x5cc   :  { %4036 = vmatpush.bf16.msrb.mxu3 %v6434_v61  ;;  %v7320_v61 = vld [vmem:[%s10451_s3 + $0x4f4] sm:$0xf0] }
 0x5d0   :  { %4037 = vmatpush.bf16.msrb.mxu3 %v6426_v10 }
 0x5d8   :  { %v2296_v37 = vpop.f32.mrf.mxu3 }
 0x5d9   :  { %v8818_v0 = vpack.c.bf16 %v2296_v37, %v2296_v37 }
 0x5db   :  { %3896 = vmatmul.bf16.vlgmr.msra.gmra.mxu1 %v8818_v0 }
 0x5dc   :  { %3940 = vmatpush.bf16.msra.mxu1 %v6026_v12  ;;  %v6049_v12 = vld [vmem:[%s10451_s3 + $0x2a0] sm:$0xf] }
 0x5dd   :  { %v6050_v41 = vor.u32 %v7246_v45, %v6049_v12  ;;  %v6097_v45 = vld [vmem:[%s10451_s3 + $0x300] sm:$0xf] }
 0x5e0   :  { %3941 = vmatpush.bf16.msra.mxu1 %v6018_v28  ;;  %v2298_v49 = vpop.f32.mrf.mxu3  ;;  %v5970_v28 = vor.u32 %v7226_v34, %v5969_v33  ;;  %v7280_v33 = vld [vmem:[%s10451_s3 + $0x3b4] sm:$0xf0] }
 0x5e1   :  { %v8860_v27 = vpack.c.bf16 %v2298_v49, %v2298_v49 }
 0x5e3   :  { %3909 = vmatmul.bf16.vlgmr.msra.gmra.mxu2 %v8860_v27 }
 0x5e4   :  { %3942 = vmatpush.bf16.msra.mxu1 %v6010_v58  ;;  %3953 = vmatpush.bf16.msra.mxu2 %v6090_v59  ;;  %v6042_v58 = vor.u32 %v7244_v47, %v6041_v56  ;;  %v6033_v59 = vld [vmem:[%s10451_s3 + $0x280] sm:$0xf]  ;;  %v6346_v56 = vor.u32 %v7320_v61, %v6345_v8  ;;  %v6169_v47 = vld [vmem:[%s10451_s3 + $0x390] sm:$0xf]  ;;  %v7308_v61 = vld [vmem:[%s10451_s3 + $0x494] sm:$0xf0] }
 0x5e5   :  { %v6034_v44 = vor.u32 %v7242_v60, %v6033_v59  ;;  %v6170_v10 = vor.u32 %v7276_v54, %v6169_v47  ;;  %v6338_v59 = vor.u32 %v7318_v57, %v6337_v1  ;;  %v6161_v60 = vld [vmem:[%s10451_s3 + $0x380] sm:$0xf]  ;;  %v6297_v8 = vld [vmem:[%s10451_s3 + $0x490] sm:$0xf]  ;;  %v7390_v54 = vld [vmem:[%s10451_s3 + $0x724] sm:$0xf0] }
 0x5e6   :  { %v6625_v47 = vld [vmem:[%s10451_s3 + $0x720] sm:$0xf]  ;;  %v6298_v1 = vor.u32 %v7308_v61, %v6297_v8  ;;  %v7187_v61 = vld [vmem:[%s10451_s3 + $0xd4] sm:$0xf] }
 0x5e8   :  { %3943 = vmatpush.bf16.msra.mxu1 %v6002_v14  ;;  %3954 = vmatpush.bf16.msra.mxu2 %v6082_v52  ;;  %v2301_v55 = vpop.f32.mrf.mxu3  ;;  %v6417_v14 = vld [vmem:[%s10451_s3 + $0x580] sm:$0xf]  ;;  %v7338_v52 = vld [vmem:[%s10451_s3 + $0x584] sm:$0xf0] }
 0x5e9   :  { %v8899_v11 = vpack.c.bf16 %v2301_v55, %v2301_v55  ;;  %v6418_v21 = vor.u32 %v7338_v52, %v6417_v14  ;;  %v7286_v55 = vld [vmem:[%s10451_s3 + $0x3e4] sm:$0xf0] }
 0x5ea   :  { %v6210_v15 = vor.u32 %v7286_v55, %v6209_v20  ;;  %v6321_v20 = vld [vmem:[%s10451_s3 + $0x4c0] sm:$0xf]  ;;  %v7314_v55 = vld [vmem:[%s10451_s3 + $0x4c4] sm:$0xf0] }
 0x5eb   :  { %3922 = vmatmul.bf16.vlgmr.msrb.gmra.mxu1 %v8899_v11  ;;  %4038 = vmatpush.bf16.msrb.mxu3 %v6418_v21 }
 0x5ec   :  { %3944 = vmatpush.bf16.msra.mxu1 %v5994_v2  ;;  %3955 = vmatpush.bf16.msra.mxu2 %v6074_v22 }
 0x5f0   :  { %3945 = vmatpush.bf16.msra.mxu1 %v5986_v23  ;;  %3956 = vmatpush.bf16.msra.mxu2 %v6066_v19  ;;  %v2303_v43 = vpop.f32.mrf.mxu3  ;;  %v6122_v23 = vor.u32 %v7264_v35, %v6121_v42  ;;  %v6202_v19 = vor.u32 %v7284_v17, %v6201_v50  ;;  %v6649_v35 = vld [vmem:[%s10451_s3 + $0x750] sm:$0xf]  ;;  %v7396_v50 = vld [vmem:[%s10451_s3 + $0x754] sm:$0xf0]  ;;  %v6322_v17 = vor.u32 %v7314_v55, %v6321_v20  ;;  %v7366_v20 = vld [vmem:[%s10451_s3 + $0x664] sm:$0xf0] }
 0x5f1   :  { %v8941_v37 = vpack.c.bf16 %v2303_v43, %v2303_v43  ;;  %v6105_v43 = vld [vmem:[%s10451_s3 + $0x310] sm:$0xf]  ;;  %v6650_v9 = vor.u32 %v7396_v50, %v6649_v35  ;;  %v7191_v50 = vld [vmem:[%s10451_s3 + $0xf4] sm:$0xf] }
 0x5f3   :  { %3935 = vmatmul.bf16.vlgmr.msrb.gmra.mxu2 %v8941_v37 }
 0x5f4   :  { %3946 = vmatpush.bf16.msra.mxu1 %v5978_v18  ;;  %3957 = vmatpush.bf16.msra.mxu2 %v6058_v32  ;;  %v7260_v18 = vld [vmem:[%s10451_s3 + $0x314] sm:$0xf0]  ;;  %v6185_v32 = vld [vmem:[%s10451_s3 + $0x3b0] sm:$0xf] }
 0x5f5   :  { %v6106_v34 = vor.u32 %v7260_v18, %v6105_v43  ;;  %v6186_v12 = vor.u32 %v7280_v33, %v6185_v32  ;;  %v6394_v43 = vor.u32 %v7332_v26, %v6393_v25  ;;  %v6305_v18 = vld [vmem:[%s10451_s3 + $0x4a0] sm:$0xf]  ;;  %v7310_v32 = vld [vmem:[%s10451_s3 + $0x4a4] sm:$0xf0]  ;;  %v6521_v25 = vld [vmem:[%s10451_s3 + $0x650] sm:$0xf] }
 0x5f6   :  { %v6385_v33 = vld [vmem:[%s10451_s3 + $0x540] sm:$0xf] }
 0x5f8   :  { %3947 = vmatpush.bf16.msra.mxu1 %v5970_v28  ;;  %3958 = vmatpush.bf16.msra.mxu2 %v6050_v41  ;;  %v2306_v49 = vpop.f32.mrf.mxu3  ;;  %v6098_v41 = vor.u32 %v7258_v40, %v6097_v45  ;;  %v6633_v45 = vld [vmem:[%s10451_s3 + $0x730] sm:$0xf]  ;;  %v7392_v40 = vld [vmem:[%s10451_s3 + $0x734] sm:$0xf0] }
 0x5f9   :  { %v8986_v30 = vpack.c.bf16 %v2306_v49, %v2306_v49  ;;  %v6665_v49 = vld [vmem:[%s10451_s3 + $0x770] sm:$0xf] }
 0x5fb   :  { %3948 = vmatmul.bf16.vlgmr.msra.gmra.mxu1 %v8986_v30 }
 0x5fc   :  { %3966 = vmatpush.bf16.msrb.mxu1 %v6154_v36  ;;  %3959 = vmatpush.bf16.msra.mxu2 %v6042_v58  ;;  %v6178_v36 = vor.u32 %v7278_v51, %v6177_v48  ;;  %v7400_v58 = vld [vmem:[%s10451_s3 + $0x774] sm:$0xf0]  ;;  %v6306_v48 = vor.u32 %v7310_v32, %v6305_v18  ;;  %v5827_v18 = vld [vmem:[%s10451_s3 + $0xe8] sm:$0xf0] }
 0x5fd   :  { %v6666_v52 = vor.u32 %v7400_v58, %v6665_v49  ;;  %v7306_v49 = vld [vmem:[%s10451_s3 + $0x484] sm:$0xf0]  ;;  %v6369_v58 = vld [vmem:[%s10451_s3 + $0x520] sm:$0xf] }
 0x600   :  { %3967 = vmatpush.bf16.msrb.mxu1 %v6146_v53  ;;  %3960 = vmatpush.bf16.msra.mxu2 %v6034_v44  ;;  %v2308_v2 = vpop.f32.mrf.mxu3  ;;  %v7274_v53 = vld [vmem:[%s10451_s3 + $0x384] sm:$0xf0] }
 0x601   :  { %v9019_v22 = vpack.c.bf16 %v2308_v2, %v2308_v2  ;;  %v6162_v44 = vor.u32 %v7274_v53, %v6161_v60  ;;  %v6401_v2 = vld [vmem:[%s10451_s3 + $0x560] sm:$0xf]  ;;  %v6626_v60 = vor.u32 %v7390_v54, %v6625_v47  ;;  %v6537_v53 = vld [vmem:[%s10451_s3 + $0x670] sm:$0xf]  ;;  %v7360_v47 = vld [vmem:[%s10451_s3 + $0x634] sm:$0xf0] }
 0x602   :  { %v6585_v54 = vld [vmem:[%s10451_s3 + $0x6d0] sm:$0xf] }
 0x603   :  { %3961 = vmatmul.bf16.vlgmr.msra.gmra.mxu2 %v9019_v22 }
 0x604   :  { %3968 = vmatpush.bf16.msrb.mxu1 %v6138_v38  ;;  %3979 = vmatpush.bf16.msrb.mxu2 %v6218_v63  ;;  %v6657_v38 = vld [vmem:[%s10451_s3 + $0x760] sm:$0xf]  ;;  %v7398_v63 = vld [vmem:[%s10451_s3 + $0x764] sm:$0xf0] }
 0x605   :  { %v6658_v42 = vor.u32 %v7398_v63, %v6657_v38  ;;  %v7324_v38 = vld [vmem:[%s10451_s3 + $0x514] sm:$0xf0] }
 0x608   :  { %3969 = vmatpush.bf16.msrb.mxu1 %v6130_v46  ;;  %3980 = vmatpush.bf16.msrb.mxu2 %v6210_v15  ;;  %v2311_v62 = vpop.f32.mrf.mxu3  ;;  %v7334_v46 = vld [vmem:[%s10451_s3 + $0x564] sm:$0xf0] }
 0x609   :  { %v9091_v24 = vpack.c.bf16 %v2311_v62, %v2311_v62  ;;  %v6402_v5 = vor.u32 %v7334_v46, %v6401_v2  ;;  %v6641_v62 = vld [vmem:[%s10451_s3 + $0x740] sm:$0xf] }
 0x60a   :  { %v6609_v46 = vld [vmem:[%s10451_s3 + $0x700] sm:$0xf] }
 0x60c   :  { %3970 = vmatpush.bf16.msrb.mxu1 %v6122_v23  ;;  %3981 = vmatpush.bf16.msrb.mxu2 %v6202_v19  ;;  %v6313_v23 = vld [vmem:[%s10451_s3 + $0x4b0] sm:$0xf]  ;;  %v7312_v19 = vld [vmem:[%s10451_s3 + $0x4b4] sm:$0xf0] }
 0x610   :  { %3971 = vmatpush.bf16.msrb.mxu1 %v6114_v7  ;;  %3982 = vmatpush.bf16.msrb.mxu2 %v6194_v31  ;;  %v2313_v28 = vpop.f32.mrf.mxu3  ;;  %v7394_v7 = vld [vmem:[%s10451_s3 + $0x744] sm:$0xf0]  ;;  %v6314_v31 = vor.u32 %v7312_v19, %v6313_v23  ;;  %v6353_v23 = vld [vmem:[%s10451_s3 + $0x500] sm:$0xf] }
 0x611   :  { %v9139_v15 = vpack.c.bf16 %v2313_v28, %v2313_v28  ;;  %v6377_v28 = vld [vmem:[%s10451_s3 + $0x530] sm:$0xf]  ;;  %v7322_v19 = vld [vmem:[%s10451_s3 + $0x504] sm:$0xf0] }
 0x614   :  { %3972 = vmatpush.bf16.msrb.mxu1 %v6106_v34  ;;  %3983 = vmatpush.bf16.msrb.mxu2 %v6186_v12  ;;  %v7330_v34 = vld [vmem:[%s10451_s3 + $0x544] sm:$0xf0]  ;;  %v6642_v12 = vor.u32 %v7394_v7, %v6641_v62  ;;  %v7384_v62 = vld [vmem:[%s10451_s3 + $0x6f4] sm:$0xf0] }
 0x615   :  { %v6386_v51 = vor.u32 %v7330_v34, %v6385_v33  ;;  %v6513_v34 = vld [vmem:[%s10451_s3 + $0x640] sm:$0xf] }
 0x618   :  { %3973 = vmatpush.bf16.msrb.mxu1 %v6098_v41  ;;  %3984 = vmatpush.bf16.msrb.mxu2 %v6178_v36  ;;  %v2316_v14 = vpop.f32.mrf.mxu3  ;;  %v7328_v41 = vld [vmem:[%s10451_s3 + $0x534] sm:$0xf0] }
 0x619   :  { %v9118_v21 = vpack.c.bf16 %v2316_v14, %v2316_v14  ;;  %v6378_v57 = vor.u32 %v7328_v41, %v6377_v28  ;;  %v5819_v28 = vld [vmem:[%s10451_s3 + $0xd8] sm:$0xf0] }
 0x61b   :  { %3974 = vmatmul.bf16.vlgmr.msrb.gmra.mxu1 %v9091_v24  ;;  %4000 = vmatmul.bf16.vlgmr.msra.gmra.mxu3 %v9118_v21 }
 0x61c   :  { %4005 = vmatpush.bf16.msra.mxu1 %v6346_v56  ;;  %3985 = vmatpush.bf16.msrb.mxu2 %v6170_v10  ;;  %v6634_v56 = vor.u32 %v7392_v40, %v6633_v45  ;;  %v6289_v10 = vld [vmem:[%s10451_s3 + $0x480] sm:$0xf]  ;;  %v7362_v45 = vld [vmem:[%s10451_s3 + $0x644] sm:$0xf0] }
 0x61d   :  { %4070 = vmatpush.bf16.msra.mxu3 %v6666_v52  ;;  %v6290_v13 = vor.u32 %v7306_v49, %v6289_v10  ;;  %v6538_v52 = vor.u32 %v7368_v3, %v6537_v53  ;;  %v6593_v40 = vld [vmem:[%s10451_s3 + $0x6e0] sm:$0xf]  ;;  %v6514_v41 = vor.u32 %v7362_v45, %v6513_v34  ;;  %v7185_v10 = vld [vmem:[%s10451_s3 + $0xc4] sm:$0xf]  ;;  %v5811_v49 = vld [vmem:[%s10451_s3 + $0xc8] sm:$0xf0] }
 0x61e   :  { %v7358_v3 = vld [vmem:[%s10451_s3 + $0x624] sm:$0xf0]  ;;  %v6553_v45 = vld [vmem:[%s10451_s3 + $0x690] sm:$0xf] }
 0x620   :  { %4006 = vmatpush.bf16.msra.mxu1 %v6338_v59  ;;  %3986 = vmatpush.bf16.msrb.mxu2 %v6162_v44  ;;  %v2318_v29 = vpop.f32.mrf.mxu3  ;;  %v7326_v59 = vld [vmem:[%s10451_s3 + $0x524] sm:$0xf0]  ;;  %v6361_v44 = vld [vmem:[%s10451_s3 + $0x510] sm:$0xf] }
 0x621   :  { %4071 = vmatpush.bf16.msra.mxu3 %v6658_v42  ;;  %v6370_v14 = vor.u32 %v7326_v59, %v6369_v58  ;;  %v9240_v55 = vpack.c.bf16 %v2318_v29, %v2318_v29  ;;  %v7386_v42 = vld [vmem:[%s10451_s3 + $0x704] sm:$0xf0]  ;;  %v6362_v35 = vor.u32 %v7324_v38, %v6361_v44  ;;  %v7364_v29 = vld [vmem:[%s10451_s3 + $0x654] sm:$0xf0] }
 0x622   :  { %v6610_v26 = vor.u32 %v7386_v42, %v6609_v46  ;;  %v6522_v32 = vor.u32 %v7364_v29, %v6521_v25  ;;  %v7454_v44 = vld [vmem:[%s10452_s4 + $0x128] sm:$0xff]  ;;  %v7376_v46 = vld [vmem:[%s10451_s3 + $0x6b4] sm:$0xf0] }
 0x623   :  { %3987 = vmatmul.bf16.vlgmr.msrb.gmra.mxu2 %v9139_v15  ;;  %4976 = vmatpush.bf16.msra.mxu0 %v7454_v44  ;;  %v7354_v25 = vld [vmem:[%s10451_s3 + $0x604] sm:$0xf0]  ;;  %v6705_v44 = vld [vmem:[%s10451_s3 + $0x7c0] sm:$0xf] }
 0x624   :  { %4007 = vmatpush.bf16.msra.mxu1 %v6330_v4  ;;  %4018 = vmatpush.bf16.msra.mxu2 %v6410_v6  ;;  %v6618_v4 = vor.u32 %v7388_v16, %v6617_v39  ;;  %v6529_v6 = vld [vmem:[%s10451_s3 + $0x660] sm:$0xf]  ;;  %v7378_v16 = vld [vmem:[%s10451_s3 + $0x6c4] sm:$0xf0] }
 0x625   :  { %4072 = vmatpush.bf16.msra.mxu3 %v6650_v9  ;;  %v6601_v9 = vld [vmem:[%s10451_s3 + $0x6f0] sm:$0xf]  ;;  %v6577_v39 = vld [vmem:[%s10451_s3 + $0x6c0] sm:$0xf]  ;;  %v7374_v29 = vld [vmem:[%s10451_s3 + $0x6a4] sm:$0xf0] }
 0x626   :  { %v6602_v33 = vor.u32 %v7384_v62, %v6601_v9 }
 0x628   :  { %4008 = vmatpush.bf16.msra.mxu1 %v6322_v17  ;;  %4019 = vmatpush.bf16.msra.mxu2 %v6402_v5  ;;  %v9196_v36 = vpop.f32.mrf.mxu3  ;;  %v5835_v17 = vld [vmem:[%s10451_s3 + $0xf8] sm:$0xf0]  ;;  %v6530_v5 = vor.u32 %v7366_v20, %v6529_v6  ;;  %v7356_v6 = vld [vmem:[%s10451_s3 + $0x614] sm:$0xf0]  ;;  %v6569_v20 = vld [vmem:[%s10451_s3 + $0x6b0] sm:$0xf] }
 0x629   :  { %4073 = vmatpush.bf16.msra.mxu3 %v6642_v12  ;;  %v5838_v7 = vor.u32 %v7191_v50, %v5835_v17  ;;  %v5795_v50 = vld [vmem:[%s10451_s3 + $0xa8] sm:$0xf0] }
 0x62c   :  { %4009 = vmatpush.bf16.msra.mxu1 %v6314_v31  ;;  %4020 = vmatpush.bf16.msra.mxu2 %v6394_v43  ;;  %v6354_v31 = vor.u32 %v7322_v19, %v6353_v23  ;;  %v7189_v43 = vld [vmem:[%s10451_s3 + $0xe4] sm:$0xf]  ;;  %v6481_v23 = vld [vmem:[%s10451_s3 + $0x600] sm:$0xf] }
 0x62d   :  { %4074 = vmatpush.bf16.msra.mxu3 %v6634_v56  ;;  %v5830_v8 = vor.u32 %v7189_v43, %v5827_v18  ;;  %v7179_v43 = vld [vmem:[%s10451_s3 + $0x94] sm:$0xf]  ;;  %v5787_v18 = vld [vmem:[%s10451_s3 + $0x98] sm:$0xf0] }
 0x630   :  { %4010 = vmatpush.bf16.msra.mxu1 %v6306_v48  ;;  %4021 = vmatpush.bf16.msra.mxu2 %v6386_v51  ;;  %v2323_v63 = vpop.f32.mrf.mxu3  ;;  %v7382_v48 = vld [vmem:[%s10451_s3 + $0x6e4] sm:$0xf0]  ;;  %v9298_v51 = vpack.c.bf16 %v9196_v36, %v9196_v36  ;;  %v6505_v36 = vld [vmem:[%s10451_s3 + $0x630] sm:$0xf] }
 0x631   :  { %4075 = vmatpush.bf16.msra.mxu3 %v6626_v60  ;;  %v9242_v2 = vpack.c.bf16 %v2323_v63, %v2323_v63  ;;  %v6594_v56 = vor.u32 %v7382_v48, %v6593_v40  ;;  %v6506_v58 = vor.u32 %v7360_v47, %v6505_v36  ;;  %v6497_v60 = vld [vmem:[%s10451_s3 + $0x620] sm:$0xf]  ;;  %v6578_v63 = vor.u32 %v7378_v16, %v6577_v39  ;;  %v7372_v40 = vld [vmem:[%s10451_s3 + $0x694] sm:$0xf0]  ;;  %v7239_v47 = vld [vmem:[%s10451_s3 + $0x274] sm:$0xf] }
 0x632   :  { %v6498_v38 = vor.u32 %v7358_v3, %v6497_v60  ;;  %v5790_v48 = vor.u32 %v7179_v43, %v5787_v18  ;;  %v6554_v36 = vor.u32 %v7372_v40, %v6553_v45  ;;  %v5771_v60 = vld [vmem:[%s10451_s3 + $0x78] sm:$0xf0]  ;;  %v7237_v16 = vld [vmem:[%s10451_s3 + $0x264] sm:$0xf]  ;;  %v7406_v43 = vld [vmem:[%s10451_s3 + $0x7a4] sm:$0xf0] }
 0x633   :  { %4039 = vmatmul.bf16.vlgmr.msrb.gmra.mxu3 %v9242_v2  ;;  %v7169_v18 = vld [vmem:[%s10451_s3 + $0x44] sm:$0xf] }
 0x634   :  { %4011 = vmatpush.bf16.msra.mxu1 %v6298_v1  ;;  %4022 = vmatpush.bf16.msra.mxu2 %v6378_v57  ;;  %v7380_v1 = vld [vmem:[%s10451_s3 + $0x6d4] sm:$0xf0]  ;;  %v5822_v57 = vor.u32 %v7187_v61, %v5819_v28  ;;  %v7414_v61 = vld [vmem:[%s10451_s3 + $0x7e4] sm:$0xf0] }
 0x635   :  { %4076 = vmatpush.bf16.msra.mxu3 %v6618_v4  ;;  %v6586_v59 = vor.u32 %v7380_v1, %v6585_v54  ;;  %v6489_v4 = vld [vmem:[%s10451_s3 + $0x610] sm:$0xf]  ;;  %v6545_v1 = vld [vmem:[%s10451_s3 + $0x680] sm:$0xf] }
 0x636   :  { %v6490_v17 = vor.u32 %v7356_v6, %v6489_v4  ;;  %v5763_v4 = vld [vmem:[%s10451_s3 + $0x68] sm:$0xf0] }
 0x638   :  { %4012 = vmatpush.bf16.msra.mxu1 %v6290_v13  ;;  %4023 = vmatpush.bf16.msra.mxu2 %v6370_v14  ;;  %v9285_v12 = vpop.f32.mrf.mxu3  ;;  %v5814_v13 = vor.u32 %v7185_v10, %v5811_v49  ;;  %v7183_v14 = vld [vmem:[%s10451_s3 + $0xb4] sm:$0xf]  ;;  %v6713_v10 = vld [vmem:[%s10451_s3 + $0x7d0] sm:$0xf] }
 0x639   :  { %4077 = vmatpush.bf16.msra.mxu3 %v6610_v26  ;;  %v6561_v26 = vld [vmem:[%s10451_s3 + $0x6a0] sm:$0xf]  ;;  %v9407_v28 = vpack.c.bf16 %v9285_v12, %v9285_v12  ;;  %v6027_v12 = vld [vmem:[%s10451_s3 + $0x278] sm:$0xf0] }
 0x63a   :  { %v6030_v3 = vor.u32 %v7239_v47, %v6027_v12  ;;  %v7229_v47 = vld [vmem:[%s10451_s3 + $0x224] sm:$0xf]  ;;  %v5987_v12 = vld [vmem:[%s10451_s3 + $0x228] sm:$0xf0] }
 0x63b   :  { %4013 = vmatmul.bf16.vlgmr.msra.gmra.mxu1 %v9240_v55 }
 0x63c   :  { %4044 = vmatpush.bf16.msrb.mxu1 %v6538_v52  ;;  %4024 = vmatpush.bf16.msra.mxu2 %v6362_v35  ;;  %v5803_v52 = vld [vmem:[%s10451_s3 + $0xb8] sm:$0xf0]  ;;  %v7181_v35 = vld [vmem:[%s10451_s3 + $0xa4] sm:$0xf] }
 0x63d   :  { %4109 = vmatpush.bf16.msrb.mxu3 %v5838_v7  ;;  %v5806_v42 = vor.u32 %v7183_v14, %v5803_v52  ;;  %v5798_v62 = vor.u32 %v7181_v35, %v5795_v50  ;;  %v6729_v7 = vld [vmem:[%s10451_s3 + $0x7f0] sm:$0xf] }
 0x640   :  { %4045 = vmatpush.bf16.msrb.mxu1 %v6530_v5  ;;  %4025 = vmatpush.bf16.msra.mxu2 %v6354_v31  ;;  %v9328_v53 = vpop.f32.mrf.mxu3  ;;  %v6570_v5 = vor.u32 %v7376_v46, %v6569_v20  ;;  %v7416_v31 = vld [vmem:[%s10451_s3 + $0x7f4] sm:$0xf0]  ;;  %v7235_v46 = vld [vmem:[%s10451_s3 + $0x254] sm:$0xf] }
 0x641   :  { %4110 = vmatpush.bf16.msrb.mxu3 %v5830_v8  ;;  %v6730_v34 = vor.u32 %v7416_v31, %v6729_v7  ;;  %v6721_v8 = vld [vmem:[%s10451_s3 + $0x7e0] sm:$0xf]  ;;  %v9460_v6 = vpack.c.bf16 %v9328_v53, %v9328_v53  ;;  %v6697_v53 = vld [vmem:[%s10451_s3 + $0x7b0] sm:$0xf] }
 0x642   :  { %v6722_v54 = vor.u32 %v7414_v61, %v6721_v8  ;;  %v6689_v31 = vld [vmem:[%s10451_s3 + $0x7a0] sm:$0xf]  ;;  %v6681_v8 = vld [vmem:[%s10451_s3 + $0x790] sm:$0xf]  ;;  %v7404_v61 = vld [vmem:[%s10451_s3 + $0x794] sm:$0xf0] }
 0x643   :  { %4026 = vmatmul.bf16.vlgmr.msra.gmra.mxu2 %v9298_v51  ;;  %v6690_v40 = vor.u32 %v7406_v43, %v6689_v31  ;;  %v7203_v31 = vld [vmem:[%s10451_s3 + $0x154] sm:$0xf] }
 0x644   :  { %4046 = vmatpush.bf16.msrb.mxu1 %v6522_v32  ;;  %4057 = vmatpush.bf16.msrb.mxu2 %v6602_v33  ;;  %v6482_v32 = vor.u32 %v7354_v25, %v6481_v23  ;;  %v6562_v33 = vor.u32 %v7374_v29, %v6561_v26  ;;  %v7171_v23 = vld [vmem:[%s10451_s3 + $0x54] sm:$0xf]  ;;  %v7233_v26 = vld [vmem:[%s10451_s3 + $0x244] sm:$0xf]  ;;  %v6003_v29 = vld [vmem:[%s10451_s3 + $0x248] sm:$0xf0] }
 0x645   :  { %4111 = vmatpush.bf16.msrb.mxu3 %v5822_v57  ;;  %v7370_v57 = vld [vmem:[%s10451_s3 + $0x684] sm:$0xf0] }
 0x646   :  { %v6546_v39 = vor.u32 %v7370_v57, %v6545_v1  ;;  %v6673_v57 = vld [vmem:[%s10451_s3 + $0x780] sm:$0xf] }
 0x648   :  { %4047 = vmatpush.bf16.msrb.mxu1 %v6514_v41  ;;  %4058 = vmatpush.bf16.msrb.mxu2 %v6594_v56  ;;  %v2331_v19 = vpop.f32.mrf.mxu3  ;;  %v7177_v41 = vld [vmem:[%s10451_s3 + $0x84] sm:$0xf]  ;;  %v5779_v56 = vld [vmem:[%s10451_s3 + $0x88] sm:$0xf0] }
 0x649   :  { %4112 = vmatpush.bf16.msrb.mxu3 %v5814_v13  ;;  %v9378_v9 = vpack.c.bf16 %v2331_v19, %v2331_v19  ;;  %v5782_v49 = vor.u32 %v7177_v41, %v5779_v56  ;;  %v6019_v13 = vld [vmem:[%s10451_s3 + $0x268] sm:$0xf0]  ;;  %v5755_v19 = vld [vmem:[%s10451_s3 + $0x58] sm:$0xf0]  ;;  %v7167_v41 = vld [vmem:[%s10451_s3 + $0x34] sm:$0xf] }
 0x64a   :  { %v6022_v20 = vor.u32 %v7237_v16, %v6019_v13  ;;  %v5758_v7 = vor.u32 %v7171_v23, %v5755_v19  ;;  %v5739_v56 = vld [vmem:[%s10451_s3 + $0x38] sm:$0xf0]  ;;  %v7227_v13 = vld [vmem:[%s10451_s3 + $0x214] sm:$0xf]  ;;  %v5971_v23 = vld [vmem:[%s10451_s3 + $0x208] sm:$0xf0] }
 0x64b   :  { %4078 = vmatmul.bf16.vlgmr.msra.gmra.mxu3 %v9378_v9  ;;  %v5742_v1 = vor.u32 %v7167_v41, %v5739_v56  ;;  %v7201_v56 = vld [vmem:[%s10451_s3 + $0x144] sm:$0xf] }
 0x64c   :  { %4048 = vmatpush.bf16.msrb.mxu1 %v6506_v58  ;;  %4059 = vmatpush.bf16.msrb.mxu2 %v6586_v59  ;;  %v7412_v58 = vld [vmem:[%s10451_s3 + $0x7d4] sm:$0xf0]  ;;  %v7175_v59 = vld [vmem:[%s10451_s3 + $0x74] sm:$0xf] }
 0x64d   :  { %4113 = vmatpush.bf16.msrb.mxu3 %v5806_v42  ;;  %v6714_v14 = vor.u32 %v7412_v58, %v6713_v10  ;;  %v5774_v52 = vor.u32 %v7175_v59, %v5771_v60  ;;  %v6011_v42 = vld [vmem:[%s10451_s3 + $0x258] sm:$0xf0]  ;;  %v7402_v10 = vld [vmem:[%s10451_s3 + $0x784] sm:$0xf0]  ;;  %v5731_v58 = vld [vmem:[%s10451_s3 + $0x28] sm:$0xf0]  ;;  %v5990_v60 = vor.u32 %v7229_v47, %v5987_v12 }
 0x64e   :  { %v6014_v25 = vor.u32 %v7235_v46, %v6011_v42  ;;  %v7163_v46 = vld [vmem:[%s10451_s3 + $0x14] sm:$0xf]  ;;  %v5723_v42 = vld [vmem:[%s10451_s3 + $0x18] sm:$0xf0]  ;;  %v7221_v47 = vld [vmem:[%s10451_s3 + $0x1e4] sm:$0xf] }
 0x64f   :  { %v5726_v19 = vor.u32 %v7163_v46, %v5723_v42  ;;  %v5955_v12 = vld [vmem:[%s10451_s3 + $0x1e8] sm:$0xf0] }
 0x650   :  { %4049 = vmatpush.bf16.msrb.mxu1 %v6498_v38  ;;  %4060 = vmatpush.bf16.msrb.mxu2 %v6578_v63  ;;  %v7410_v38 = vld [vmem:[%s10451_s3 + $0x7c4] sm:$0xf0]  ;;  %v7173_v63 = vld [vmem:[%s10451_s3 + $0x64] sm:$0xf]  ;;  %v5939_v46 = vld [vmem:[%s10451_s3 + $0x1c8] sm:$0xf0] }
 0x651   :  { %4114 = vmatpush.bf16.msrb.mxu3 %v5798_v62  ;;  %v6706_v50 = vor.u32 %v7410_v38, %v6705_v44  ;;  %v2333_v44 = vpop.f32.mrf.mxu3  ;;  %v6674_v38 = vor.u32 %v7402_v10, %v6673_v57  ;;  %v6203_v57 = vld [vmem:[%s10451_s3 + $0x3d8] sm:$0xf0] }
 0x654   :  { %4050 = vmatpush.bf16.msrb.mxu1 %v6490_v17  ;;  %4061 = vmatpush.bf16.msrb.mxu2 %v6570_v5  ;;  %v5766_v17 = vor.u32 %v7173_v63, %v5763_v4  ;;  %v7408_v5 = vld [vmem:[%s10451_s3 + $0x7b4] sm:$0xf0] }
 0x655   :  { %4115 = vmatpush.bf16.msrb.mxu3 %v5790_v48  ;;  %v6698_v62 = vor.u32 %v7408_v5, %v6697_v53  ;;  %v9560_v53 = vpack.c.bf16 %v2333_v44, %v2333_v44  ;;  %v7225_v5 = vld [vmem:[%s10451_s3 + $0x204] sm:$0xf] }
 0x658   :  { %4051 = vmatpush.bf16.msrb.mxu1 %v6482_v32  ;;  %4062 = vmatpush.bf16.msrb.mxu2 %v6562_v33  ;;  %v3897_v35 = vpop.f32.mrf.mxu1  ;;  %v5747_v32 = vld [vmem:[%s10451_s3 + $0x48] sm:$0xf0]  ;;  %v6006_v33 = vor.u32 %v7233_v26, %v6003_v29  ;;  %v6219_v26 = vld [vmem:[%s10451_s3 + $0x3f8] sm:$0xf0] }
 0x659   :  { %4116 = vmatpush.bf16.msrb.mxu3 %v5782_v49  ;;  %v5750_v48 = vor.u32 %v7169_v18, %v5747_v32  ;;  %v7165_v49 = vld [vmem:[%s10451_s3 + $0x24] sm:$0xf]  ;;  %v5974_v18 = vor.u32 %v7225_v5, %v5971_v23  ;;  %v5883_v32 = vld [vmem:[%s10451_s3 + $0x158] sm:$0xf0]  ;;  %v7195_v23 = vld [vmem:[%s10451_s3 + $0x114] sm:$0xf] }
 0x65a   :  { %v5734_v63 = vor.u32 %v7165_v49, %v5731_v58  ;;  %v5958_v49 = vor.u32 %v7221_v47, %v5955_v12  ;;  %v7199_v58 = vld [vmem:[%s10451_s3 + $0x134] sm:$0xf] }
 0x65b   :  { %4052 = vmatmul.bf16.vlgmr.msrb.gmra.mxu1 %v9407_v28 }
 0x65c   :  { %4083 = vmatpush.bf16.msra.mxu1 %v6730_v34  ;;  %4063 = vmatpush.bf16.msrb.mxu2 %v6554_v36  ;;  %v7231_v34 = vld [vmem:[%s10451_s3 + $0x234] sm:$0xf] }
 0x65d   :  { %4148 = vmatpush.bf16.msra.mxu3 %v6030_v3  ;;  %v7207_v3 = vld [vmem:[%s10451_s3 + $0x174] sm:$0xf] }
 0x65e   :  { %4117 = vmatmul.bf16.vlgmr.msrb.gmra.mxu3 %v8860_v27  ;;  %v5995_v27 = vld [vmem:[%s10451_s3 + $0x238] sm:$0xf0] }
 0x65f   :  { %v5998_v36 = vor.u32 %v7231_v34, %v5995_v27  ;;  %v5963_v34 = vld [vmem:[%s10451_s3 + $0x1f8] sm:$0xf0] }
 0x660   :  { %4084 = vmatpush.bf16.msra.mxu1 %v6722_v54  ;;  %4064 = vmatpush.bf16.msrb.mxu2 %v6546_v39  ;;  %v3899_v45 = vpop.f32.mrf.mxu1  ;;  %v6682_v54 = vor.u32 %v7404_v61, %v6681_v8  ;;  %v5899_v39 = vld [vmem:[%s10451_s3 + $0x178] sm:$0xf0]  ;;  %v6211_v8 = vld [vmem:[%s10451_s3 + $0x3e8] sm:$0xf0]  ;;  %v5886_v61 = vor.u32 %v7203_v31, %v5883_v32 }
 0x661   :  { %4149 = vmatpush.bf16.msra.mxu3 %v6022_v20  ;;  %v5902_v20 = vor.u32 %v7207_v3, %v5899_v39  ;;  %v7219_v3 = vld [vmem:[%s10451_s3 + $0x1d4] sm:$0xf]  ;;  %v5947_v39 = vld [vmem:[%s10451_s3 + $0x1d8] sm:$0xf0]  ;;  %v6179_v31 = vld [vmem:[%s10451_s3 + $0x3a8] sm:$0xf0] }
 0x663   :  { %4065 = vmatmul.bf16.vlgmr.msrb.gmra.mxu2 %v9460_v6 }
 0x664   :  { %4085 = vmatpush.bf16.msra.mxu1 %v6714_v14  ;;  %4096 = vmatpush.bf16.msra.mxu2 %v5774_v52  ;;  %v5979_v14 = vld [vmem:[%s10451_s3 + $0x218] sm:$0xf0] }
 0x665   :  { %4150 = vmatpush.bf16.msra.mxu3 %v6014_v25  ;;  %v7287_v25 = vld [vmem:[%s10451_s3 + $0x3f4] sm:$0xf] }
 0x666   :  { %v3910_v59 = vpop.f32.mrf.mxu2  ;;  %v6222_v27 = vor.u32 %v7287_v25, %v6219_v26  ;;  %v5851_v25 = vld [vmem:[%s10451_s3 + $0x118] sm:$0xf0]  ;;  %v7215_v26 = vld [vmem:[%s10451_s3 + $0x1b4] sm:$0xf] }
 0x667   :  { %v3911_v16 = vadd.f32 %v3910_v59, %v3897_v35  ;;  %v5982_v35 = vor.u32 %v7227_v13, %v5979_v14 }
 0x668   :  { %4086 = vmatpush.bf16.msra.mxu1 %v6706_v50  ;;  %4097 = vmatpush.bf16.msra.mxu2 %v5766_v17  ;;  %v3923_v52 = vpop.f32.mrf.mxu1  ;;  %v7205_v50 = vld [vmem:[%s10451_s3 + $0x164] sm:$0xf]  ;;  %v5891_v17 = vld [vmem:[%s10451_s3 + $0x168] sm:$0xf0] }
 0x669   :  { %4151 = vmatpush.bf16.msra.mxu3 %v6006_v33  ;;  %v3924_v4 = vadd.f32 %v3923_v52, %v3911_v16  ;;  %v5894_v29 = vor.u32 %v7205_v50, %v5891_v17  ;;  %v7223_v33 = vld [vmem:[%s10451_s3 + $0x1f4] sm:$0xf]  ;;  %v6195_v52 = vld [vmem:[%s10451_s3 + $0x3c8] sm:$0xf0]  ;;  %v6187_v50 = vld [vmem:[%s10451_s3 + $0x3b8] sm:$0xf0] }
 0x66a   :  { %v5966_v41 = vor.u32 %v7223_v33, %v5963_v34  ;;  %v7193_v33 = vld [vmem:[%s10451_s3 + $0x104] sm:$0xf]  ;;  %v5843_v34 = vld [vmem:[%s10451_s3 + $0x108] sm:$0xf0] }
 0x66c   :  { %4087 = vmatpush.bf16.msra.mxu1 %v6698_v62  ;;  %4098 = vmatpush.bf16.msra.mxu2 %v5758_v7  ;;  %v7161_v62 = vld [vmem:[%s10451_s3 + $0x4] sm:$0xf]  ;;  %v5715_v7 = vld [vmem:[%s10451_s3 + $0x8] sm:$0xf0] }
 0x66d   :  { %4152 = vmatpush.bf16.msra.mxu3 %v5998_v36  ;;  %v5875_v36 = vld [vmem:[%s10451_s3 + $0x148] sm:$0xf0] }
 0x66e   :  { %v3912_v43 = vpop.f32.mrf.mxu2  ;;  %v5878_v10 = vor.u32 %v7201_v56, %v5875_v36  ;;  %v7453_v56 = vld [vmem:[%s10452_s4 + $0x120] sm:$0xff]  ;;  %v5846_v36 = vor.u32 %v7193_v33, %v5843_v34  ;;  %v6139_v33 = vld [vmem:[%s10451_s3 + $0x358] sm:$0xf0] }
 0x66f   :  { %4977 = vmatpush.bf16.msra.mxu0 %v7453_v56  ;;  %v6131_v56 = vld [vmem:[%s10451_s3 + $0x348] sm:$0xf0] }
 0x670   :  { %4088 = vmatpush.bf16.msra.mxu1 %v6690_v40  ;;  %4099 = vmatpush.bf16.msra.mxu2 %v5750_v48  ;;  %v3925_v45 = vpop.f32.mrf.mxu1  ;;  %v5718_v40 = vor.u32 %v7161_v62, %v5715_v7  ;;  %v7285_v48 = vld [vmem:[%s10451_s3 + $0x3e4] sm:$0xf] }
 0x671   :  { %4153 = vmatpush.bf16.msra.mxu3 %v5990_v60  ;;  %v5867_v60 = vld [vmem:[%s10451_s3 + $0x138] sm:$0xf0]  ;;  %v7277_v7 = vld [vmem:[%s10451_s3 + $0x3a4] sm:$0xf]  ;;  %v5923_v45 = vld [vmem:[%s10451_s3 + $0x1a8] sm:$0xf0] }
 0x674   :  { %4089 = vmatpush.bf16.msra.mxu1 %v6682_v54  ;;  %4100 = vmatpush.bf16.msra.mxu2 %v5742_v1  ;;  %v6214_v54 = vor.u32 %v7285_v48, %v6211_v8  ;;  %v7283_v1 = vld [vmem:[%s10451_s3 + $0x3d4] sm:$0xf]  ;;  %v6091_v8 = vld [vmem:[%s10451_s3 + $0x2f8] sm:$0xf0] }
 0x675   :  { %4154 = vmatpush.bf16.msra.mxu3 %v5982_v35  ;;  %v6206_v13 = vor.u32 %v7283_v1, %v6203_v57  ;;  %v7279_v35 = vld [vmem:[%s10451_s3 + $0x3b4] sm:$0xf]  ;;  %v5915_v57 = vld [vmem:[%s10451_s3 + $0x198] sm:$0xf0] }
 0x676   :  { %v3936_v59 = vpop.f32.mrf.mxu2  ;;  %v6190_v62 = vor.u32 %v7279_v35, %v6187_v50  ;;  %v7255_v48 = vld [vmem:[%s10451_s3 + $0x2f4] sm:$0xf]  ;;  %v6403_v35 = vld [vmem:[%s10451_s3 + $0x568] sm:$0xf0] }
 0x677   :  { %v3937_v16 = vadd.f32 %v3936_v59, %v3924_v4  ;;  %v5859_v4 = vld [vmem:[%s10451_s3 + $0x128] sm:$0xf0]  ;;  %v7211_v1 = vld [vmem:[%s10451_s3 + $0x194] sm:$0xf] }
 0x678   :  { %4090 = vmatpush.bf16.msra.mxu1 %v6674_v38  ;;  %4101 = vmatpush.bf16.msra.mxu2 %v5734_v63  ;;  %v3949_v14 = vpop.f32.mrf.mxu1  ;;  %v5870_v38 = vor.u32 %v7199_v58, %v5867_v60  ;;  %v5950_v63 = vor.u32 %v7219_v3, %v5947_v39  ;;  %v7253_v58 = vld [vmem:[%s10451_s3 + $0x2e4] sm:$0xf]  ;;  %v6083_v59 = vld [vmem:[%s10451_s3 + $0x2e8] sm:$0xf0]  ;;  %v5918_v39 = vor.u32 %v7211_v1, %v5915_v57  ;;  %v7243_v57 = vld [vmem:[%s10451_s3 + $0x294] sm:$0xf] }
 0x679   :  { %4155 = vmatpush.bf16.msra.mxu3 %v5974_v18  ;;  %v3950_v44 = vadd.f32 %v3949_v14, %v3937_v16  ;;  %v5854_v18 = vor.u32 %v7195_v23, %v5851_v25  ;;  %v7273_v60 = vld [vmem:[%s10451_s3 + $0x384] sm:$0xf]  ;;  %v6163_v3 = vld [vmem:[%s10451_s3 + $0x388] sm:$0xf0]  ;;  %v7335_v16 = vld [vmem:[%s10451_s3 + $0x574] sm:$0xf]  ;;  %v6086_v14 = vor.u32 %v7253_v58, %v6083_v59 }
 0x67a   :  { %v6147_v25 = vld [vmem:[%s10451_s3 + $0x368] sm:$0xf0]  ;;  %v6123_v58 = vld [vmem:[%s10451_s3 + $0x338] sm:$0xf0] }
 0x67b   :  { %4091 = vmatmul.bf16.vlgmr.msra.gmra.mxu1 %v9560_v53 }
 0x67c   :  { %4122 = vmatpush.bf16.msrb.mxu1 %v5902_v20  ;;  %4102 = vmatpush.bf16.msra.mxu2 %v5726_v19  ;;  %v7217_v20 = vld [vmem:[%s10451_s3 + $0x1c4] sm:$0xf] }
 0x67d   :  { %4187 = vmatpush.bf16.msrb.mxu3 %v6222_v27  ;;  %v5942_v5 = vor.u32 %v7217_v20, %v5939_v46  ;;  %v7213_v27 = vld [vmem:[%s10451_s3 + $0x1a4] sm:$0xf] }
 0x67e   :  { %4156 = vmatmul.bf16.vlgmr.msra.gmra.mxu3 %v8986_v30  ;;  %v7281_v30 = vld [vmem:[%s10451_s3 + $0x3c4] sm:$0xf]  ;;  %v3938_v19 = vpop.f32.mrf.mxu2  ;;  %v5926_v47 = vor.u32 %v7213_v27, %v5923_v45  ;;  %v6387_v45 = vld [vmem:[%s10451_s3 + $0x548] sm:$0xf0] }
 0x67f   :  { %v6198_v42 = vor.u32 %v7281_v30, %v6195_v52  ;;  %v7209_v30 = vld [vmem:[%s10451_s3 + $0x184] sm:$0xf]  ;;  %v5907_v52 = vld [vmem:[%s10451_s3 + $0x188] sm:$0xf0] }
 0x680   :  { %4123 = vmatpush.bf16.msrb.mxu1 %v5894_v29  ;;  %4103 = vmatpush.bf16.msra.mxu2 %v5718_v40  ;;  %v5931_v29 = vld [vmem:[%s10451_s3 + $0x1b8] sm:$0xf0]  ;;  %v3951_v43 = vpop.f32.mrf.mxu1  ;;  %v6182_v40 = vor.u32 %v7277_v7, %v6179_v31  ;;  %v5910_v46 = vor.u32 %v7209_v30, %v5907_v52  ;;  %v7269_v19 = vld [vmem:[%s10451_s3 + $0x364] sm:$0xf]  ;;  %v6035_v52 = vld [vmem:[%s10451_s3 + $0x288] sm:$0xf0] }
 0x681   :  { %4188 = vmatpush.bf16.msrb.mxu3 %v6214_v54  ;;  %v5934_v32 = vor.u32 %v7215_v26, %v5931_v29  ;;  %v6094_v54 = vor.u32 %v7255_v48, %v6091_v8  ;;  %v7331_v29 = vld [vmem:[%s10451_s3 + $0x554] sm:$0xf]  ;;  %v6150_v31 = vor.u32 %v7269_v19, %v6147_v25  ;;  %v7241_v30 = vld [vmem:[%s10451_s3 + $0x284] sm:$0xf] }
 0x682   :  { %v7247_v43 = vld [vmem:[%s10451_s3 + $0x2b4] sm:$0xf]  ;;  %v7301_v25 = vld [vmem:[%s10451_s3 + $0x464] sm:$0xf] }
 0x683   :  { %4104 = vmatmul.bf16.vlgmr.msra.gmra.mxu2 %v8818_v0  ;;  %v7197_v0 = vld [vmem:[%s10451_s3 + $0x124] sm:$0xf] }
 0x684   :  { %4124 = vmatpush.bf16.msrb.mxu1 %v5886_v61  ;;  %4135 = vmatpush.bf16.msrb.mxu2 %v5966_v41  ;;  %v5862_v17 = vor.u32 %v7197_v0, %v5859_v4  ;;  %v7275_v61 = vld [vmem:[%s10451_s3 + $0x394] sm:$0xf]  ;;  %v6171_v41 = vld [vmem:[%s10451_s3 + $0x398] sm:$0xf0] }
 0x685   :  { %4189 = vmatpush.bf16.msrb.mxu3 %v6206_v13  ;;  %v6411_v13 = vld [vmem:[%s10451_s3 + $0x578] sm:$0xf0]  ;;  %v7271_v0 = vld [vmem:[%s10451_s3 + $0x374] sm:$0xf] }
 0x686   :  { %v3962_v12 = vpop.f32.mrf.mxu2  ;;  %v6155_v4 = vld [vmem:[%s10451_s3 + $0x378] sm:$0xf0]  ;;  %v6414_v20 = vor.u32 %v7335_v16, %v6411_v13 }
 0x688   :  { %4125 = vmatpush.bf16.msrb.mxu1 %v5878_v10  ;;  %4136 = vmatpush.bf16.msrb.mxu2 %v5958_v49  ;;  %v3963_v10 = vadd.f32 %v3962_v12, %v3950_v44  ;;  %v6174_v49 = vor.u32 %v7275_v61, %v6171_v41  ;;  %v7251_v44 = vld [vmem:[%s10451_s3 + $0x2d4] sm:$0xf]  ;;  %v6051_v61 = vld [vmem:[%s10451_s3 + $0x2a8] sm:$0xf0]  ;;  %v7265_v41 = vld [vmem:[%s10451_s3 + $0x344] sm:$0xf] }
 0x689   :  { %4190 = vmatpush.bf16.msrb.mxu3 %v6198_v42  ;;  %v7333_v42 = vld [vmem:[%s10451_s3 + $0x564] sm:$0xf]  ;;  %v6379_v12 = vld [vmem:[%s10451_s3 + $0x538] sm:$0xf0]  ;;  %v6134_v1 = vor.u32 %v7265_v41, %v6131_v56  ;;  %v6595_v56 = vld [vmem:[%s10451_s3 + $0x6e8] sm:$0xf0] }
 0x68a   :  { %v6406_v26 = vor.u32 %v7333_v42, %v6403_v35  ;;  %v6038_v42 = vor.u32 %v7241_v30, %v6035_v52  ;;  %v7381_v41 = vld [vmem:[%s10451_s3 + $0x6e4] sm:$0xf]  ;;  %v6579_v52 = vld [vmem:[%s10451_s3 + $0x6c8] sm:$0xf0] }
 0x68c   :  { %4126 = vmatpush.bf16.msrb.mxu1 %v5870_v38  ;;  %4137 = vmatpush.bf16.msrb.mxu2 %v5950_v63  ;;  %v6166_v38 = vor.u32 %v7273_v60, %v6163_v3  ;;  %v6075_v63 = vld [vmem:[%s10451_s3 + $0x2d8] sm:$0xf0]  ;;  %v7325_v60 = vld [vmem:[%s10451_s3 + $0x524] sm:$0xf]  ;;  %v6371_v3 = vld [vmem:[%s10451_s3 + $0x528] sm:$0xf0] }
 0x68d   :  { %4191 = vmatpush.bf16.msrb.mxu3 %v6190_v62  ;;  %v6078_v50 = vor.u32 %v7251_v44, %v6075_v63  ;;  %v6395_v62 = vld [vmem:[%s10451_s3 + $0x558] sm:$0xf0]  ;;  %v7261_v44 = vld [vmem:[%s10451_s3 + $0x324] sm:$0xf]  ;;  %v6374_v63 = vor.u32 %v7325_v60, %v6371_v3  ;;  %v7295_v3 = vld [vmem:[%s10451_s3 + $0x434] sm:$0xf] }
 0x68e   :  { %v3964_v23 = vpop.f32.mrf.mxu2  ;;  %v6398_v34 = vor.u32 %v7331_v29, %v6395_v62  ;;  %v7321_v29 = vld [vmem:[%s10451_s3 + $0x504] sm:$0xf]  ;;  %v6355_v62 = vld [vmem:[%s10451_s3 + $0x508] sm:$0xf0] }
 0x68f   :  { %v6107_v23 = vld [vmem:[%s10451_s3 + $0x318] sm:$0xf0] }
 0x690   :  { %4127 = vmatpush.bf16.msrb.mxu1 %v5862_v17  ;;  %4138 = vmatpush.bf16.msrb.mxu2 %v5942_v5  ;;  %v6158_v17 = vor.u32 %v7271_v0, %v6155_v4  ;;  %v7249_v5 = vld [vmem:[%s10451_s3 + $0x2c4] sm:$0xf]  ;;  %v7303_v0 = vld [vmem:[%s10451_s3 + $0x474] sm:$0xf]  ;;  %v6283_v4 = vld [vmem:[%s10451_s3 + $0x478] sm:$0xf0] }
 0x691   :  { %4192 = vmatpush.bf16.msrb.mxu3 %v6182_v40 }
 0x694   :  { %4128 = vmatpush.bf16.msrb.mxu1 %v5854_v18  ;;  %4139 = vmatpush.bf16.msrb.mxu2 %v5934_v32  ;;  %v6059_v18 = vld [vmem:[%s10451_s3 + $0x2b8] sm:$0xf0]  ;;  %v7267_v32 = vld [vmem:[%s10451_s3 + $0x354] sm:$0xf] }
 0x695   :  { %4193 = vmatpush.bf16.msrb.mxu3 %v6174_v49  ;;  %v6062_v48 = vor.u32 %v7247_v43, %v6059_v18  ;;  %v6142_v8 = vor.u32 %v7267_v32, %v6139_v33  ;;  %v7263_v49 = vld [vmem:[%s10451_s3 + $0x334] sm:$0xf]  ;;  %v6603_v18 = vld [vmem:[%s10451_s3 + $0x6f8] sm:$0xf0] }
 0x696   :  { %v6126_v13 = vor.u32 %v7263_v49, %v6123_v58  ;;  %v7383_v43 = vld [vmem:[%s10451_s3 + $0x6f4] sm:$0xf]  ;;  %v6587_v58 = vld [vmem:[%s10451_s3 + $0x6d8] sm:$0xf0] }
 0x697   :  { %v7379_v49 = vld [vmem:[%s10451_s3 + $0x6d4] sm:$0xf] }
 0x698   :  { %4129 = vmatpush.bf16.msrb.mxu1 %v5846_v36  ;;  %4140 = vmatpush.bf16.msrb.mxu2 %v5926_v47  ;;  %v3975_v27 = vpop.f32.mrf.mxu1  ;;  %v7327_v47 = vld [vmem:[%s10451_s3 + $0x534] sm:$0xf] }
 0x699   :  { %4194 = vmatpush.bf16.msrb.mxu3 %v6166_v38  ;;  %v3976_v40 = vadd.f32 %v3975_v27, %v3963_v10  ;;  %v6043_v10 = vld [vmem:[%s10451_s3 + $0x298] sm:$0xf0]  ;;  %v6382_v59 = vor.u32 %v7327_v47, %v6379_v12  ;;  %v6115_v38 = vld [vmem:[%s10451_s3 + $0x328] sm:$0xf0]  ;;  %v7297_v12 = vld [vmem:[%s10451_s3 + $0x444] sm:$0xf] }
 0x69a   :  { %v6046_v16 = vor.u32 %v7243_v57, %v6043_v10  ;;  %v6118_v35 = vor.u32 %v7261_v44, %v6115_v38  ;;  %v6099_v27 = vld [vmem:[%s10451_s3 + $0x308] sm:$0xf0]  ;;  %v6598_v10 = vor.u32 %v7381_v41, %v6595_v56 }
 0x69b   :  { %4130 = vmatmul.bf16.vlgmr.msrb.gmra.mxu1 %v8899_v11  ;;  %v6067_v11 = vld [vmem:[%s10451_s3 + $0x2c8] sm:$0xf0] }
 0x69c   :  { %4161 = vmatpush.bf16.msra.mxu1 %v6094_v54  ;;  %4141 = vmatpush.bf16.msrb.mxu2 %v5918_v39  ;;  %v6070_v7 = vor.u32 %v7249_v5, %v6067_v11  ;;  %v7259_v5 = vld [vmem:[%s10451_s3 + $0x314] sm:$0xf]  ;;  %v6339_v57 = vld [vmem:[%s10451_s3 + $0x4e8] sm:$0xf0] }
 0x69d   :  { %4226 = vmatpush.bf16.msra.mxu3 %v6414_v20  ;;  %v7323_v20 = vld [vmem:[%s10451_s3 + $0x514] sm:$0xf] }
 0x69e   :  { %4195 = vmatmul.bf16.vlgmr.msrb.gmra.mxu3 %v9139_v15  ;;  %v7329_v15 = vld [vmem:[%s10451_s3 + $0x544] sm:$0xf] }
 0x69f   :  { %v6390_v36 = vor.u32 %v7329_v15, %v6387_v45  ;;  %v7299_v15 = vld [vmem:[%s10451_s3 + $0x454] sm:$0xf]  ;;  %v6358_v45 = vor.u32 %v7321_v29, %v6355_v62  ;;  %v6563_v29 = vld [vmem:[%s10451_s3 + $0x6a8] sm:$0xf0] }
 0x6a0   :  { %4162 = vmatpush.bf16.msra.mxu1 %v6086_v14  ;;  %4142 = vmatpush.bf16.msrb.mxu2 %v5910_v46  ;;  %v3977_v39 = vpop.f32.mrf.mxu1  ;;  %v4001_v14 = vpop.f32.mrf.mxu3  ;;  %v6363_v46 = vld [vmem:[%s10451_s3 + $0x518] sm:$0xf0] }
 0x6a1   :  { %4227 = vmatpush.bf16.msra.mxu3 %v6406_v26  ;;  %v6366_v19 = vor.u32 %v7323_v20, %v6363_v46  ;;  %v6275_v26 = vld [vmem:[%s10451_s3 + $0x468] sm:$0xf0]  ;;  %v6251_v39 = vld [vmem:[%s10451_s3 + $0x438] sm:$0xf0]  ;;  %v7375_v46 = vld [vmem:[%s10451_s3 + $0x6b4] sm:$0xf] }
 0x6a2   :  { %v6278_v33 = vor.u32 %v7301_v25, %v6275_v26  ;;  %v6254_v44 = vor.u32 %v7295_v3, %v6251_v39  ;;  %v7373_v26 = vld [vmem:[%s10451_s3 + $0x6a4] sm:$0xf]  ;;  %v7347_v3 = vld [vmem:[%s10451_s3 + $0x5d4] sm:$0xf] }
 0x6a3   :  { %4143 = vmatmul.bf16.vlgmr.msrb.gmra.mxu2 %v8941_v37  ;;  %v7245_v37 = vld [vmem:[%s10451_s3 + $0x2a4] sm:$0xf] }
 0x6a4   :  { %4163 = vmatpush.bf16.msra.mxu1 %v6078_v50  ;;  %4174 = vmatpush.bf16.msra.mxu2 %v6158_v17  ;;  %v6054_v54 = vor.u32 %v7245_v37, %v6051_v61  ;;  %v6286_v17 = vor.u32 %v7303_v0, %v6283_v4  ;;  %v6606_v37 = vor.u32 %v7383_v43, %v6603_v18  ;;  %v7313_v0 = vld [vmem:[%s10451_s3 + $0x4c4] sm:$0xf]  ;;  %v6323_v4 = vld [vmem:[%s10451_s3 + $0x4c8] sm:$0xf0] }
 0x6a5   :  { %4228 = vmatpush.bf16.msra.mxu3 %v6398_v34  ;;  %v7257_v34 = vld [vmem:[%s10451_s3 + $0x304] sm:$0xf] }
 0x6a6   :  { %v3988_v50 = vpop.f32.mrf.mxu2  ;;  %v6102_v61 = vor.u32 %v7257_v34, %v6099_v27  ;;  %v7289_v18 = vld [vmem:[%s10451_s3 + $0x404] sm:$0xf]  ;;  %v6307_v34 = vld [vmem:[%s10451_s3 + $0x4a8] sm:$0xf0]  ;;  %v6566_v27 = vor.u32 %v7373_v26, %v6563_v29 }
 0x6a7   :  { %v3989_v11 = vadd.f32 %v3988_v50, %v3976_v40  ;;  %v6267_v40 = vld [vmem:[%s10451_s3 + $0x458] sm:$0xf0]  ;;  %v7361_v26 = vld [vmem:[%s10451_s3 + $0x644] sm:$0xf] }
 0x6a8   :  { %4164 = vmatpush.bf16.msra.mxu1 %v6070_v7  ;;  %4175 = vmatpush.bf16.msra.mxu2 %v6150_v31  ;;  %v6110_v31 = vor.u32 %v7259_v5, %v6107_v23  ;;  %v4003_v32 = vpop.f32.mrf.mxu3  ;;  %v7291_v5 = vld [vmem:[%s10451_s3 + $0x414] sm:$0xf]  ;;  %v6235_v23 = vld [vmem:[%s10451_s3 + $0x418] sm:$0xf0] }
 0x6a9   :  { %4229 = vmatpush.bf16.msra.mxu3 %v6390_v36  ;;  %v9865_v7 = vadd.f32 %v4001_v14, %v3989_v11  ;;  %v6270_v36 = vor.u32 %v7299_v15, %v6267_v40  ;;  %v6590_v14 = vor.u32 %v7379_v49, %v6587_v58  ;;  %v7311_v11 = vld [vmem:[%s10451_s3 + $0x4b4] sm:$0xf]  ;;  %v6227_v32 = vld [vmem:[%s10451_s3 + $0x408] sm:$0xf0]  ;;  %v7452_v49 = vld [vmem:[%s10452_s4 + $0x118] sm:$0xff] }
 0x6aa   :  { %v7351_v15 = vld [vmem:[%s10451_s3 + $0x5f4] sm:$0xf]  ;;  %4978 = vmatpush.bf16.msra.mxu0 %v7452_v49 }
 0x6ab   :  { %v7371_v40 = vld [vmem:[%s10451_s3 + $0x694] sm:$0xf] }
 0x6ac   :  { %4165 = vmatpush.bf16.msra.mxu1 %v6062_v48  ;;  %4176 = vmatpush.bf16.msra.mxu2 %v6142_v8  ;;  %v7319_v48 = vld [vmem:[%s10451_s3 + $0x4f4] sm:$0xf]  ;;  %v6347_v8 = vld [vmem:[%s10451_s3 + $0x4f8] sm:$0xf0] }
 0x6ad   :  { %4230 = vmatpush.bf16.msra.mxu3 %v6382_v59  ;;  %v6350_v47 = vor.u32 %v7319_v48, %v6347_v8  ;;  %v6555_v48 = vld [vmem:[%s10451_s3 + $0x698] sm:$0xf0] }
 0x6b0   :  { %4166 = vmatpush.bf16.msra.mxu1 %v6054_v54  ;;  %4177 = vmatpush.bf16.msra.mxu2 %v6134_v1  ;;  %v3990_v54 = vpop.f32.mrf.mxu2  ;;  %v7317_v1 = vld [vmem:[%s10451_s3 + $0x4e4] sm:$0xf] }
 0x6b1   :  { %4231 = vmatpush.bf16.msra.mxu3 %v6374_v63  ;;  %v6342_v60 = vor.u32 %v7317_v1, %v6339_v57  ;;  %v6243_v63 = vld [vmem:[%s10451_s3 + $0x428] sm:$0xf0]  ;;  %v7349_v54 = vld [vmem:[%s10451_s3 + $0x5e4] sm:$0xf] }
 0x6b2   :  { %v7369_v1 = vld [vmem:[%s10451_s3 + $0x684] sm:$0xf]  ;;  %v6547_v57 = vld [vmem:[%s10451_s3 + $0x688] sm:$0xf0] }
 0x6b3   :  { %v6550_v39 = vor.u32 %v7369_v1, %v6547_v57  ;;  %v6491_v1 = vld [vmem:[%s10451_s3 + $0x618] sm:$0xf0]  ;;  %v7397_v57 = vld [vmem:[%s10451_s3 + $0x764] sm:$0xf] }
 0x6b4   :  { %4167 = vmatpush.bf16.msra.mxu1 %v6046_v16  ;;  %4178 = vmatpush.bf16.msra.mxu2 %v6126_v13  ;;  %v7315_v16 = vld [vmem:[%s10451_s3 + $0x4d4] sm:$0xf]  ;;  %v6331_v13 = vld [vmem:[%s10451_s3 + $0x4d8] sm:$0xf0] }
 0x6b5   :  { %4232 = vmatpush.bf16.msra.mxu3 %v6366_v19  ;;  %v6334_v38 = vor.u32 %v7315_v16, %v6331_v13  ;;  %v6315_v19 = vld [vmem:[%s10451_s3 + $0x4b8] sm:$0xf0]  ;;  %v7367_v13 = vld [vmem:[%s10451_s3 + $0x674] sm:$0xf] }
 0x6b6   :  { %v6318_v43 = vor.u32 %v7311_v11, %v6315_v19  ;;  %v6459_v16 = vld [vmem:[%s10451_s3 + $0x5d8] sm:$0xf0]  ;;  %v7341_v19 = vld [vmem:[%s10451_s3 + $0x5a4] sm:$0xf] }
 0x6b8   :  { %4168 = vmatpush.bf16.msra.mxu1 %v6038_v42  ;;  %4179 = vmatpush.bf16.msra.mxu2 %v6118_v35  ;;  %v9930_v30 = vpop.f32.mrf.mxu1  ;;  %v6571_v42 = vld [vmem:[%s10451_s3 + $0x6b8] sm:$0xf0]  ;;  %v9956_v35 = vpop.f32.mrf.mxu3 }
 0x6b9   :  { %4233 = vmatpush.bf16.msra.mxu3 %v6358_v45  ;;  %v6574_v25 = vor.u32 %v7375_v46, %v6571_v42  ;;  %v6475_v45 = vld [vmem:[%s10451_s3 + $0x5f8] sm:$0xf0]  ;;  %v7343_v46 = vld [vmem:[%s10451_s3 + $0x5b4] sm:$0xf] }
 0x6ba   :  { %v6478_v56 = vor.u32 %v7351_v15, %v6475_v45  ;;  %v6443_v42 = vld [vmem:[%s10451_s3 + $0x5b8] sm:$0xf0]  ;;  %v7337_v45 = vld [vmem:[%s10451_s3 + $0x584] sm:$0xf] }
 0x6bb   :  { %4169 = vmatmul.bf16.vlgmr.msra.gmra.mxu1 %v9019_v22  ;;  %v6259_v22 = vld [vmem:[%s10451_s3 + $0x448] sm:$0xf0] }
 0x6bc   :  { %4200 = vmatpush.bf16.msrb.mxu1 %v6286_v17  ;;  %4180 = vmatpush.bf16.msra.mxu2 %v6110_v31  ;;  %v6262_v59 = vor.u32 %v7297_v12, %v6259_v22  ;;  %v6326_v17 = vor.u32 %v7313_v0, %v6323_v4  ;;  %v6238_v31 = vor.u32 %v7291_v5, %v6235_v23  ;;  %v6467_v22 = vld [vmem:[%s10451_s3 + $0x5e8] sm:$0xf0]  ;;  %v7365_v0 = vld [vmem:[%s10451_s3 + $0x664] sm:$0xf] }
 0x6bd   :  { %4265 = vmatpush.bf16.msrb.mxu3 %v6606_v37  ;;  %v6230_v37 = vor.u32 %v7289_v18, %v6227_v32  ;;  %v6558_v12 = vor.u32 %v7371_v40, %v6555_v48  ;;  %v6470_v58 = vor.u32 %v7349_v54, %v6467_v22  ;;  %v7359_v18 = vld [vmem:[%s10451_s3 + $0x634] sm:$0xf]  ;;  %v6507_v32 = vld [vmem:[%s10451_s3 + $0x638] sm:$0xf0]  ;;  %v6419_v40 = vld [vmem:[%s10451_s3 + $0x588] sm:$0xf0] }
 0x6be   :  { %4234 = vmatmul.bf16.vlgmr.msra.gmra.mxu3 %v9298_v51  ;;  %v7377_v51 = vld [vmem:[%s10451_s3 + $0x6c4] sm:$0xf]  ;;  %v6510_v15 = vor.u32 %v7359_v18, %v6507_v32  ;;  %v7355_v22 = vld [vmem:[%s10451_s3 + $0x614] sm:$0xf] }
 0x6bf   :  { %v6582_v20 = vor.u32 %v7377_v51, %v6579_v52  ;;  %v6462_v52 = vor.u32 %v7347_v3, %v6459_v16  ;;  %v7357_v48 = vld [vmem:[%s10451_s3 + $0x624] sm:$0xf]  ;;  %v6483_v3 = vld [vmem:[%s10451_s3 + $0x608] sm:$0xf0]  ;;  %v7415_v16 = vld [vmem:[%s10451_s3 + $0x7f4] sm:$0xf] }
 0x6c0   :  { %4201 = vmatpush.bf16.msrb.mxu1 %v6278_v33  ;;  %4181 = vmatpush.bf16.msra.mxu2 %v6102_v61  ;;  %v4016_v62 = vpop.f32.mrf.mxu1  ;;  %v7309_v33 = vld [vmem:[%s10451_s3 + $0x4a4] sm:$0xf]  ;;  %v4042_v8 = vpop.f32.mrf.mxu3 }
 0x6c1   :  { %4266 = vmatpush.bf16.msrb.mxu3 %v6598_v10  ;;  %v6310_v61 = vor.u32 %v7309_v33, %v6307_v34  ;;  %v6499_v8 = vld [vmem:[%s10451_s3 + $0x628] sm:$0xf0] }
 0x6c3   :  { %4182 = vmatmul.bf16.vlgmr.msra.gmra.mxu2 %v9091_v24  ;;  %v7293_v24 = vld [vmem:[%s10451_s3 + $0x424] sm:$0xf] }
 0x6c4   :  { %4202 = vmatpush.bf16.msrb.mxu1 %v6270_v36  ;;  %4213 = vmatpush.bf16.msrb.mxu2 %v6350_v47  ;;  %v6246_v50 = vor.u32 %v7293_v24, %v6243_v63  ;;  %v7307_v36 = vld [vmem:[%s10451_s3 + $0x494] sm:$0xf]  ;;  %v6299_v47 = vld [vmem:[%s10451_s3 + $0x498] sm:$0xf0]  ;;  %v6451_v63 = vld [vmem:[%s10451_s3 + $0x5c8] sm:$0xf0] }
 0x6c5   :  { %4267 = vmatpush.bf16.msrb.mxu3 %v6590_v14  ;;  %v6302_v10 = vor.u32 %v7307_v36, %v6299_v47  ;;  %v6539_v14 = vld [vmem:[%s10451_s3 + $0x678] sm:$0xf0]  ;;  %v6502_v36 = vor.u32 %v7357_v48, %v6499_v8  ;;  %v4015_v47 = vadd.f32 %v9930_v30, %v9865_v7  ;;  %v7582_v30 = vmov 8.0  }
 0x6c6   :  { %v10000_v41 = vpop.f32.mrf.mxu2  ;;  %7573 = vrcp.f32 %v7582_v30  ;;  %v6699_v48 = vld [vmem:[%s10451_s3 + $0x7b8] sm:$0xf0] }
 0x6c7   :  { %v4028_v7 = vadd.f32 %v10000_v41, %v4015_v47  ;;  %v7395_v41 = vld [vmem:[%s10451_s3 + $0x754] sm:$0xf] }
 0x6c8   :  { %4203 = vmatpush.bf16.msrb.mxu1 %v6262_v59  ;;  %4214 = vmatpush.bf16.msrb.mxu2 %v6342_v60  ;;  %v7305_v59 = vld [vmem:[%s10451_s3 + $0x484] sm:$0xf]  ;;  %v6291_v60 = vld [vmem:[%s10451_s3 + $0x488] sm:$0xf0] }
 0x6c9   :  { %4268 = vmatpush.bf16.msrb.mxu3 %v6582_v20  ;;  %v6294_v51 = vor.u32 %v7305_v59, %v6291_v60  ;;  %v7353_v60 = vld [vmem:[%s10451_s3 + $0x604] sm:$0xf] }
 0x6cc   :  { %4204 = vmatpush.bf16.msrb.mxu1 %v6254_v44  ;;  %4215 = vmatpush.bf16.msrb.mxu2 %v6334_v38  ;;  %v6542_v44 = vor.u32 %v7367_v13, %v6539_v14  ;;  %v7345_v38 = vld [vmem:[%s10451_s3 + $0x5c4] sm:$0xf]  ;;  %v6731_v13 = vld [vmem:[%s10451_s3 + $0x7f8] sm:$0xf0]  ;;  %v4041_v14 = vadd.f32 %v9956_v35, %v4028_v7  ;;  %v6723_v35 = vld [vmem:[%s10451_s3 + $0x7e8] sm:$0xf0] }
 0x6cd   :  { %4269 = vmatpush.bf16.msrb.mxu3 %v6574_v25  ;;  %v6454_v4 = vor.u32 %v7345_v38, %v6451_v63  ;;  %v6435_v25 = vld [vmem:[%s10451_s3 + $0x5a8] sm:$0xf0]  ;;  %v7393_v63 = vld [vmem:[%s10451_s3 + $0x744] sm:$0xf] }
 0x6ce   :  { %v4029_v24 = vpop.f32.mrf.mxu2  ;;  %v10068_v23 = vpop.f32.mrf.mxu3  ;;  %v6438_v29 = vor.u32 %v7341_v19, %v6435_v25 }
 0x6cf   :  { %v6734_v24 = vor.u32 %v7415_v16, %v6731_v13  ;;  %v7423_v16 = vld [vmem:[%s10452_s4 + $0x30] sm:$0xff] }
 0x6d0   :  { %4205 = vmatpush.bf16.msrb.mxu1 %v6246_v50  ;;  %4216 = vmatpush.bf16.msrb.mxu2 %v6326_v17  ;;  %v7363_v50 = vld [vmem:[%s10451_s3 + $0x654] sm:$0xf]  ;;  %v6523_v17 = vld [vmem:[%s10451_s3 + $0x658] sm:$0xf0] }
 0x6d1   :  { %4270 = vmatpush.bf16.msrb.mxu3 %v6566_v27  ;;  %v6526_v11 = vor.u32 %v7363_v50, %v6523_v17  ;;  %v7391_v17 = vld [vmem:[%s10451_s3 + $0x734] sm:$0xf] }
 0x6d4   :  { %4206 = vmatpush.bf16.msrb.mxu1 %v6238_v31  ;;  %4217 = vmatpush.bf16.msrb.mxu2 %v6318_v43  ;;  %v7339_v31 = vld [vmem:[%s10451_s3 + $0x594] sm:$0xf]  ;;  %v6427_v43 = vld [vmem:[%s10451_s3 + $0x598] sm:$0xf0] }
 0x6d5   :  { %4271 = vmatpush.bf16.msrb.mxu3 %v6558_v12  ;;  %v6430_v27 = vor.u32 %v7339_v31, %v6427_v43  ;;  %v7389_v31 = vld [vmem:[%s10451_s3 + $0x724] sm:$0xf]  ;;  %v6627_v43 = vld [vmem:[%s10451_s3 + $0x728] sm:$0xf0] }
 0x6d6   :  { %v4081_v33 = vpop.f32.mrf.mxu3 }
 0x6d8   :  { %4207 = vmatpush.bf16.msrb.mxu1 %v6230_v37  ;;  %4218 = vmatpush.bf16.msrb.mxu2 %v6310_v61  ;;  %v4053_v5 = vpop.f32.mrf.mxu1  ;;  %v7399_v37 = vld [vmem:[%s10451_s3 + $0x774] sm:$0xf]  ;;  %v6667_v61 = vld [vmem:[%s10451_s3 + $0x778] sm:$0xf0] }
 0x6d9   :  { %4272 = vmatpush.bf16.msrb.mxu3 %v6550_v39  ;;  %v6670_v54 = vor.u32 %v7399_v37, %v6667_v61  ;;  %v6651_v39 = vld [vmem:[%s10451_s3 + $0x758] sm:$0xf0] }
 0x6da   :  { %v6654_v38 = vor.u32 %v7395_v41, %v6651_v39  ;;  %v7403_v41 = vld [vmem:[%s10451_s3 + $0x794] sm:$0xf]  ;;  %v6683_v39 = vld [vmem:[%s10451_s3 + $0x798] sm:$0xf0] }
 0x6db   :  { %4208 = vmatmul.bf16.vlgmr.msrb.gmra.mxu1 %v9118_v21  ;;  %v6531_v21 = vld [vmem:[%s10451_s3 + $0x668] sm:$0xf0] }
 0x6dc   :  { %4239 = vmatpush.bf16.msra.mxu1 %v6478_v56  ;;  %4219 = vmatpush.bf16.msrb.mxu2 %v6302_v10  ;;  %v6534_v20 = vor.u32 %v7365_v0, %v6531_v21  ;;  %v6422_v56 = vor.u32 %v7337_v45, %v6419_v40  ;;  %v6659_v10 = vld [vmem:[%s10451_s3 + $0x768] sm:$0xf0]  ;;  %v6619_v45 = vld [vmem:[%s10451_s3 + $0x718] sm:$0xf0]  ;;  %v7407_v40 = vld [vmem:[%s10451_s3 + $0x7b4] sm:$0xf] }
 0x6dd   :  { %4273 = vmatmul.bf16.vlgmr.msrb.gmra.mxu3 %v9460_v6  ;;  %v6446_v6 = vor.u32 %v7343_v46, %v6443_v42  ;;  %v6662_v59 = vor.u32 %v7397_v57, %v6659_v10  ;;  %v6643_v21 = vld [vmem:[%s10451_s3 + $0x748] sm:$0xf0]  ;;  %v6702_v47 = vor.u32 %v7407_v40, %v6699_v48  ;;  %v7424_v57 = vld [vmem:[%s10452_s4 + $0x38] sm:$0xff] }
 0x6de   :  { %v6646_v42 = vor.u32 %v7393_v63, %v6643_v21  ;;  %4922 = vmatpush.bf16.msra.mxu3 %v7424_v57  ;;  %v7434_v48 = vld [vmem:[%s10452_s4 + $0x88] sm:$0xff] }
 0x6e0   :  { %4240 = vmatpush.bf16.msra.mxu1 %v6470_v58  ;;  %4220 = vmatpush.bf16.msrb.mxu2 %v6294_v51  ;;  %v4055_v34 = vpop.f32.mrf.mxu1  ;;  %v6494_v58 = vor.u32 %v7355_v22, %v6491_v1  ;;  %v6486_v51 = vor.u32 %v7353_v60, %v6483_v3  ;;  %v7405_v22 = vld [vmem:[%s10451_s3 + $0x7a4] sm:$0xf]  ;;  %v6691_v1 = vld [vmem:[%s10451_s3 + $0x7a8] sm:$0xf0] }
 0x6e1   :  { %v10127_v49 = vpop.f32.mrf.mxu3  ;;  %v6630_v34 = vor.u32 %v7389_v31, %v6627_v43  ;;  %v6694_v60 = vor.u32 %v7405_v22, %v6691_v1  ;;  %v7449_v43 = vld [vmem:[%s10452_s4 + $0x100] sm:$0xff] }
 0x6e2   :  { %4923 = vmatpush.bf16.msra.mxu3 %v7423_v16  ;;  %v10305_v22 = vld [vmem:[%s10447_s7 + $0x5] ss:$8 sm:$0x3] }
 0x6e3   :  { %4221 = vmatmul.bf16.vlgmr.msrb.gmra.mxu2 %v9240_v55  ;;  %v6515_v55 = vld [vmem:[%s10451_s3 + $0x648] sm:$0xf0] }
 0x6e4   :  { %4241 = vmatpush.bf16.msra.mxu1 %v6462_v52  ;;  %4252 = vmatpush.bf16.msra.mxu2 %v6542_v44  ;;  %v6518_v62 = vor.u32 %v7361_v26, %v6515_v55  ;;  %v7574_v52 = vpop.eup %7573  ;;  %v4054_v44 = vadd.f32 %v4053_v5, %v4041_v14  ;;  %v6635_v5 = vld [vmem:[%s10451_s3 + $0x738] sm:$0xf0]  ;;  %v7470_v16 = vld [vmem:[%s10452_s4 + $0x1a8] sm:$0xff] }
 0x6e5   :  { %v4321_v46 = vmul.f32 8.0, %v7574_v52  ;;  %vm4325_vm10 = vweird.f32 %v7574_v52 }
 0x6e6   :  { %v4066_v12 = vpop.f32.mrf.mxu2 }
 0x6e7   :  { %v4322_v26 = vsub.f32 1.0, %v4321_v46 }
 0x6e8   :  { %4242 = vmatpush.bf16.msra.mxu1 %v6454_v4  ;;  %4253 = vmatpush.bf16.msra.mxu2 %v6534_v20  ;;  %v4067_v4 = vadd.f32 %v4066_v12, %v4054_v44  ;;  %v7385_v12 = vld [vmem:[%s10451_s3 + $0x704] sm:$0xf] }
 0x6e9   :  { %v4120_v20 = vpop.f32.mrf.mxu3  ;;  %v4323_v32 = vmul.f32 %v7574_v52, %v4322_v26  ;;  %v7401_v44 = vld [vmem:[%s10451_s3 + $0x784] sm:$0xf] }
 0x6ea   :  { %v4080_v19 = vadd.f32 %v10068_v23, %v4067_v4  ;;  %v6707_v23 = vld [vmem:[%s10451_s3 + $0x7c8] sm:$0xf0]  ;;  %v7421_v4 = vld [vmem:[%s10452_s4 + $0x20] sm:$0xff] }
 0x6eb   :  { %v4324_v37 = vadd.f32 %v7574_v52, %v4323_v32 }
 0x6ec   :  { %4243 = vmatpush.bf16.msra.mxu1 %v6446_v6  ;;  %4254 = vmatpush.bf16.msra.mxu2 %v6526_v11  ;;  %v7411_v6 = vld [vmem:[%s10451_s3 + $0x7d4] sm:$0xf]  ;;  %v6715_v11 = vld [vmem:[%s10451_s3 + $0x7d8] sm:$0xf0] }
 0x6ed   :  { %v10214_v7 = vsel %vm4325_vm10, %v7574_v52, %v4324_v37  ;;  %v6686_v52 = vor.u32 %v7403_v41, %v6683_v39 }
 0x6ee   :  { %v4068_v0 = vpop.f32.mrf.mxu2 }
 0x6f0   :  { %4244 = vmatpush.bf16.msra.mxu1 %v6438_v29  ;;  %4255 = vmatpush.bf16.msra.mxu2 %v6518_v62  ;;  %v6638_v29 = vor.u32 %v7391_v17, %v6635_v5  ;;  %v6718_v62 = vor.u32 %v7411_v6, %v6715_v11  ;;  %v7419_v6 = vld [vmem:[%s10452_s4 + $0x10] sm:$0xff] }
 0x6f1   :  { %v7451_v11 = vld [vmem:[%s10452_s4 + $0x110] sm:$0xff] }
 0x6f2   :  { %4979 = vmatpush.bf16.msra.mxu0 %v7451_v11 }
 0x6f4   :  { %4245 = vmatpush.bf16.msra.mxu1 %v6430_v27  ;;  %4256 = vmatpush.bf16.msra.mxu2 %v6510_v15  ;;  %v7387_v15 = vld [vmem:[%s10451_s3 + $0x714] sm:$0xf] }
 0x6f8   :  { %4246 = vmatpush.bf16.msra.mxu1 %v6422_v56  ;;  %4257 = vmatpush.bf16.msra.mxu2 %v6502_v36  ;;  %v4092_v25 = vpop.f32.mrf.mxu1  ;;  %v6622_v36 = vor.u32 %v7387_v15, %v6619_v45 }
 0x6f9   :  { %v4093_v55 = vadd.f32 %v4092_v25, %v4080_v19  ;;  %v7438_v25 = vld [vmem:[%s10452_s4 + $0xa8] sm:$0xff] }
 0x6fb   :  { %4247 = vmatmul.bf16.vlgmr.msra.gmra.mxu1 %v9242_v2  ;;  %v7413_v2 = vld [vmem:[%s10451_s3 + $0x7e4] sm:$0xf]  ;;  %v4308_v18 = vrot.slane %v4093_v55, 4 }
 0x6fc   :  { %4278 = vmatpush.bf16.msrb.mxu1 %v6670_v54  ;;  %4258 = vmatpush.bf16.msra.mxu2 %v6494_v58  ;;  %v6726_v50 = vor.u32 %v7413_v2, %v6723_v35  ;;  %v6611_v54 = vld [vmem:[%s10451_s3 + $0x708] sm:$0xf0]  ;;  %v7440_v35 = vld [vmem:[%s10452_s4 + $0xb8] sm:$0xff] }
 0x6fd   :  { %v4309_v33 = vadd.f32 %v4308_v18, %v4093_v55  ;;  %v7436_v18 = vld [vmem:[%s10452_s4 + $0x98] sm:$0xff] }
 0x6ff   :  { %v4310_v8 = vrot.slane %v4309_v33, 2 }
 0x700   :  { %4279 = vmatpush.bf16.msrb.mxu1 %v6662_v59  ;;  %4259 = vmatpush.bf16.msra.mxu2 %v6486_v51  ;;  %v4094_v61 = vpop.f32.mrf.mxu1  ;;  %v6614_v59 = vor.u32 %v7385_v12, %v6611_v54  ;;  %v7472_v54 = vld [vmem:[%s10452_s4 + $0x1b8] sm:$0xff] }
 0x701   :  { %v4311_v56 = vadd.f32 %v4310_v8, %v4309_v33  ;;  %v10216_v58 = vpop.f32.mrf.mxu3  ;;  %v7435_v33 = vld [vmem:[%s10452_s4 + $0x90] sm:$0xff]  ;;  %v10294_v61 = vld [vmem:[%s10447_s7 + $0x4] ss:$8 sm:$0x3] }
 0x702   :  { %v4372_v57 = vperm.slane %v10294_v61, 0 }
 0x703   :  { %4260 = vmatmul.bf16.vlgmr.msra.gmra.mxu2 %v9407_v28  ;;  %v7409_v28 = vld [vmem:[%s10451_s3 + $0x7c4] sm:$0xf]  ;;  %v4312_v10 = vrot.slane %v4311_v56, 1 }
 0x704   :  { %4280 = vmatpush.bf16.msrb.mxu1 %v6654_v38  ;;  %4291 = vmatpush.bf16.msrb.mxu2 %v6734_v24  ;;  %v6710_v27 = vor.u32 %v7409_v28, %v6707_v23  ;;  %v6675_v38 = vld [vmem:[%s10451_s3 + $0x788] sm:$0xf0]  ;;  %v7417_v28 = vld [vmem:[%s10452_s4] sm:$0xff] }
 0x705   :  { %v4313_v30 = vadd.f32 %v4312_v10, %v4311_v56  ;;  %v7422_v24 = vld [vmem:[%s10452_s4 + $0x28] sm:$0xff]  ;;  %v6678_v21 = vor.u32 %v7401_v44, %v6675_v38  ;;  %v7469_v44 = vld [vmem:[%s10452_s4 + $0x1a0] sm:$0xff] }
 0x706   :  { %v4105_v3 = vpop.f32.mrf.mxu2  ;;  %4924 = vmatpush.bf16.msra.mxu3 %v7422_v24 }
 0x707   :  { %v4327_v13 = vmul.f32 %v10214_v7, %v4313_v30  ;;  %v4119_v14 = vadd.f32 %v10127_v49, %v4105_v3 }
 0x708   :  { %4281 = vmatpush.bf16.msrb.mxu1 %v6646_v42  ;;  %4292 = vmatpush.bf16.msrb.mxu2 %v6726_v50  ;;  %v7420_v42 = vld [vmem:[%s10452_s4 + $0x18] sm:$0xff] }
 0x709   :  { %v10229_v51 = vsub.f32 %v4093_v55, %v4327_v13  ;;  %v4159_v0 = vpop.f32.mrf.mxu3  ;;  %v7418_v55 = vld [vmem:[%s10452_s4 + $0x8] sm:$0xff] }
 0x70a   :  { %4925 = vmatpush.bf16.msra.mxu3 %v7421_v4 }
 0x70b   :  { %v4331_v49 = vmul.f32 %v10229_v51, %v10229_v51 }
 0x70c   :  { %4282 = vmatpush.bf16.msrb.mxu1 %v6638_v29  ;;  %4293 = vmatpush.bf16.msrb.mxu2 %v6718_v62  ;;  %v7437_v62 = vld [vmem:[%s10452_s4 + $0xa0] sm:$0xff] }
 0x70d   :  { %v4333_v63 = vrot.slane %v4331_v49, 4 }
 0x70e   :  { %v4107_v2 = vpop.f32.mrf.mxu2  ;;  %4926 = vmatpush.bf16.msra.mxu3 %v7420_v42  ;;  %v7465_v42 = vld [vmem:[%s10452_s4 + $0x180] sm:$0xff] }
 0x70f   :  { %v4334_v20 = vadd.f32 %v4333_v63, %v4331_v49  ;;  %v7468_v63 = vld [vmem:[%s10452_s4 + $0x198] sm:$0xff]  ;;  %v7467_v2 = vld [vmem:[%s10452_s4 + $0x190] sm:$0xff] }
 0x710   :  { %4283 = vmatpush.bf16.msrb.mxu1 %v6630_v34  ;;  %4294 = vmatpush.bf16.msrb.mxu2 %v6710_v27 }
 0x711   :  { %v4335_v46 = vrot.slane %v4334_v20, 2 }
 0x712   :  { %4927 = vmatpush.bf16.msra.mxu3 %v7419_v6 }
 0x713   :  { %v4336_v50 = vadd.f32 %v4335_v46, %v4334_v20  ;;  %v7466_v20 = vld [vmem:[%s10452_s4 + $0x188] sm:$0xff] }
 0x714   :  { %4284 = vmatpush.bf16.msrb.mxu1 %v6622_v36  ;;  %4295 = vmatpush.bf16.msrb.mxu2 %v6702_v47  ;;  %v7433_v47 = vld [vmem:[%s10452_s4 + $0x80] sm:$0xff] }
 0x715   :  { %v4337_v17 = vrot.slane %v4336_v50, 1 }
 0x716   :  { %4928 = vmatpush.bf16.msra.mxu3 %v7418_v55 }
 0x717   :  { %v4338_v26 = vadd.f32 %v4337_v17, %v4336_v50 }
 0x718   :  { %4285 = vmatpush.bf16.msrb.mxu1 %v6614_v59  ;;  %4296 = vmatpush.bf16.msrb.mxu2 %v6694_v60  ;;  %v4131_v5 = vpop.f32.mrf.mxu1  ;;  %v7471_v59 = vld [vmem:[%s10452_s4 + $0x1b0] sm:$0xff] }
 0x719   :  { %v4132_v19 = vadd.f32 %v4131_v5, %v4119_v14  ;;  %v4345_v29 = vmul.f32 %v4338_v26, %v10214_v7 }
 0x71a   :  { %4929 = vmatpush.bf16.msra.mxu3 %v7417_v28 }
 0x71b   :  { %4286 = vmatmul.bf16.vlgmr.msrb.gmra.mxu1 %v9378_v9  ;;  %v7439_v9 = vld [vmem:[%s10452_s4 + $0xb0] sm:$0xff]  ;;  %v4347_v31 = vadd.f32 1e-05, %v4345_v29 }
 0x71c   :  { %4297 = vmatpush.bf16.msrb.mxu2 %v6686_v52 }
 0x71d   :  { %7575 = vrsqrt.f32 %v4347_v31  ;;  %vm4355_vm12 = vweird.f32 %v4347_v31 }
 0x720   :  { %4298 = vmatpush.bf16.msrb.mxu2 %v6678_v21  ;;  %v4133_v23 = vpop.f32.mrf.mxu1 }
 0x721   :  { %v4196_v32 = vpop.f32.mrf.mxu3 }
 0x723   :  { %4299 = vmatmul.bf16.vlgmr.msrb.gmra.mxu2 %v9560_v53  ;;  %v7450_v53 = vld [vmem:[%s10452_s4 + $0x108] sm:$0xff]  ;;  %v7576_v34 = vpop.eup %7575 }
 0x724   :  { %4948 = vmatpush.bf16.msra.mxu2 %v7440_v35  ;;  %4980 = vmatpush.bf16.msra.mxu0 %v7450_v53  ;;  %v4350_v15 = vmul.f32 %v7576_v34, %v4347_v31  ;;  %vm4356_vm11 = vweird.f32 %v7576_v34 }
 0x725   :  { %vm4357_vm13 = vmor %vm4355_vm12, %vm4356_vm11 }
 0x726   :  { %v4144_v27 = vpop.f32.mrf.mxu2  ;;  %v4351_v40 = vmul.f32 %v7576_v34, %v4350_v15 }
 0x727   :  { %v4145_v45 = vadd.f32 %v4144_v27, %v4132_v19  ;;  %v7432_v27 = vld [vmem:[%s10452_s4 + $0x78] sm:$0xff] }
 0x728   :  { %4949 = vmatpush.bf16.msra.mxu2 %v7439_v9  ;;  %4981 = vmatpush.bf16.msra.mxu0 %v7449_v43  ;;  %v4352_v37 = vmul.f32 0.5, %v4351_v40 }
 0x729   :  { %v4158_v8 = vadd.f32 %v10216_v58, %v4145_v45  ;;  %v4198_v36 = vpop.f32.mrf.mxu3  ;;  %v4379_v58 = vperm.slane %v10305_v22, 0  ;;  %4935 = vmatpush.bf16.msra.mxu1 %v7432_v27  ;;  %v7448_v45 = vld [vmem:[%s10452_s4 + $0xf8] sm:$0xff] }
 0x72a   :  { %v4353_v56 = vsub.f32 1.5, %v4352_v37  ;;  %4961 = vmatpush.bf16.msrb.mxu3 %v7448_v45  ;;  %v4373_v45 = vperm.slane %v10294_v61, 1 }
 0x72c   :  { %4950 = vmatpush.bf16.msra.mxu2 %v7438_v25  ;;  %v4354_v1 = vmul.f32 %v7576_v34, %v4353_v56  ;;  %v7447_v56 = vld [vmem:[%s10452_s4 + $0xf0] sm:$0xff] }
 0x72e   :  { %v4146_v12 = vpop.f32.mrf.mxu2  ;;  %v4358_v10 = vsel %vm4357_vm13, %v7576_v34, %v4354_v1  ;;  %4962 = vmatpush.bf16.msrb.mxu3 %v7447_v56 }
 0x72f   :  { %v4369_v30 = vmul.f32 %v4358_v10, %v10229_v51  ;;  %v7429_v10 = vld [vmem:[%s10452_s4 + $0x60] sm:$0xff] }
 0x730   :  { %4951 = vmatpush.bf16.msra.mxu2 %v7437_v62 }
 0x731   :  { %v4376_v60 = vmul.f32 %v4372_v57, %v4369_v30 }
 0x733   :  { %v4383_v41 = vadd.f32 %v4379_v58, %v4376_v60  ;;  %v7445_v58 = vld [vmem:[%s10452_s4 + $0xe0] sm:$0xff]  ;;  %v7428_v60 = vld [vmem:[%s10452_s4 + $0x58] sm:$0xff] }
 0x734   :  { %4952 = vmatpush.bf16.msra.mxu2 %v7436_v18 }
 0x735   :  { %v4385_v13 = vmax.f32 %v4383_v41, 0.0  ;;  %v7444_v41 = vld [vmem:[%s10452_s4 + $0xd8] sm:$0xff] }
 0x737   :  { %v4401_v14 = vpack.c.bf16 %v4385_v13, %v4385_v13  ;;  %v4389_v51 = vrot.slane %v4385_v13, 2  ;;  %v4393_v52 = vrot.slane %v4385_v13, 4  ;;  %v4397_v50 = vrot.slane %v4385_v13, 6 }
 0x738   :  { %4953 = vmatpush.bf16.msra.mxu2 %v7435_v33  ;;  %v4170_v3 = vpop.f32.mrf.mxu1 }
 0x739   :  { %v4171_v39 = vadd.f32 %v4170_v3, %v4158_v8  ;;  %4930 = vmatmul.bf16.vlgmr.msra.gmra.mxu3 %v4401_v14  ;;  %v4403_v38 = vpack.c.bf16 %v4389_v51, %v4389_v51  ;;  %v4405_v24 = vpack.c.bf16 %v4393_v52, %v4393_v52  ;;  %v4407_v17 = vpack.c.bf16 %v4397_v50, %v4397_v50  ;;  %v7431_v8 = vld [vmem:[%s10452_s4 + $0x70] sm:$0xff]  ;;  %v7426_v52 = vld [vmem:[%s10452_s4 + $0x48] sm:$0xff] }
 0x73a   :  { %4936 = vmatpush.bf16.msra.mxu1 %v7431_v8  ;;  %v7443_v14 = vld [vmem:[%s10452_s4 + $0xd0] sm:$0xff] }
 0x73b   :  { %4982 = vmatmul.bf16.vlgmr.msra.gmra.mxu0 %v4405_v24 }
 0x73c   :  { %4954 = vmatpush.bf16.msra.mxu2 %v7434_v48 }
 0x740   :  { %4955 = vmatpush.bf16.msra.mxu2 %v7433_v47  ;;  %v4172_v49 = vpop.f32.mrf.mxu1  ;;  %v7430_v47 = vld [vmem:[%s10452_s4 + $0x68] sm:$0xff] }
 0x741   :  { %v4235_v0 = vpop.f32.mrf.mxu3  ;;  %4937 = vmatpush.bf16.msra.mxu1 %v7430_v47  ;;  %v7425_v49 = vld [vmem:[%s10452_s4 + $0x40] sm:$0xff] }
 0x743   :  { %4956 = vmatmul.bf16.vlgmr.msra.gmra.mxu2 %v4403_v38  ;;  %v7442_v38 = vld [vmem:[%s10452_s4 + $0xc8] sm:$0xff] }
 0x744   :  { %5000 = vmatpush.bf16.msrb.mxu2 %v7472_v54  ;;  %v7446_v54 = vld [vmem:[%s10452_s4 + $0xe8] sm:$0xff] }
 0x745   :  { %4963 = vmatpush.bf16.msrb.mxu3 %v7446_v54  ;;  %4938 = vmatpush.bf16.msra.mxu1 %v7429_v10 }
 0x746   :  { %v4183_v21 = vpop.f32.mrf.mxu2 }
 0x747   :  { %v4184_v35 = vadd.f32 %v4183_v21, %v4171_v39  ;;  %v7441_v21 = vld [vmem:[%s10452_s4 + $0xc0] sm:$0xff] }
 0x748   :  { %5001 = vmatpush.bf16.msrb.mxu2 %v7471_v59 }
 0x749   :  { %v4197_v4 = vadd.f32 %v4196_v32, %v4184_v35  ;;  %v4237_v46 = vpop.f32.mrf.mxu3  ;;  %4964 = vmatpush.bf16.msrb.mxu3 %v7445_v58  ;;  %4939 = vmatpush.bf16.msra.mxu1 %v7428_v60 }
 0x74c   :  { %5002 = vmatpush.bf16.msrb.mxu2 %v7470_v16  ;;  %v7427_v16 = vld [vmem:[%s10452_s4 + $0x50] sm:$0xff] }
 0x74d   :  { %4965 = vmatpush.bf16.msrb.mxu3 %v7444_v41  ;;  %4940 = vmatpush.bf16.msra.mxu1 %v7427_v16 }
 0x74e   :  { %v4185_v9 = vpop.f32.mrf.mxu2 }
 0x74f   :  { %v7462_v9 = vld [vmem:[%s10452_s4 + $0x168] sm:$0xff] }
 0x750   :  { %5003 = vmatpush.bf16.msrb.mxu2 %v7469_v44 }
 0x751   :  { %4966 = vmatpush.bf16.msrb.mxu3 %v7443_v14  ;;  %4941 = vmatpush.bf16.msra.mxu1 %v7426_v52 }
 0x754   :  { %5004 = vmatpush.bf16.msrb.mxu2 %v7468_v63  ;;  %v7464_v63 = vld [vmem:[%s10452_s4 + $0x178] sm:$0xff] }
 0x755   :  { %4967 = vmatpush.bf16.msrb.mxu3 %v7442_v38  ;;  %4942 = vmatpush.bf16.msra.mxu1 %v7425_v49 }
 0x758   :  { %5005 = vmatpush.bf16.msrb.mxu2 %v7467_v2  ;;  %v4209_v5 = vpop.f32.mrf.mxu1  ;;  %v7480_v2 = vld [vmem:[%s10452_s4 + $0x1f8] sm:$0xff] }
 0x759   :  { %v4210_v11 = vadd.f32 %v4209_v5, %v4197_v4  ;;  %4987 = vmatpush.bf16.msrb.mxu1 %v7464_v63  ;;  %4968 = vmatpush.bf16.msrb.mxu3 %v7441_v21  ;;  %v7463_v4 = vld [vmem:[%s10452_s4 + $0x170] sm:$0xff] }
 0x75c   :  { %5006 = vmatpush.bf16.msrb.mxu2 %v7466_v20  ;;  %v7479_v20 = vld [vmem:[%s10452_s4 + $0x1f0] sm:$0xff] }
 0x75d   :  { %5013 = vmatpush.bf16.msra.mxu3 %v7480_v2  ;;  %4988 = vmatpush.bf16.msrb.mxu1 %v7463_v4 }
 0x760   :  { %5007 = vmatpush.bf16.msrb.mxu2 %v7465_v42  ;;  %v4211_v6 = vpop.f32.mrf.mxu1  ;;  %v4274_v19 = vpop.f32.mrf.mxu3 }
 0x761   :  { %5014 = vmatpush.bf16.msra.mxu3 %v7479_v20  ;;  %4989 = vmatpush.bf16.msrb.mxu1 %v7462_v9  ;;  %v7461_v6 = vld [vmem:[%s10452_s4 + $0x160] sm:$0xff] }
 0x763   :  { %5008 = vmatmul.bf16.vlgmr.msrb.gmra.mxu2 %v4407_v17  ;;  %v7478_v17 = vld [vmem:[%s10452_s4 + $0x1e8] sm:$0xff] }
 0x765   :  { %5015 = vmatpush.bf16.msra.mxu3 %v7478_v17  ;;  %4990 = vmatpush.bf16.msrb.mxu1 %v7461_v6 }
 0x766   :  { %v4222_v25 = vpop.f32.mrf.mxu2 }
 0x767   :  { %v4223_v26 = vadd.f32 %v4222_v25, %v4210_v11  ;;  %v7460_v25 = vld [vmem:[%s10452_s4 + $0x158] sm:$0xff] }
 0x768   :  { %v4276_v55 = vpop.f32.mrf.mxu3 }
 0x769   :  { %v4236_v53 = vadd.f32 %v4235_v0, %v4223_v26  ;;  %4991 = vmatpush.bf16.msrb.mxu1 %v7460_v25 }
 0x76e   :  { %v4224_v29 = vpop.f32.mrf.mxu2 }
 0x778   :  { %v4248_v62 = vpop.f32.mrf.mxu1 }
 0x779   :  { %v4249_v18 = vadd.f32 %v4248_v62, %v4236_v53  ;;  %v7476_v53 = vld [vmem:[%s10452_s4 + $0x1d8] sm:$0xff]  ;;  %v7459_v62 = vld [vmem:[%s10452_s4 + $0x150] sm:$0xff] }
 0x77a   :  { %4992 = vmatpush.bf16.msrb.mxu1 %v7459_v62 }
 0x780   :  { %v4250_v31 = vpop.f32.mrf.mxu1 }
 0x786   :  { %v4261_v43 = vpop.f32.mrf.mxu2 }
 0x787   :  { %v4262_v32 = vadd.f32 %v4261_v43, %v4249_v18 }
 0x789   :  { %v4275_v34 = vadd.f32 %v4274_v19, %v4262_v32  ;;  %v7458_v32 = vld [vmem:[%s10452_s4 + $0x148] sm:$0xff] }
 0x78a   :  { %4993 = vmatpush.bf16.msrb.mxu1 %v7458_v32 }
 0x78e   :  { %v4263_v28 = vpop.f32.mrf.mxu2 }
 0x78f   :  { %v7475_v28 = vld [vmem:[%s10452_s4 + $0x1d0] sm:$0xff] }
 0x798   :  { %v4287_v23 = vpop.f32.mrf.mxu1 }
 0x799   :  { %v4288_v15 = vadd.f32 %v4287_v23, %v4275_v34  ;;  %v7474_v34 = vld [vmem:[%s10452_s4 + $0x1c8] sm:$0xff] }
 0x7a0   :  { %v4289_v33 = vpop.f32.mrf.mxu1 }
 0x7a6   :  { %v4300_v40 = vpop.f32.mrf.mxu2 }
 0x7a7   :  { %v4301_v48 = vadd.f32 %v4300_v40, %v4288_v15  ;;  %v7457_v15 = vld [vmem:[%s10452_s4 + $0x140] sm:$0xff] }
 0x7a8   :  { %4994 = vmatpush.bf16.msrb.mxu1 %v7457_v15 }
 0x7a9   :  { %v4314_v37 = vrot.slane %v4301_v48, 4 }
 0x7ab   :  { %v4315_v36 = vadd.f32 %v4314_v37, %v4301_v48  ;;  %v4380_v37 = vperm.slane %v10305_v22, 1  ;;  %v4537_v22 = vld [vmem:[%s10447_s7 + $0x6] ss:$0 sm:$0xff] }
 0x7ad   :  { %v4316_v12 = vrot.slane %v4315_v36, 2 }
 0x7ae   :  { %v4302_v1 = vpop.f32.mrf.mxu2 }
 0x7af   :  { %v4317_v57 = vadd.f32 %v4316_v12, %v4315_v36 }
 0x7b1   :  { %v4318_v30 = vrot.slane %v4317_v57, 1 }
 0x7b3   :  { %v4319_v59 = vadd.f32 %v4318_v30, %v4317_v57 }
 0x7b5   :  { %v4328_v3 = vmul.f32 %v10214_v7, %v4319_v59 }
 0x7b7   :  { %v10362_v39 = vsub.f32 %v4301_v48, %v4328_v3  ;;  %v7473_v48 = vld [vmem:[%s10452_s4 + $0x1c0] sm:$0xff] }
 0x7b8   :  { %v10400_v50 = vpop.f32.mrf.mxu0 }
 0x7b9   :  { %v4332_v13 = vmul.f32 %v10362_v39, %v10362_v39 }
 0x7bb   :  { %v4339_v51 = vrot.slane %v4332_v13, 4 }
 0x7bc   :  { %v4931_v11 = vpop.f32.mrf.mxu3 }
 0x7bd   :  { %v4340_v44 = vadd.f32 %v4339_v51, %v4332_v13  ;;  %v4932_v3 = vadd.f32 %v4931_v11, %v4537_v22 }
 0x7bf   :  { %v4341_v24 = vrot.slane %v4340_v44, 2 }
 0x7c0   :  { %v4985_v26 = vpop.f32.mrf.mxu0 }
 0x7c1   :  { %v4342_v0 = vadd.f32 %v4341_v24, %v4340_v44 }
 0x7c3   :  { %v4343_v35 = vrot.slane %v4342_v0, 1 }
 0x7c4   :  { %v4933_v31 = vpop.f32.mrf.mxu3 }
 0x7c5   :  { %v4344_v46 = vadd.f32 %v4343_v35, %v4342_v0 }
 0x7c6   :  { %v4957_v19 = vpop.f32.mrf.mxu2 }
 0x7c7   :  { %v4346_v42 = vmul.f32 %v4344_v46, %v10214_v7  ;;  %v7477_v7 = vld [vmem:[%s10452_s4 + $0x1e0] sm:$0xff] }
 0x7c8   :  { %5016 = vmatpush.bf16.msra.mxu3 %v7477_v7 }
 0x7c9   :  { %v4348_v5 = vadd.f32 1e-05, %v4346_v42 }
 0x7cb   :  { %7577 = vrsqrt.f32 %v4348_v5  ;;  %vm4365_vm15 = vweird.f32 %v4348_v5 }
 0x7cc   :  { %5017 = vmatpush.bf16.msra.mxu3 %v7476_v53 }
 0x7ce   :  { %v4959_v23 = vpop.f32.mrf.mxu2 }
 0x7d0   :  { %5018 = vmatpush.bf16.msra.mxu3 %v7475_v28 }
 0x7d1   :  { %v7578_v55 = vpop.eup %7577 }
 0x7d2   :  { %v4360_v29 = vmul.f32 %v7578_v55, %v4348_v5  ;;  %vm4366_vm14 = vweird.f32 %v7578_v55 }
 0x7d3   :  { %vm4367_vm0 = vmor %vm4365_vm15, %vm4366_vm14 }
 0x7d4   :  { %v4361_v43 = vmul.f32 %v7578_v55, %v4360_v29  ;;  %5019 = vmatpush.bf16.msra.mxu3 %v7474_v34 }
 0x7d6   :  { %v4362_v18 = vmul.f32 0.5, %v4361_v43 }
 0x7d8   :  { %v4363_v33 = vsub.f32 1.5, %v4362_v18  ;;  %5020 = vmatpush.bf16.msra.mxu3 %v7473_v48 }
 0x7da   :  { %v4364_v27 = vmul.f32 %v7578_v55, %v4363_v33 }
 0x7dc   :  { %v4368_v40 = vsel %vm4367_vm0, %v7578_v55, %v4364_v27 }
 0x7dd   :  { %v4370_v8 = vmul.f32 %v4368_v40, %v10362_v39 }
 0x7df   :  { %v4377_v56 = vmul.f32 %v4373_v45, %v4370_v8 }
 0x7e1   :  { %v4384_v36 = vadd.f32 %v4380_v37, %v4377_v56 }
 0x7e3   :  { %v4386_v12 = vmax.f32 %v4384_v36, 0.0 }
 0x7e5   :  { %v4402_v54 = vpack.c.bf16 %v4386_v12, %v4386_v12  ;;  %v4390_v1 = vrot.slane %v4386_v12, 2  ;;  %v4394_v10 = vrot.slane %v4386_v12, 4  ;;  %v4398_v30 = vrot.slane %v4386_v12, 6 }
 0x7e6   :  { %v5009_v47 = vpop.f32.mrf.mxu2 }
 0x7e7   :  { %4943 = vmatmul.bf16.vlgmr.msra.gmra.mxu1 %v4402_v54  ;;  %v4404_v61 = vpack.c.bf16 %v4390_v1, %v4390_v1  ;;  %v4406_v58 = vpack.c.bf16 %v4394_v10, %v4394_v10  ;;  %v4408_v59 = vpack.c.bf16 %v4398_v30, %v4398_v30 }
 0x7e9   :  { %4969 = vmatmul.bf16.vlgmr.msrb.gmra.mxu3 %v4404_v61 }
 0x7ee   :  { %v5011_v57 = vpop.f32.mrf.mxu2 }
 0x7f7   :  { %4995 = vmatmul.bf16.vlgmr.msrb.gmra.mxu1 %v4406_v58 }
 0x7f9   :  { %5021 = vmatmul.bf16.vlgmr.msra.gmra.mxu3 %v4408_v59 }
 0x864   :  { %v4944_v60 = vpop.f32.mrf.mxu1 }
 0x865   :  { %v4945_v41 = vadd.f32 %v4944_v60, %v4932_v3 }
 0x867   :  { %v4958_v13 = vadd.f32 %v4957_v19, %v4945_v41 }
 0x86c   :  { %v4946_v39 = vpop.f32.mrf.mxu1  ;;  %v4970_v16 = vpop.f32.mrf.mxu3 }
 0x86d   :  { %v4971_v14 = vadd.f32 %v4970_v16, %v4958_v13 }
 0x86f   :  { %v4984_v44 = vadd.f32 %v10400_v50, %v4971_v14 }
 0x874   :  { %v4972_v51 = vpop.f32.mrf.mxu3  ;;  %v4996_v52 = vpop.f32.mrf.mxu1 }
 0x875   :  { %v4997_v38 = vadd.f32 %v4996_v52, %v4984_v44 }
 0x877   :  { %v5010_v24 = vadd.f32 %v5009_v47, %v4997_v38 }
 0x87c   :  { %v4998_v49 = vpop.f32.mrf.mxu1  ;;  %v5022_v63 = vpop.f32.mrf.mxu3 }
 0x87d   :  { %v5023_v0 = vadd.f32 %v5022_v63, %v5010_v24 }
 0x87f   :  { %5026 = vst [vmem:[%s10453_s8] sm:$0x3] %v5023_v0 }
 0x884   :  { %v5024_v21 = vpop.f32.mrf.mxu3 }

</bundles_post_ra>
